<compile_context>
chip_gen: v6e
topology: v6e:2x2x1
jax: 0.10.0
libtpu: 0.0.40
codegen_flags: <defaults>
</compile_context>

<pallas_src>
import functools
import math

import jax
import jax.numpy as jnp
from jax.experimental import pallas as pl
from jax.experimental.pallas import tpu as pltpu


def _round_up(x, m):
    return (x + m - 1) // m * m


def _cdiv(a, b):
    return -(-a // b)


# ------------------------------------------------------------------
# Pallas kernel: one block of E_blk epochs, folded onto the lane axis
# ------------------------------------------------------------------
def unet_block_kernel(x_ref, te_ref, w1_ref, w2_ref, b2_ref, o_ref, *, t):
    """
    x_ref : (C_pad, E_blk*T)   activations (epochs folded on lanes), compute dtype
    te_ref: (H_pad, E_blk*T)   SiLU(temb @ wt + bt) + b1, pre-broadcast over T (f32)
    w1_ref: (3, H_pad, C_pad)  conv1 weights per tap (left / center / right)
    w2_ref: (3, C_pad, H_pad)  conv2 weights per tap
    b2_ref: (C_pad, 1)         conv2 bias (f32)
    o_ref : (C_pad, E_blk*T)   f32 output
    """
    x = x_ref[...]
    n = x.shape[1]

    # lane -> position inside its epoch; masks the k=+-1 taps at epoch edges
    tpos = jax.lax.broadcasted_iota(jnp.int32, (1, n), 1) % t
    keep_l = tpos != 0              # no t-1 neighbour at tau == 0
    keep_r = tpos != (t - 1)        # no t+1 neighbour at tau == t-1

    def tap_left(a):                # value at position tau-1 (zero-padded)
        return jnp.where(keep_l, pltpu.roll(a, shift=1, axis=1),
                         jnp.zeros((), a.dtype))

    def tap_right(a):               # value at position tau+1 (zero-padded)
        return jnp.where(keep_r, pltpu.roll(a, shift=n - 1, axis=1),
                         jnp.zeros((), a.dtype))

    # conv1d (k=3, padding=1): 3 accumulate matmuls, no 3x-sized taps concat
    h = jnp.dot(w1_ref[0], tap_left(x), preferred_element_type=jnp.float32)
    h = h + jnp.dot(w1_ref[1], x, preferred_element_type=jnp.float32)
    h = h + jnp.dot(w1_ref[2], tap_right(x), preferred_element_type=jnp.float32)

    # + per-epoch time embedding (pre-broadcast over T; conv1 bias folded in); SiLU
    h = h + te_ref[...]
    h = h * jax.nn.sigmoid(h)
    h = h.astype(x.dtype)           # back to compute dtype for the second conv

    # conv1d (k=3, padding=1)
    out = jnp.dot(w2_ref[0], tap_left(h), preferred_element_type=jnp.float32)
    out = out + jnp.dot(w2_ref[1], h, preferred_element_type=jnp.float32)
    out = out + jnp.dot(w2_ref[2], tap_right(h), preferred_element_type=jnp.float32)
    out = out + b2_ref[...]
    o_ref[...] = out.astype(o_ref.dtype)


# ------------------------------------------------------------------
# Helpers: timestep embedding + params (the synthetic UNet)
# ------------------------------------------------------------------
def sinusoidal_embedding(timesteps, dim):
    half = dim // 2
    freqs = jnp.exp(-jnp.log(10000.0) * jnp.arange(half, dtype=jnp.float32) / half)
    args = timesteps.astype(jnp.float32)[:, None] * freqs[None, :]
    return jnp.concatenate([jnp.sin(args), jnp.cos(args)], axis=-1)   # (epochs, dim)


def init_params(key, channels, hidden, emb_dim):
    ks = jax.random.split(key, 6)
    scale1 = 1.0 / jnp.sqrt(channels * 3.0)
    scale2 = 1.0 / jnp.sqrt(hidden * 3.0)
    scalet = 1.0 / jnp.sqrt(float(emb_dim))
    return dict(
        w1=jax.random.normal(ks[0], (3, hidden, channels), jnp.float32) * scale1,
        b1=jnp.zeros((hidden, 1), jnp.float32),
        wt=jax.random.normal(ks[1], (emb_dim, hidden), jnp.float32) * scalet,
        bt=jnp.zeros((1, hidden), jnp.float32),
        w2=jax.random.normal(ks[2], (3, channels, hidden), jnp.float32) * scale2,
        b2=jnp.zeros((channels, 1), jnp.float32),
    )


# ------------------------------------------------------------------
# Epoch blocking: lane-dense, VMEM-capped, even grid for v7x megacore
# ------------------------------------------------------------------
def _choose_epoch_block(num_epochs, t, epoch_block, n_blk_cap):
    lane_mult = 128 // math.gcd(t, 128)      # e_blk multiple -> (e_blk*t) % 128 == 0
    min_eblk = _cdiv(2048, t)                # target >= 2048 lane columns per step
    cap_eblk = max(1, n_blk_cap // t)        # VMEM-driven cap on lane columns per step
    e_blk = min(max(epoch_block, min_eblk), cap_eblk)
    if e_blk >= num_epochs:
        return num_epochs, num_epochs, 1     # one full block (lane tiling exempt)
    e_blk = _round_up(e_blk, lane_mult)
    if e_blk >= num_epochs:
        return num_epochs, num_epochs, 1
    e_pad = _round_up(num_epochs, e_blk)
    grid = e_pad // e_blk
    # v7x megacore: prefer an even number of "parallel" grid steps (2 TensorCores).
    if grid > 1 and grid % 2 == 1:
        g2 = grid - 1
        eb2 = _round_up(_cdiv(num_epochs, g2), lane_mult)
        if eb2 < num_epochs and eb2 * t <= 2 * n_blk_cap:
            e_blk = eb2
            e_pad = _round_up(num_epochs, e_blk)
            grid = e_pad // e_blk
    return e_blk, e_pad, grid


# ------------------------------------------------------------------
# Wrapper: PatientDiffusionWrapper.forward semantics + pallas_call
# ------------------------------------------------------------------
@functools.partial(jax.jit, static_argnames=("emb_dim", "epoch_block",
                                             "compute_dtype", "n_blk_cap"))
def patient_diffusion_forward(x, timesteps, params, *, emb_dim=16, epoch_block=16,
                              compute_dtype=jnp.float32, n_blk_cap=16384,
                              context=None, y=None):
    """Equivalent of PatientDiffusionWrapper.forward (synthetic conv1d UNet block).

    x:         [epochs, channels, timepoints]  float32
    timesteps: [1] (or [epochs]) int/float, or None
    returns:   [epochs, channels, timepoints]  float32
    """
    # TODO(synk): context / y conditioning are accepted but unused by this synthetic UNet.
    del context, y
    num_epochs, c, t = x.shape
    hidden = params["w1"].shape[1]

    # --- timestep handling (timesteps.repeat(num_epochs)) ---
    if timesteps is not None:
        if timesteps.shape[0] == 1:
            timesteps = jnp.repeat(timesteps, num_epochs)
    else:
        timesteps = jnp.zeros((num_epochs,), jnp.float32)

    # --- per-epoch time-embedding MLP, hoisted out of the kernel ---
    temb = sinusoidal_embedding(timesteps, emb_dim)               # (E, emb)
    te = temb @ params["wt"] + params["bt"]                       # (E, H)
    te = te * jax.nn.sigmoid(te)                                  # SiLU
    te = te + params["b1"][:, 0][None, :]                         # fold conv1 bias in

    # --- padding / blocking (sublane multiple depends on compute dtype) ---
    sub = 16 if jnp.dtype(compute_dtype).itemsize == 2 else 8
    c_pad = _round_up(c, sub)
    h_pad = _round_up(hidden, sub)
    e_blk, e_pad, grid = _choose_epoch_block(num_epochs, t, epoch_block, n_blk_cap)
    n_blk = e_blk * t

    # --- fold epochs onto the lane axis (layout plumbing in plain JAX) ---
    # TODO(synk): at production epochs*T, avoid this extra HBM pass via
    # CompilerParams(allow_input_fusion=...) or a consumer taking the folded layout.
    x_p = jnp.pad(x, ((0, e_pad - num_epochs), (0, c_pad - c), (0, 0)))
    x_folded = jnp.transpose(x_p, (1, 0, 2)).reshape(c_pad, e_pad * t)
    x_folded = x_folded.astype(compute_dtype)

    te_p = jnp.pad(te, ((0, e_pad - num_epochs), (0, h_pad - hidden)))
    te_full = jnp.broadcast_to(te_p.T[:, :, None], (h_pad, e_pad, t))
    te_full = te_full.reshape(h_pad, e_pad * t).astype(jnp.float32)

    # --- per-tap conv weights (tap axis leads so the kernel indexes w_ref[k]) ---
    w1 = jnp.pad(params["w1"], ((0, 0), (0, h_pad - hidden), (0, c_pad - c)))
    w2 = jnp.pad(params["w2"], ((0, 0), (0, c_pad - c), (0, h_pad - hidden)))
    w1 = w1.astype(compute_dtype)
    w2 = w2.astype(compute_dtype)
    b2 = jnp.pad(params["b2"], ((0, c_pad - c), (0, 0))).astype(jnp.float32)

    # --- explicit scoped-VMEM budget for the chosen tile (generation-safe clamp) ---
    in_bytes = jnp.dtype(compute_dtype).itemsize
    per_lane = (2 * (c_pad * in_bytes + h_pad * 4 + c_pad * 4)   # double-buffered x/te/out
                + 4 * (2 * c_pad + 3 * h_pad + c_pad))           # taps, h, out intermediates
    vmem_limit = int(min(max(2 * n_blk * per_lane + (4 << 20), 32 << 20), 64 << 20))

    full = lambda shape: pl.BlockSpec(shape, lambda i: (0,) * len(shape))

    out_folded = pl.pallas_call(
        functools.partial(unet_block_kernel, t=t),
        out_shape=jax.ShapeDtypeStruct((c_pad, e_pad * t), jnp.float32),
        grid=(grid,),                                            # one step per epoch block
        in_specs=[
            pl.BlockSpec((c_pad, n_blk), lambda i: (0, i)),      # x, epochs folded on lanes
            pl.BlockSpec((h_pad, n_blk), lambda i: (0, i)),      # pre-broadcast time emb
            full((3, h_pad, c_pad)),                             # conv1 weights (per tap)
            full((3, c_pad, h_pad)),                             # conv2 weights (per tap)
            full((c_pad, 1)),                                    # conv2 bias
        ],
        out_specs=pl.BlockSpec((c_pad, n_blk), lambda i: (0, i)),
        compiler_params=pltpu.CompilerParams(
            dimension_semantics=("parallel",),
            vmem_limit_bytes=vmem_limit),
    )(x_folded, te_full, w1, w2, b2)

    out = out_folded.reshape(c_pad, e_pad, t).transpose(1, 0, 2)  # (E_pad, C_pad, T)
    return out[:num_epochs, :c, :]


# ------------------------------------------------------------------
# Pure-JAX reference (per-epoch loop + concat, like the PyTorch wrapper)
# ------------------------------------------------------------------
def reference_forward(x, timesteps, params, emb_dim=16):
    num_epochs = x.shape[0]
    if timesteps.shape[0] == 1:
        timesteps = jnp.repeat(timesteps, num_epochs)
    temb = sinusoidal_embedding(timesteps, emb_dim)

    def conv1d_k3(w, b, xin):  # w: (3, O, I), xin: (I, T)
        zc = jnp.zeros((xin.shape[0], 1), xin.dtype)
        xl = jnp.concatenate([zc, xin[:, :-1]], axis=1)
        xr = jnp.concatenate([xin[:, 1:], zc], axis=1)
        return w[0] @ xl + w[1] @ xin + w[2] @ xr + b

    outs = []
    for i in range(num_epochs):
        xi = x[i]
        h = conv1d_k3(params["w1"], params["b1"], xi)
        te = temb[i:i + 1] @ params["wt"] + params["bt"]
        te = te * jax.nn.sigmoid(te)
        h = h + te.T
        h = h * jax.nn.sigmoid(h)
        o = conv1d_k3(params["w2"], params["b2"], h)
        outs.append(o[None])
    return jnp.concatenate(outs, axis=0)


if __name__ == "__main__":
    EPOCHS, C, T = 24, 4, 128      # -> e_blk=16, grid=2 (lane-dense 2048-column tiles)
    HIDDEN, EMB = 32, 16

    key = jax.random.PRNGKey(0)
    kx, kp = jax.random.split(key)
    x = jax.random.normal(kx, (EPOCHS, C, T), jnp.float32)
    timesteps = jnp.array([37], dtype=jnp.int32)   # shape [1], like the wrapper expects
    params = init_params(kp, C, HIDDEN, EMB)

    ref = reference_forward(x, timesteps, params, emb_dim=EMB)

    # f32 path: tight correctness check
    out = patient_diffusion_forward(x, timesteps, params, emb_dim=EMB,
                                    epoch_block=16, compute_dtype=jnp.float32)
    out = jax.block_until_ready(out)
    assert out.shape == (EPOCHS, C, T)
    assert jnp.allclose(out, ref, atol=1e-3, rtol=1e-3), \
        float(jnp.max(jnp.abs(out - ref)))

    # bf16 operand path (v6e/v7x bandwidth/MXU win); f32 accumulation, looser tolerance
    out_bf16 = patient_diffusion_forward(x, timesteps, params, emb_dim=EMB,
                                         epoch_block=16, compute_dtype=jnp.bfloat16)
    out_bf16 = jax.block_until_ready(out_bf16)
    assert out_bf16.shape == (EPOCHS, C, T)
    assert jnp.allclose(out_bf16, ref, atol=8e-2, rtol=8e-2), \
        float(jnp.max(jnp.abs(out_bf16 - ref)))

    print("KERNEL_OK")
</pallas_src>

<mosaic_0001>
module attributes {stable_mosaic.version = 11 : i64} {
  func.func @unet_block_kernel(%arg0: i32, %arg1: memref<8x2048xf32, #tpu.memory_space<vmem>>, %arg2: memref<32x2048xf32, #tpu.memory_space<vmem>>, %arg3: memref<3x32x8xf32, #tpu.memory_space<vmem>>, %arg4: memref<3x8x32xf32, #tpu.memory_space<vmem>>, %arg5: memref<8x1xf32, #tpu.memory_space<vmem>>, %arg6: memref<8x2048xf32, #tpu.memory_space<vmem>>) attributes {dimension_semantics = [#tpu.dimension_semantics<parallel>], iteration_bounds = array<i64: 2>, scalar_prefetch = 0 : i64, scratch_operands = 0 : i64, tpu.core_type = #tpu.core_type<tc>, window_params = [{transform_indices = @transform_0, window_bounds = array<i64: 8, 2048>}, {transform_indices = @transform_1, window_bounds = array<i64: 32, 2048>}, {pipeline_mode = #tpu.pipeline_mode<synchronous>, transform_indices = @transform_2, window_bounds = array<i64: 3, 32, 8>}, {pipeline_mode = #tpu.pipeline_mode<synchronous>, transform_indices = @transform_3, window_bounds = array<i64: 3, 8, 32>}, {pipeline_mode = #tpu.pipeline_mode<synchronous>, transform_indices = @transform_4, window_bounds = array<i64: 8, 1>}, {transform_indices = @transform_5, window_bounds = array<i64: 8, 2048>}]} {
    %c0 = arith.constant 0 : index
    %c0_0 = arith.constant 0 : index
    %0 = vector.load %arg1[%c0, %c0_0] : memref<8x2048xf32, #tpu.memory_space<vmem>>, vector<8x2048xf32>
    %1 = tpu.iota {dimensions = array<i32: 1>} : vector<1x2048xi32>
    %c128_i32 = arith.constant 128 : i32
    %c0_i32 = arith.constant 0 : i32
    %2 = arith.cmpi eq, %c128_i32, %c0_i32 : i32
    %c1_i32 = arith.constant 1 : i32
    %3 = arith.select %2, %c1_i32, %c128_i32 : i32
    %4 = vector.broadcast %3 : i32 to vector<1x2048xi32>
    %5 = arith.remsi %1, %4 : vector<1x2048xi32>
    %c0_i32_1 = arith.constant 0 : i32
    %6 = vector.broadcast %c0_i32_1 : i32 to vector<1x2048xi32>
    %7 = arith.cmpi ne, %5, %6 : vector<1x2048xi32>
    %c0_i32_2 = arith.constant 0 : i32
    %8 = vector.broadcast %c0_i32_2 : i32 to vector<1x2048xi32>
    %9 = arith.cmpi slt, %5, %8 : vector<1x2048xi32>
    %c0_i32_3 = arith.constant 0 : i32
    %10 = arith.cmpi slt, %3, %c0_i32_3 : i32
    %11 = vector.broadcast %10 : i1 to vector<1x2048xi1>
    %12 = vector.broadcast %11 : vector<1x2048xi1> to vector<1x2048xi1>
    %13 = arith.xori %9, %12 : vector<1x2048xi1>
    %14 = arith.andi %13, %7 : vector<1x2048xi1>
    %15 = vector.broadcast %3 : i32 to vector<1x2048xi32>
    %16 = arith.addi %5, %15 : vector<1x2048xi32>
    %17 = arith.select %14, %16, %5 : vector<1x2048xi1>, vector<1x2048xi32>
    %c0_i32_4 = arith.constant 0 : i32
    %18 = vector.broadcast %c0_i32_4 : i32 to vector<1x2048xi32>
    %19 = arith.cmpi ne, %17, %18 : vector<1x2048xi32>
    %c127_i32 = arith.constant 127 : i32
    %20 = vector.broadcast %c127_i32 : i32 to vector<1x2048xi32>
    %21 = arith.cmpi ne, %17, %20 : vector<1x2048xi32>
    %c0_5 = arith.constant 0 : index
    %c0_6 = arith.constant 0 : index
    %c0_7 = arith.constant 0 : index
    %22 = vector.load %arg3[%c0_5, %c0_6, %c0_7] : memref<3x32x8xf32, #tpu.memory_space<vmem>>, vector<1x32x8xf32>
    %23 = vector.shape_cast %22 : vector<1x32x8xf32> to vector<32x8xf32>
    %c1_i32_8 = arith.constant 1 : i32
    %24 = tpu.dynamic_rotate %0 by %c1_i32_8 dim 1 : vector<8x2048xf32>, i32 -> vector<8x2048xf32>
    %cst = arith.constant 0.000000e+00 : f32
    %25 = vector.shape_cast %19 : vector<1x2048xi1> to vector<1x2048xi1>
    %26 = vector.broadcast %25 : vector<1x2048xi1> to vector<8x2048xi1>
    %27 = vector.broadcast %cst : f32 to vector<8x2048xf32>
    %28 = arith.select %26, %24, %27 : vector<8x2048xi1>, vector<8x2048xf32>
    %cst_9 = arith.constant dense<0.000000e+00> : vector<32x2048xf32>
    %29 = tpu.matmul %23, %28, %cst_9 {dimension_numbers = #tpu.dot_dimension_numbers<[1], [0], [0], [1], [0, 0, 1, 1], [], []>} : vector<32x8xf32>, vector<8x2048xf32>, vector<32x2048xf32> -> vector<32x2048xf32>
    %c1 = arith.constant 1 : index
    %c0_10 = arith.constant 0 : index
    %c0_11 = arith.constant 0 : index
    %30 = vector.load %arg3[%c1, %c0_10, %c0_11] : memref<3x32x8xf32, #tpu.memory_space<vmem>>, vector<1x32x8xf32>
    %31 = vector.shape_cast %30 : vector<1x32x8xf32> to vector<32x8xf32>
    %cst_12 = arith.constant dense<0.000000e+00> : vector<32x2048xf32>
    %32 = tpu.matmul %31, %0, %cst_12 {dimension_numbers = #tpu.dot_dimension_numbers<[1], [0], [0], [1], [0, 0, 1, 1], [], []>} : vector<32x8xf32>, vector<8x2048xf32>, vector<32x2048xf32> -> vector<32x2048xf32>
    %33 = arith.addf %29, %32 : vector<32x2048xf32>
    %c2 = arith.constant 2 : index
    %c0_13 = arith.constant 0 : index
    %c0_14 = arith.constant 0 : index
    %34 = vector.load %arg3[%c2, %c0_13, %c0_14] : memref<3x32x8xf32, #tpu.memory_space<vmem>>, vector<1x32x8xf32>
    %35 = vector.shape_cast %34 : vector<1x32x8xf32> to vector<32x8xf32>
    %c2047_i32 = arith.constant 2047 : i32
    %36 = tpu.dynamic_rotate %0 by %c2047_i32 dim 1 : vector<8x2048xf32>, i32 -> vector<8x2048xf32>
    %cst_15 = arith.constant 0.000000e+00 : f32
    %37 = vector.shape_cast %21 : vector<1x2048xi1> to vector<1x2048xi1>
    %38 = vector.broadcast %37 : vector<1x2048xi1> to vector<8x2048xi1>
    %39 = vector.broadcast %cst_15 : f32 to vector<8x2048xf32>
    %40 = arith.select %38, %36, %39 : vector<8x2048xi1>, vector<8x2048xf32>
    %cst_16 = arith.constant dense<0.000000e+00> : vector<32x2048xf32>
    %41 = tpu.matmul %35, %40, %cst_16 {dimension_numbers = #tpu.dot_dimension_numbers<[1], [0], [0], [1], [0, 0, 1, 1], [], []>} : vector<32x8xf32>, vector<8x2048xf32>, vector<32x2048xf32> -> vector<32x2048xf32>
    %42 = arith.addf %33, %41 : vector<32x2048xf32>
    %c0_17 = arith.constant 0 : index
    %c0_18 = arith.constant 0 : index
    %43 = vector.load %arg2[%c0_17, %c0_18] : memref<32x2048xf32, #tpu.memory_space<vmem>>, vector<32x2048xf32>
    %44 = arith.addf %42, %43 : vector<32x2048xf32>
    %45 = arith.negf %44 : vector<32x2048xf32>
    %46 = math.exp %45 : vector<32x2048xf32>
    %cst_19 = arith.constant 1.000000e+00 : f32
    %47 = vector.broadcast %cst_19 : f32 to vector<32x2048xf32>
    %48 = arith.addf %47, %46 : vector<32x2048xf32>
    %49 = arith.divf %47, %48 : vector<32x2048xf32>
    %50 = arith.mulf %44, %49 : vector<32x2048xf32>
    %c0_20 = arith.constant 0 : index
    %c0_21 = arith.constant 0 : index
    %c0_22 = arith.constant 0 : index
    %51 = vector.load %arg4[%c0_20, %c0_21, %c0_22] : memref<3x8x32xf32, #tpu.memory_space<vmem>>, vector<1x8x32xf32>
    %52 = vector.shape_cast %51 : vector<1x8x32xf32> to vector<8x32xf32>
    %c1_i32_23 = arith.constant 1 : i32
    %53 = tpu.dynamic_rotate %50 by %c1_i32_23 dim 1 : vector<32x2048xf32>, i32 -> vector<32x2048xf32>
    %cst_24 = arith.constant 0.000000e+00 : f32
    %54 = vector.shape_cast %19 : vector<1x2048xi1> to vector<1x2048xi1>
    %55 = vector.broadcast %54 : vector<1x2048xi1> to vector<32x2048xi1>
    %56 = vector.broadcast %cst_24 : f32 to vector<32x2048xf32>
    %57 = arith.select %55, %53, %56 : vector<32x2048xi1>, vector<32x2048xf32>
    %cst_25 = arith.constant dense<0.000000e+00> : vector<8x2048xf32>
    %58 = tpu.matmul %52, %57, %cst_25 {dimension_numbers = #tpu.dot_dimension_numbers<[1], [0], [0], [1], [0, 0, 1, 1], [], []>} : vector<8x32xf32>, vector<32x2048xf32>, vector<8x2048xf32> -> vector<8x2048xf32>
    %c1_26 = arith.constant 1 : index
    %c0_27 = arith.constant 0 : index
    %c0_28 = arith.constant 0 : index
    %59 = vector.load %arg4[%c1_26, %c0_27, %c0_28] : memref<3x8x32xf32, #tpu.memory_space<vmem>>, vector<1x8x32xf32>
    %60 = vector.shape_cast %59 : vector<1x8x32xf32> to vector<8x32xf32>
    %cst_29 = arith.constant dense<0.000000e+00> : vector<8x2048xf32>
    %61 = tpu.matmul %60, %50, %cst_29 {dimension_numbers = #tpu.dot_dimension_numbers<[1], [0], [0], [1], [0, 0, 1, 1], [], []>} : vector<8x32xf32>, vector<32x2048xf32>, vector<8x2048xf32> -> vector<8x2048xf32>
    %62 = arith.addf %58, %61 : vector<8x2048xf32>
    %c2_30 = arith.constant 2 : index
    %c0_31 = arith.constant 0 : index
    %c0_32 = arith.constant 0 : index
    %63 = vector.load %arg4[%c2_30, %c0_31, %c0_32] : memref<3x8x32xf32, #tpu.memory_space<vmem>>, vector<1x8x32xf32>
    %64 = vector.shape_cast %63 : vector<1x8x32xf32> to vector<8x32xf32>
    %c2047_i32_33 = arith.constant 2047 : i32
    %65 = tpu.dynamic_rotate %50 by %c2047_i32_33 dim 1 : vector<32x2048xf32>, i32 -> vector<32x2048xf32>
    %cst_34 = arith.constant 0.000000e+00 : f32
    %66 = vector.shape_cast %21 : vector<1x2048xi1> to vector<1x2048xi1>
    %67 = vector.broadcast %66 : vector<1x2048xi1> to vector<32x2048xi1>
    %68 = vector.broadcast %cst_34 : f32 to vector<32x2048xf32>
    %69 = arith.select %67, %65, %68 : vector<32x2048xi1>, vector<32x2048xf32>
    %cst_35 = arith.constant dense<0.000000e+00> : vector<8x2048xf32>
    %70 = tpu.matmul %64, %69, %cst_35 {dimension_numbers = #tpu.dot_dimension_numbers<[1], [0], [0], [1], [0, 0, 1, 1], [], []>} : vector<8x32xf32>, vector<32x2048xf32>, vector<8x2048xf32> -> vector<8x2048xf32>
    %71 = arith.addf %62, %70 : vector<8x2048xf32>
    %c0_36 = arith.constant 0 : index
    %c0_37 = arith.constant 0 : index
    %72 = vector.load %arg5[%c0_36, %c0_37] : memref<8x1xf32, #tpu.memory_space<vmem>>, vector<8x1xf32>
    %73 = vector.broadcast %72 : vector<8x1xf32> to vector<8x2048xf32>
    %74 = arith.addf %71, %73 : vector<8x2048xf32>
    %c0_38 = arith.constant 0 : index
    %c0_39 = arith.constant 0 : index
    %75 = vector.load %arg6[%c0_38, %c0_39] : memref<8x2048xf32, #tpu.memory_space<vmem>>, vector<8x2048xf32>
    tpu.vector_store %arg6[%c0_38, %c0_39], %74 {strides = array<i32>} : memref<8x2048xf32, #tpu.memory_space<vmem>>, vector<8x2048xf32>,
    return
  }
  func.func @transform_0(%arg0: i32) -> (i32, i32) {
    %c0_i32 = arith.constant 0 : i32
    %c0_i32_0 = arith.constant 0 : i32
    return %c0_i32, %arg0 : i32, i32
  }
  func.func @transform_1(%arg0: i32) -> (i32, i32) {
    %c0_i32 = arith.constant 0 : i32
    %c0_i32_0 = arith.constant 0 : i32
    return %c0_i32, %arg0 : i32, i32
  }
  func.func @transform_2(%arg0: i32) -> (i32, i32, i32) {
    %c0_i32 = arith.constant 0 : i32
    %c0_i32_0 = arith.constant 0 : i32
    %c0_i32_1 = arith.constant 0 : i32
    %c0_i32_2 = arith.constant 0 : i32
    return %c0_i32, %c0_i32_0, %c0_i32_1 : i32, i32, i32
  }
  func.func @transform_3(%arg0: i32) -> (i32, i32, i32) {
    %c0_i32 = arith.constant 0 : i32
    %c0_i32_0 = arith.constant 0 : i32
    %c0_i32_1 = arith.constant 0 : i32
    %c0_i32_2 = arith.constant 0 : i32
    return %c0_i32, %c0_i32_0, %c0_i32_1 : i32, i32, i32
  }
  func.func @transform_4(%arg0: i32) -> (i32, i32) {
    %c0_i32 = arith.constant 0 : i32
    %c0_i32_0 = arith.constant 0 : i32
    %c0_i32_1 = arith.constant 0 : i32
    return %c0_i32, %c0_i32_0 : i32, i32
  }
  func.func @transform_5(%arg0: i32) -> (i32, i32) {
    %c0_i32 = arith.constant 0 : i32
    %c0_i32_0 = arith.constant 0 : i32
    return %c0_i32, %arg0 : i32, i32
  }
}

</mosaic_0001>

<bundles_post_ra>
// kernel: patient_diffusion_forward.1
= control target key start
LH: loop header
LB: loop body
LE: loop exit
PB: predicated region body
PF: predicated region fallthrough
CT: control target
= control target key end

     0   :  { %s6745_s18 = smov 0   ;;  %s6747_s19 = smov 0   ;;  %s10340_s0 = inlined_call_operand.vmem [shape: f32[8,4096], index: 0, kind: input, shape index: {}]   ;;  %s10341_s1 = inlined_call_operand.vmem [shape: f32[32,4096], index: 1, kind: input, shape index: {}]   ;;  %s10342_s2 = inlined_call_operand.vmem [shape: f32[3,32,8], index: 2, kind: input, shape index: {}]   ;;  %s10343_s3 = inlined_call_operand.vmem [shape: f32[3,8,32], index: 3, kind: input, shape index: {}]   ;;  %s10344_s4 = inlined_call_operand.vmem [shape: f32[8,1], index: 4, kind: input, shape index: {}]   ;;  %s10345_s5 = inlined_call_operand.vmem [shape: f32[8,4096], index: 5, kind: output, shape index: {}]  }
   0x1   :  { %s6749_s20 = smov 0  }
   0x2 LB: > { %s6032_s21 = sadd.s32 4294967295, %s6709_s20   ;;  %s6762_s22 = sadd.s32 1, %s6709_s20   ;;  %s6709_s20 = sphi %s6749_s20, %s11124_s20   ;;  %s6705_s19 = sphi %s6747_s19, %s11123_s19   ;;  %s6701_s18 = sphi %s6745_s18, %s11122_s18  }
   0x3   : > { %s45_s23 = ssub.s32 %s6709_s20, %s6762_s22  ;;  %s48_s24 = sadd.s32 1, %s6705_s19 }
   0x4   : > { %p46_p0 = scmp.eq.s32.totalorder %s45_s23, 0  ;;  %p55_p1 = scmp.ne.s32.totalorder %s6705_s19, %s6701_s18 }
   0x5   : > { %p56_p2 = scmp.eq.s32.totalorder %s6709_s20, 0  ;;  %p6035_p4 = scmp.ge.s32.totalorder %s6709_s20, 2 }
   0x6   : > { %s6771_s25 = scalar_select %p46_p0, %s6705_s19, %s48_s24  }
   0x7   : > { %p57_p3 = por %p56_p2, %p55_p1  ;;  %179 = sbr.rel (%p6035_p4) target bundleno = 48 (0x30), region = 28 }
   0xc   : > { %191 = sbr.rel (!%p57_p3) target bundleno = 48 (0x30), region = 36  ;;  %s193_s26 = sand.u32 (%p57_p3), 1, %s6705_s19  }
   0xd   : > { %s6401_s27 = sshll.u32 (%p57_p3), %s6709_s20, 7  ;;  %s6036_s28 = sshll.u32 (%p57_p3), %s193_s26, 9 }
   0xe   : > { %s6779_s6 = scalar_lea.vmem (%p57_p3), %s10341_s1, %s6401_s27  ;;  %s6784_s7 = scalar_lea.vmem (%p57_p3), [#allocation2], %s6036_s28 }
   0xf   : > { %v211_v0 = vld [vmem:[%s6779_s6] sm:$0xff] (%p57_p3)  ;;  %v213_v1 = vld [vmem:[%s6779_s6 + $0x8] sm:$0xff] (%p57_p3)  ;;  %v215_v2 = vld [vmem:[%s6779_s6 + $0x10] sm:$0xff] (%p57_p3) }
  0x10   : > { %212 = vst [vmem:[%s6784_s7] sm:$0xff] (%p57_p3), %v211_v0  ;;  %214 = vst [vmem:[%s6784_s7 + $0x8] sm:$0xff] (%p57_p3), %v213_v1  ;;  %v217_v3 = vld [vmem:[%s6779_s6 + $0x18] sm:$0xff] (%p57_p3)  ;;  %v219_v4 = vld [vmem:[%s6779_s6 + $0x20] sm:$0xff] (%p57_p3) }
  0x11   : > { %216 = vst [vmem:[%s6784_s7 + $0x10] sm:$0xff] %v215_v2  ;;  %v221_v5 = vld [vmem:[%s6779_s6 + $0x28] sm:$0xff]  ;;  %218 = vst [vmem:[%s6784_s7 + $0x18] sm:$0xff] %v217_v3  ;;  %v223_v6 = vld [vmem:[%s6779_s6 + $0x30] sm:$0xff] }
  0x12   : > { %220 = vst [vmem:[%s6784_s7 + $0x20] sm:$0xff] %v219_v4  ;;  %222 = vst [vmem:[%s6784_s7 + $0x28] sm:$0xff] %v221_v5  ;;  %v225_v7 = vld [vmem:[%s6779_s6 + $0x38] sm:$0xff]  ;;  %v227_v8 = vld [vmem:[%s6779_s6 + $0x40] sm:$0xff] }
  0x13   : > { %224 = vst [vmem:[%s6784_s7 + $0x30] sm:$0xff] %v223_v6  ;;  %226 = vst [vmem:[%s6784_s7 + $0x38] sm:$0xff] %v225_v7  ;;  %v229_v9 = vld [vmem:[%s6779_s6 + $0x48] sm:$0xff]  ;;  %v231_v10 = vld [vmem:[%s6779_s6 + $0x50] sm:$0xff] }
  0x14   : > { %228 = vst [vmem:[%s6784_s7 + $0x40] sm:$0xff] %v227_v8  ;;  %v233_v11 = vld [vmem:[%s6779_s6 + $0x58] sm:$0xff]  ;;  %230 = vst [vmem:[%s6784_s7 + $0x48] sm:$0xff] %v229_v9  ;;  %v235_v12 = vld [vmem:[%s6779_s6 + $0x60] sm:$0xff] }
  0x15   : > { %232 = vst [vmem:[%s6784_s7 + $0x50] sm:$0xff] %v231_v10  ;;  %234 = vst [vmem:[%s6784_s7 + $0x58] sm:$0xff] %v233_v11  ;;  %v237_v13 = vld [vmem:[%s6779_s6 + $0x68] sm:$0xff]  ;;  %v239_v14 = vld [vmem:[%s6779_s6 + $0x70] sm:$0xff] }
  0x16   : > { %236 = vst [vmem:[%s6784_s7 + $0x60] sm:$0xff] %v235_v12  ;;  %238 = vst [vmem:[%s6784_s7 + $0x68] sm:$0xff] %v237_v13  ;;  %v241_v15 = vld [vmem:[%s6779_s6 + $0x78] sm:$0xff]  ;;  %v243_v16 = vld [vmem:[%s6779_s6 + $0x100] sm:$0xff] }
  0x17   : > { %240 = vst [vmem:[%s6784_s7 + $0x70] sm:$0xff] %v239_v14  ;;  %v245_v17 = vld [vmem:[%s6779_s6 + $0x108] sm:$0xff]  ;;  %242 = vst [vmem:[%s6784_s7 + $0x78] sm:$0xff] %v241_v15  ;;  %v247_v18 = vld [vmem:[%s6779_s6 + $0x110] sm:$0xff] }
  0x18   : > { %244 = vst [vmem:[%s6784_s7 + $0x80] sm:$0xff] %v243_v16  ;;  %246 = vst [vmem:[%s6784_s7 + $0x88] sm:$0xff] %v245_v17  ;;  %v249_v19 = vld [vmem:[%s6779_s6 + $0x118] sm:$0xff]  ;;  %v251_v20 = vld [vmem:[%s6779_s6 + $0x120] sm:$0xff] }
  0x19   : > { %248 = vst [vmem:[%s6784_s7 + $0x90] sm:$0xff] %v247_v18  ;;  %250 = vst [vmem:[%s6784_s7 + $0x98] sm:$0xff] %v249_v19  ;;  %v253_v21 = vld [vmem:[%s6779_s6 + $0x128] sm:$0xff]  ;;  %v255_v22 = vld [vmem:[%s6779_s6 + $0x130] sm:$0xff] }
  0x1a   : > { %252 = vst [vmem:[%s6784_s7 + $0xa0] sm:$0xff] %v251_v20  ;;  %v257_v23 = vld [vmem:[%s6779_s6 + $0x138] sm:$0xff]  ;;  %254 = vst [vmem:[%s6784_s7 + $0xa8] sm:$0xff] %v253_v21  ;;  %v259_v24 = vld [vmem:[%s6779_s6 + $0x140] sm:$0xff] }
  0x1b   : > { %256 = vst [vmem:[%s6784_s7 + $0xb0] sm:$0xff] %v255_v22  ;;  %258 = vst [vmem:[%s6784_s7 + $0xb8] sm:$0xff] %v257_v23  ;;  %v261_v25 = vld [vmem:[%s6779_s6 + $0x148] sm:$0xff]  ;;  %v263_v26 = vld [vmem:[%s6779_s6 + $0x150] sm:$0xff] }
  0x1c   : > { %260 = vst [vmem:[%s6784_s7 + $0xc0] sm:$0xff] %v259_v24  ;;  %262 = vst [vmem:[%s6784_s7 + $0xc8] sm:$0xff] %v261_v25  ;;  %v265_v27 = vld [vmem:[%s6779_s6 + $0x158] sm:$0xff]  ;;  %v267_v28 = vld [vmem:[%s6779_s6 + $0x160] sm:$0xff] }
  0x1d   : > { %264 = vst [vmem:[%s6784_s7 + $0xd0] sm:$0xff] %v263_v26  ;;  %v269_v29 = vld [vmem:[%s6779_s6 + $0x168] sm:$0xff]  ;;  %266 = vst [vmem:[%s6784_s7 + $0xd8] sm:$0xff] %v265_v27  ;;  %v271_v30 = vld [vmem:[%s6779_s6 + $0x170] sm:$0xff] }
  0x1e   : > { %268 = vst [vmem:[%s6784_s7 + $0xe0] sm:$0xff] %v267_v28  ;;  %270 = vst [vmem:[%s6784_s7 + $0xe8] sm:$0xff] %v269_v29  ;;  %v273_v31 = vld [vmem:[%s6779_s6 + $0x178] sm:$0xff]  ;;  %v275_v32 = vld [vmem:[%s6779_s6 + $0x200] sm:$0xff] }
  0x1f   : > { %272 = vst [vmem:[%s6784_s7 + $0xf0] sm:$0xff] %v271_v30  ;;  %274 = vst [vmem:[%s6784_s7 + $0xf8] sm:$0xff] %v273_v31  ;;  %v277_v33 = vld [vmem:[%s6779_s6 + $0x208] sm:$0xff]  ;;  %v279_v34 = vld [vmem:[%s6779_s6 + $0x210] sm:$0xff] }
  0x20   : > { %276 = vst [vmem:[%s6784_s7 + $0x100] sm:$0xff] %v275_v32  ;;  %v281_v35 = vld [vmem:[%s6779_s6 + $0x218] sm:$0xff]  ;;  %278 = vst [vmem:[%s6784_s7 + $0x108] sm:$0xff] %v277_v33  ;;  %v283_v36 = vld [vmem:[%s6779_s6 + $0x220] sm:$0xff] }
  0x21   : > { %280 = vst [vmem:[%s6784_s7 + $0x110] sm:$0xff] %v279_v34  ;;  %282 = vst [vmem:[%s6784_s7 + $0x118] sm:$0xff] %v281_v35  ;;  %v285_v37 = vld [vmem:[%s6779_s6 + $0x228] sm:$0xff]  ;;  %v287_v38 = vld [vmem:[%s6779_s6 + $0x230] sm:$0xff] }
  0x22   : > { %284 = vst [vmem:[%s6784_s7 + $0x120] sm:$0xff] %v283_v36  ;;  %286 = vst [vmem:[%s6784_s7 + $0x128] sm:$0xff] %v285_v37  ;;  %v289_v39 = vld [vmem:[%s6779_s6 + $0x238] sm:$0xff]  ;;  %v291_v40 = vld [vmem:[%s6779_s6 + $0x240] sm:$0xff] }
  0x23   : > { %288 = vst [vmem:[%s6784_s7 + $0x130] sm:$0xff] %v287_v38  ;;  %v293_v41 = vld [vmem:[%s6779_s6 + $0x248] sm:$0xff]  ;;  %290 = vst [vmem:[%s6784_s7 + $0x138] sm:$0xff] %v289_v39  ;;  %v295_v42 = vld [vmem:[%s6779_s6 + $0x250] sm:$0xff] }
  0x24   : > { %292 = vst [vmem:[%s6784_s7 + $0x140] sm:$0xff] %v291_v40  ;;  %294 = vst [vmem:[%s6784_s7 + $0x148] sm:$0xff] %v293_v41  ;;  %v297_v43 = vld [vmem:[%s6779_s6 + $0x258] sm:$0xff]  ;;  %v299_v44 = vld [vmem:[%s6779_s6 + $0x260] sm:$0xff] }
  0x25   : > { %296 = vst [vmem:[%s6784_s7 + $0x150] sm:$0xff] %v295_v42  ;;  %298 = vst [vmem:[%s6784_s7 + $0x158] sm:$0xff] %v297_v43  ;;  %v301_v45 = vld [vmem:[%s6779_s6 + $0x268] sm:$0xff]  ;;  %v303_v46 = vld [vmem:[%s6779_s6 + $0x270] sm:$0xff] }
  0x26   : > { %300 = vst [vmem:[%s6784_s7 + $0x160] sm:$0xff] %v299_v44  ;;  %v305_v47 = vld [vmem:[%s6779_s6 + $0x278] sm:$0xff]  ;;  %302 = vst [vmem:[%s6784_s7 + $0x168] sm:$0xff] %v301_v45  ;;  %v307_v48 = vld [vmem:[%s6779_s6 + $0x300] sm:$0xff] }
  0x27   : > { %304 = vst [vmem:[%s6784_s7 + $0x170] sm:$0xff] %v303_v46  ;;  %306 = vst [vmem:[%s6784_s7 + $0x178] sm:$0xff] %v305_v47  ;;  %v309_v49 = vld [vmem:[%s6779_s6 + $0x308] sm:$0xff]  ;;  %v311_v50 = vld [vmem:[%s6779_s6 + $0x310] sm:$0xff] }
  0x28   : > { %308 = vst [vmem:[%s6784_s7 + $0x180] sm:$0xff] %v307_v48  ;;  %310 = vst [vmem:[%s6784_s7 + $0x188] sm:$0xff] %v309_v49  ;;  %v313_v51 = vld [vmem:[%s6779_s6 + $0x318] sm:$0xff]  ;;  %v315_v52 = vld [vmem:[%s6779_s6 + $0x320] sm:$0xff] }
  0x29   : > { %312 = vst [vmem:[%s6784_s7 + $0x190] sm:$0xff] %v311_v50  ;;  %v317_v53 = vld [vmem:[%s6779_s6 + $0x328] sm:$0xff]  ;;  %314 = vst [vmem:[%s6784_s7 + $0x198] sm:$0xff] %v313_v51  ;;  %v319_v54 = vld [vmem:[%s6779_s6 + $0x330] sm:$0xff] }
  0x2a   : > { %316 = vst [vmem:[%s6784_s7 + $0x1a0] sm:$0xff] %v315_v52  ;;  %318 = vst [vmem:[%s6784_s7 + $0x1a8] sm:$0xff] %v317_v53  ;;  %v321_v55 = vld [vmem:[%s6779_s6 + $0x338] sm:$0xff]  ;;  %v323_v56 = vld [vmem:[%s6779_s6 + $0x340] sm:$0xff] }
  0x2b   : > { %320 = vst [vmem:[%s6784_s7 + $0x1b0] sm:$0xff] %v319_v54  ;;  %322 = vst [vmem:[%s6784_s7 + $0x1b8] sm:$0xff] %v321_v55  ;;  %v325_v57 = vld [vmem:[%s6779_s6 + $0x348] sm:$0xff]  ;;  %v327_v58 = vld [vmem:[%s6779_s6 + $0x350] sm:$0xff] }
  0x2c   : > { %324 = vst [vmem:[%s6784_s7 + $0x1c0] sm:$0xff] %v323_v56  ;;  %v329_v59 = vld [vmem:[%s6779_s6 + $0x358] sm:$0xff]  ;;  %326 = vst [vmem:[%s6784_s7 + $0x1c8] sm:$0xff] %v325_v57  ;;  %v331_v60 = vld [vmem:[%s6779_s6 + $0x360] sm:$0xff] }
  0x2d   : > { %328 = vst [vmem:[%s6784_s7 + $0x1d0] sm:$0xff] %v327_v58  ;;  %330 = vst [vmem:[%s6784_s7 + $0x1d8] sm:$0xff] %v329_v59  ;;  %v333_v61 = vld [vmem:[%s6779_s6 + $0x368] sm:$0xff]  ;;  %v335_v62 = vld [vmem:[%s6779_s6 + $0x370] sm:$0xff] }
  0x2e   : > { %332 = vst [vmem:[%s6784_s7 + $0x1e0] sm:$0xff] %v331_v60  ;;  %334 = vst [vmem:[%s6784_s7 + $0x1e8] sm:$0xff] %v333_v61  ;;  %v337_v63 = vld [vmem:[%s6779_s6 + $0x378] sm:$0xff] }
  0x2f   : > { %336 = vst [vmem:[%s6784_s7 + $0x1f0] sm:$0xff] %v335_v62  ;;  %338 = vst [vmem:[%s6784_s7 + $0x1f8] sm:$0xff] %v337_v63 }
  0x30 PF: > { %p6039_p5 = scmp.ge.s32.totalorder %s6709_s20, 1  ;;  %p343_p6 = scmp.lt.s32.totalorder %s6709_s20, 3 }
  0x32   : > { %p344_p7 = pnand %p6039_p5, %p343_p6 }
  0x34   : > { %347 = sbr.rel (%p344_p7) target bundleno = 1091 (0x443), region = 59 }
  0x39   : > { %s6041_s8 = sshll.u32 %s6032_s21, 4  ;;  %v10408_v0 = vmov 0.0   ;;  %s6712_s13 = smov 1   ;;  %v6943_v4 = vld [vmem:[%s10342_s2 + $0x20] sm:$0xff]  ;;  %vm10347_vm0 = vcmask 64512   ;;  %v6966_v7 = vld [vmem:[%s10342_s2 + $0x28] sm:$0xff]  ;;  %v411_v21 = vlaneseq }
  0x3a   : > { %p383_p8 = scmp.lt.s32.totalorder %s6041_s8, 31  ;;  %924 = vmatprep.mubr.f32.mxu1 %v10408_v0  ;;  %835 = vmatprep.mubr.f32.mxu0 %v10408_v0  ;;  %v6989_v10 = vld [vmem:[%s10342_s2 + $0x30] sm:$0xff]  ;;  %v7009_v13 = vld [vmem:[%s10342_s2 + $0x38] sm:$0xff]  ;;  %s6713_s26 = smov 127   ;;  %v10514_v31 = vmov 0  ;;  %v10517_v36 = vmov 0 }
  0x3b   : > { %v7156_v22 = vand.u32 127, %v411_v21  ;;  %v7195_v39 = vld [vmem:[%s10342_s2] sm:$0xff]  ;;  %v10520_v41 = vmov 0  ;;  %v10523_v46 = vmov 0  ;;  %v7232_v49 = vld [vmem:[%s10342_s2 + $0x8] sm:$0xff]  ;;  %v10526_v50 = vmov 0 }
  0x3c   : > { %s11126_s8 = smov (!%p383_p8, %s6041_s8), 31  ;;  %v7262_v58 = vld [vmem:[%s10342_s2 + $0x10] sm:$0xff]  ;;  %v10529_v61 = vmov 0  ;;  %s350_s24 = sand.u32 1, %s6701_s18  }
  0x3d   : > { %s6042_s9 = sshll.u32 %s11126_s8, 3  ;;  %10513 = vst [vmem:[#allocation3_spill] sm:$0xff] %v7156_v22  ;;  %v7159_v23 = vadd.s32 384, %v7156_v22  ;;  %v7162_v24 = vadd.s32 256, %v7156_v22  ;;  %v7166_v26 = vadd.s32 896, %v7156_v22  ;;  %v7170_v30 = vadd.s32 768, %v7156_v22 }
  0x3e   : > { %s6925_s12 = scalar_lea.vmem %s10340_s0, %s6042_s9  ;;  %vm10348_vm1 = vcmp.lt.s32.totalorder %v7156_v22, 1  ;;  %v7181_v33 = vadd.s32 128, %v7156_v22  ;;  %v7211_v43 = vadd.s32 1408, %v7156_v22  ;;  %v7245_v51 = vadd.s32 640, %v7156_v22  ;;  %s6040_s27 = sshll.u32 %s350_s24, 9 }
  0x3f   : > { %v6928_v1 = vld [vmem:[%s6925_s12 + $0x10] sm:$0xff]  ;;  %v6931_v2 = vld [vmem:[%s6925_s12 + $0x8] sm:$0xff]  ;;  %v6938_v3 = vld [vmem:[%s6925_s12 + $0x18] sm:$0xff]  ;;  %v453_v25 = vand.u32 127, %v7159_v23  ;;  %v446_v29 = vand.u32 127, %v7162_v24  ;;  %v481_v32 = vand.u32 127, %v7166_v26  ;;  %s10284_s14 = scalar_lea.vmem %s10345_s5, %s6042_s9 }
  0x40   : > { %660 = vrot.lane.b32.xlu0 %v6928_v1, %s6712_s13  ;;  %658 = vrot.lane.b32.xlu1 %v6931_v2, %s6712_s13  ;;  %v6946_v5 = vld [vmem:[%s6925_s12 + $0x30] sm:$0xff]  ;;  %v6949_v6 = vld [vmem:[%s6925_s12] sm:$0xff]  ;;  %v474_v37 = vand.u32 127, %v7170_v30  ;;  %v439_v42 = vand.u32 127, %v7181_v33  ;;  %v509_v52 = vand.u32 127, %v7211_v43  ;;  %vm10346_vm7 = vcmp.ne.s32.totalorder %v7156_v22, 0 }
  0x41   : > { %890 = vmatprep.subr.mxu1 %v6938_v3  ;;  %801 = vmatprep.subr.mxu0 %v6931_v2  ;;  %v6969_v8 = vld [vmem:[%s6925_s12 + $0x38] sm:$0xff]  ;;  %v6972_v9 = vld [vmem:[%s6925_s12 + $0x28] sm:$0xff]  ;;  %v399_v12 = vld [vmem:[%s6925_s12 + $0x20] sm:$0xff]  ;;  %vm7175_vm2 = vcmp.ne.s32.totalorder %v453_v25, 0  ;;  %vm7185_vm3 = vcmp.ne.s32.totalorder %v446_v29, 0  ;;  %vm7205_vm4 = vcmp.ne.s32.totalorder %v481_v32, 0 }
  0x42   : > { %891 = vmatpush1.msra.mxu1 %v6928_v1  ;;  %802 = vmatpush1.msra.mxu0 %v6949_v6  ;;  %v6992_v11 = vld [vmem:[%s6925_s12 + $0x78] sm:$0xff]  ;;  %v7015_v15 = vld [vmem:[%s6925_s12 + $0x50] sm:$0xff]  ;;  %v7018_v16 = vld [vmem:[%s6925_s12 + $0x48] sm:$0xff]  ;;  %v10515_v31 = vsel %vm7175_vm2, 4294967295, %v10514_v31  ;;  %v10518_v36 = vsel %vm7185_vm3, 4294967295, %v10517_v36  ;;  %v10521_v41 = vsel %vm7205_vm4, 4294967295, %v10520_v41 }
  0x43   : > { %6053 = vmatmul.mubr.msk.f32.vlgmr.msra.gmra.mxu1 %vm10347_vm0, %v6943_v4  ;;  %6049 = vmatmul.mubr.msk.f32.vlgmr.msra.gmra.mxu0 %vm10347_vm0, %v6943_v4  ;;  %v7012_v14 = vld [vmem:[%s6925_s12 + $0x58] sm:$0xff]  ;;  %v7042_v17 = vld [vmem:[%s6925_s12 + $0x70] sm:$0xff]  ;;  %v7045_v18 = vld [vmem:[%s6925_s12 + $0x68] sm:$0xff]  ;;  %10516 = vst [vmem:[#allocation4_spill] sm:$0xff] %v10515_v31  ;;  %vm7219_vm5 = vcmp.ne.s32.totalorder %v474_v37, 0  ;;  %vm7240_vm6 = vcmp.ne.s32.totalorder %v439_v42, 0 }
  0x44   : > { %662 = vrot.lane.b32.xlu0 %v6938_v3, %s6712_s13  ;;  %668 = vrot.lane.b32.xlu1 %v6946_v5, %s6712_s13  ;;  %v403_v19 = vld [vmem:[%s6925_s12 + $0x40] sm:$0xff]  ;;  %10519 = vst [vmem:[#allocation5_spill] sm:$0xff] %v10518_v36  ;;  %10522 = vst [vmem:[#allocation6_spill] sm:$0xff] %v10521_v41  ;;  %v10524_v46 = vsel %vm7219_vm5, 4294967295, %v10523_v46  ;;  %v10527_v50 = vsel %vm7240_vm6, 4294967295, %v10526_v50  ;;  %v7252_v55 = vadd.s32 512, %v7156_v22 }
  0x45   : > { %930 = vmatprep.mubr.f32.mxu1 %v10408_v0  ;;  %841 = vmatprep.mubr.f32.mxu0 %v10408_v0  ;;  %v407_v20 = vld [vmem:[%s6925_s12 + $0x60] sm:$0xff]  ;;  %10525 = vst [vmem:[#allocation7_spill] sm:$0xff] %v10524_v46  ;;  %10528 = vst [vmem:[#allocation8_spill] sm:$0xff] %v10527_v50  ;;  %v7267_v59 = vadd.s32 1280, %v7156_v22  ;;  %v467_v60 = vand.u32 127, %v7245_v51  ;;  %vm7274_vm8 = vcmp.ne.s32.totalorder %v509_v52, 0 }
  0x46   : > { %1068 = vmatprep.subr.mxu1 %v6969_v8  ;;  %979 = vmatprep.subr.mxu0 %v6972_v9  ;;  %v10530_v61 = vsel %vm7274_vm8, 4294967295, %v10529_v61  ;;  %v7279_v62 = vadd.s32 1920, %v7156_v22  ;;  %v7597_v30 = vld [vmem:[%s10342_s2 + $0x48] sm:$0xff]  ;;  %s8048_s18 = scalar_lea.vmem [#allocation2], %s6040_s27 }
  0x47   : > { %6054 = vmatmul.mubr.msk.f32.gmra.mxu1 %vm10347_vm0, %v6966_v7  ;;  %6050 = vmatmul.mubr.msk.f32.gmra.mxu0 %vm10347_vm0, %v6966_v7  ;;  %10531 = vst [vmem:[#allocation9_spill] sm:$0xff] %v10530_v61  ;;  %vm7303_vm9 = vcmp.ne.s32.totalorder %v467_v60, 0 }
  0x48   : > { %670 = vrot.lane.b32.xlu0 %v6969_v8, %s6712_s13  ;;  %666 = vrot.lane.b32.xlu1 %v6972_v9, %s6712_s13 }
  0x49   : > { %936 = vmatprep.mubr.f32.mxu1 %v10408_v0  ;;  %847 = vmatprep.mubr.f32.mxu0 %v10408_v0 }
  0x4a   : > { %1069 = vmatpush1.msra.mxu1 %v6946_v5  ;;  %980 = vmatpush1.msra.mxu0 %v399_v12 }
  0x4b   : > { %6055 = vmatmul.mubr.msk.f32.gmra.mxu1 %vm10347_vm0, %v6989_v10  ;;  %6051 = vmatmul.mubr.msk.f32.gmra.mxu0 %vm10347_vm0, %v6989_v10 }
  0x4c   : > { %686 = vrot.lane.b32.xlu1 %v6992_v11, %s6712_s13  ;;  %656 = vrot.lane.b32.xlu0 %v6949_v6, %s6712_s13 }
  0x4d   : > { %942 = vmatprep.mubr.f32.mxu1 %v10408_v0  ;;  %853 = vmatprep.mubr.f32.mxu0 %v10408_v0 }
  0x4e   : > { %1246 = vmatprep.subr.mxu1 %v7012_v14  ;;  %1157 = vmatprep.subr.mxu0 %v7018_v16 }
  0x4f   : > { %6056 = vmatmul.mubr.msk.f32.gmra.mxu1 %vm10347_vm0, %v7009_v13  ;;  %6052 = vmatmul.mubr.msk.f32.gmra.mxu0 %vm10347_vm0, %v7009_v13 }
  0x50   : > { %678 = vrot.lane.b32.xlu1 %v7012_v14, %s6712_s13  ;;  %676 = vrot.lane.b32.xlu0 %v7015_v15, %s6712_s13 }
  0x51   : > { %1102 = vmatprep.mubr.f32.mxu1 %v10408_v0  ;;  %1013 = vmatprep.mubr.f32.mxu0 %v10408_v0 }
  0x53   : > { %6061 = vmatmul.mubr.msk.f32.vlgmr.msra.gmra.mxu1 %vm10347_vm0, %v6943_v4  ;;  %6057 = vmatmul.mubr.msk.f32.vlgmr.msra.gmra.mxu0 %vm10347_vm0, %v6943_v4 }
  0x54   : > { %664 = vrot.lane.b32.xlu1 %v399_v12, %s6712_s13  ;;  %674 = vrot.lane.b32.xlu0 %v7018_v16, %s6712_s13 }
  0x55   : > { %1108 = vmatprep.mubr.f32.mxu1 %v10408_v0  ;;  %1019 = vmatprep.mubr.f32.mxu0 %v10408_v0 }
  0x56   : > { %1247 = vmatpush1.msra.mxu1 %v7015_v15  ;;  %1158 = vmatpush1.msra.mxu0 %v403_v19 }
  0x57   : > { %6062 = vmatmul.mubr.msk.f32.gmra.mxu1 %vm10347_vm0, %v6966_v7  ;;  %6058 = vmatmul.mubr.msk.f32.gmra.mxu0 %vm10347_vm0, %v6966_v7 }
  0x58   : > { %684 = vrot.lane.b32.xlu0 %v7042_v17, %s6712_s13  ;;  %682 = vrot.lane.b32.xlu1 %v7045_v18, %s6712_s13 }
  0x59   : > { %1114 = vmatprep.mubr.f32.mxu1 %v10408_v0  ;;  %1025 = vmatprep.mubr.f32.mxu0 %v10408_v0 }
  0x5a   : > { %1424 = vmatprep.subr.mxu1 %v6992_v11  ;;  %1335 = vmatprep.subr.mxu0 %v7045_v18 }
  0x5b   : > { %6063 = vmatmul.mubr.msk.f32.gmra.mxu1 %vm10347_vm0, %v6989_v10  ;;  %6059 = vmatmul.mubr.msk.f32.gmra.mxu0 %vm10347_vm0, %v6989_v10 }
  0x5c   : > { %672 = vrot.lane.b32.xlu0 %v403_v19, %s6712_s13  ;;  %2218 = vrot.lane.b32.xlu1 %v6938_v3, %s6713_s26  ;;  %v7293_v3 = vld [vmem:[%s10342_s2 + $0x18] sm:$0xff] }
  0x5d   : > { %1120 = vmatprep.mubr.f32.mxu1 %v10408_v0  ;;  %1031 = vmatprep.mubr.f32.mxu0 %v10408_v0 }
  0x5f   : > { %6064 = vmatmul.mubr.msk.f32.gmra.mxu1 %vm10347_vm0, %v7009_v13  ;;  %6060 = vmatmul.mubr.msk.f32.gmra.mxu0 %vm10347_vm0, %v7009_v13 }
  0x60   : > { %2220 = vrot.lane.b32.xlu0 %v399_v12, %s6713_s26  ;;  %2216 = vrot.lane.b32.xlu1 %v6928_v1, %s6713_s26 }
  0x61   : > { %1280 = vmatprep.mubr.f32.mxu1 %v10408_v0  ;;  %1191 = vmatprep.mubr.f32.mxu0 %v10408_v0 }
  0x63   : > { %6069 = vmatmul.mubr.msk.f32.vlgmr.msra.gmra.mxu1 %vm10347_vm0, %v6943_v4  ;;  %6065 = vmatmul.mubr.msk.f32.vlgmr.msra.gmra.mxu0 %vm10347_vm0, %v6943_v4 }
  0x64   : > { %680 = vrot.lane.b32.xlu0 %v407_v20, %s6712_s13  ;;  %2226 = vrot.lane.b32.xlu1 %v6969_v8, %s6713_s26  ;;  %v7309_v8 = vadd.s32 1152, %v7156_v22 }
  0x65   : > { %1286 = vmatprep.mubr.f32.mxu1 %v10408_v0  ;;  %1197 = vmatprep.mubr.f32.mxu0 %v10408_v0 }
  0x66   : > { %1425 = vmatpush1.msra.mxu1 %v7042_v17  ;;  %1336 = vmatpush1.msra.mxu0 %v407_v20 }
  0x67   : > { %6070 = vmatmul.mubr.msk.f32.gmra.mxu1 %vm10347_vm0, %v6966_v7  ;;  %6066 = vmatmul.mubr.msk.f32.gmra.mxu0 %vm10347_vm0, %v6966_v7 }
  0x68   : > { %2224 = vrot.lane.b32.xlu1 %v6946_v5, %s6713_s26  ;;  %2228 = vrot.lane.b32.xlu0 %v403_v19, %s6713_s26  ;;  %v502_v5 = vand.u32 127, %v7267_v59 }
  0x69   : > { %1292 = vmatprep.mubr.f32.mxu1 %v10408_v0  ;;  %1203 = vmatprep.mubr.f32.mxu0 %v10408_v0 }
  0x6a   : > { %vm7333_vm11 = vcmp.ne.s32.totalorder %v502_v5, 0 }
  0x6b   : > { %6071 = vmatmul.mubr.msk.f32.gmra.mxu1 %vm10347_vm0, %v6989_v10  ;;  %6067 = vmatmul.mubr.msk.f32.gmra.mxu0 %vm10347_vm0, %v6989_v10 }
  0x6c   : > { %2212 = vrot.lane.b32.xlu1 %v6949_v6, %s6713_s26  ;;  %2214 = vrot.lane.b32.xlu0 %v6931_v2, %s6713_s26  ;;  %v460_v2 = vand.u32 127, %v7252_v55  ;;  %v10532_v6 = vmov 0  ;;  %v7640_v55 = vld [vmem:[%s10342_s2 + $0x58] sm:$0xff] }
  0x6d   : > { %1298 = vmatprep.mubr.f32.mxu1 %v10408_v0  ;;  %1209 = vmatprep.mubr.f32.mxu0 %v10408_v0  ;;  %v10533_v6 = vsel %vm7303_vm9, 4294967295, %v10532_v6 }
  0x6e   : > { %10534 = vst [vmem:[#allocation10_spill] sm:$0xff] %v10533_v6  ;;  %vm7317_vm10 = vcmp.ne.s32.totalorder %v460_v2, 0 }
  0x6f   : > { %6072 = vmatmul.mubr.msk.f32.gmra.mxu1 %vm10347_vm0, %v7009_v13  ;;  %6068 = vmatmul.mubr.msk.f32.gmra.mxu0 %vm10347_vm0, %v7009_v13 }
  0x70   : > { %2236 = vrot.lane.b32.xlu1 %v407_v20, %s6713_s26  ;;  %2234 = vrot.lane.b32.xlu0 %v7012_v14, %s6713_s26 }
  0x71   : > { %1458 = vmatprep.mubr.f32.mxu1 %v10408_v0  ;;  %1369 = vmatprep.mubr.f32.mxu0 %v10408_v0 }
  0x73   : > { %6077 = vmatmul.mubr.msk.f32.vlgmr.msra.gmra.mxu1 %vm10347_vm0, %v6943_v4  ;;  %6073 = vmatmul.mubr.msk.f32.vlgmr.msra.gmra.mxu0 %vm10347_vm0, %v6943_v4 }
  0x74   : > { %2222 = vrot.lane.b32.xlu1 %v6972_v9, %s6713_s26  ;;  %2232 = vrot.lane.b32.xlu0 %v7015_v15, %s6713_s26  ;;  %v10538_v15 = vmov 0 }
  0x75   : > { %1464 = vmatprep.mubr.f32.mxu1 %v10408_v0  ;;  %1375 = vmatprep.mubr.f32.mxu0 %v10408_v0  ;;  %v10539_v15 = vsel %vm7333_vm11, 4294967295, %v10538_v15 }
  0x76   : > { %10540 = vst [vmem:[#allocation12_spill] sm:$0xff] %v10539_v15 }
  0x77   : > { %6078 = vmatmul.mubr.msk.f32.gmra.mxu1 %vm10347_vm0, %v6966_v7  ;;  %6074 = vmatmul.mubr.msk.f32.gmra.mxu0 %vm10347_vm0, %v6966_v7  ;;  %v537_v7 = vand.u32 127, %v7279_v62 }
  0x78   : > { %2242 = vrot.lane.b32.xlu0 %v6992_v11, %s6713_s26  ;;  %1470 = vmatprep.mubr.f32.mxu1 %v10408_v0  ;;  %v10535_v11 = vmov 0 }
  0x79   : > { %2240 = vrot.lane.b32.xlu1 %v7042_v17, %s6713_s26  ;;  %1381 = vmatprep.mubr.f32.mxu0 %v10408_v0  ;;  %v10536_v11 = vsel %vm7317_vm10, 4294967295, %v10535_v11  ;;  %vm7344_vm12 = vcmp.ne.s32.totalorder %v537_v7, 0  ;;  %v10541_v17 = vmov 0 }
  0x7a   : > { %10537 = vst [vmem:[#allocation11_spill] sm:$0xff] %v10536_v11  ;;  %v10542_v17 = vsel %vm7344_vm12, 4294967295, %v10541_v17 }
  0x7b   : > { %6079 = vmatmul.mubr.msk.f32.gmra.mxu1 %vm10347_vm0, %v6989_v10  ;;  %6075 = vmatmul.mubr.msk.f32.gmra.mxu0 %vm10347_vm0, %v6989_v10  ;;  %10543 = vst [vmem:[#allocation13_spill] sm:$0xff] %v10542_v17 }
  0x7c   : > { %2230 = vrot.lane.b32.xlu0 %v7018_v16, %s6713_s26  ;;  %1476 = vmatprep.mubr.f32.mxu1 %v10408_v0  ;;  %v7338_v16 = vadd.s32 1024, %v7156_v22 }
  0x7d   : > { %2238 = vrot.lane.b32.xlu1 %v7045_v18, %s6713_s26  ;;  %1387 = vmatprep.mubr.f32.mxu0 %v10408_v0  ;;  %v495_v18 = vand.u32 127, %v7309_v8 }
  0x7f   : > { %6080 = vmatmul.mubr.msk.f32.gmra.mxu1 %vm10347_vm0, %v7009_v13  ;;  %6076 = vmatmul.mubr.msk.f32.gmra.mxu0 %vm10347_vm0, %v7009_v13  ;;  %vm7364_vm13 = vcmp.ne.s32.totalorder %v495_v18, 0 }
  0x80   : > { %1648 = vmatprep.mubr.f32.mxu1 %v10408_v0  ;;  %1559 = vmatprep.mubr.f32.mxu0 %v10408_v0 }
  0xb2   : > { %v661_v27 = vpop.permute.xlu0 %660  ;;  %v659_v28 = vpop.permute.xlu1 %658 }
  0xb3   : > { %v702_v40 = vsel %vm10348_vm1, %v659_v28, %v661_v27 }
  0xb6   : > { %v663_v34 = vpop.permute.xlu0 %662  ;;  %v669_v35 = vpop.permute.xlu1 %668 }
  0xb7   : > { %v701_v38 = vsel %vm10348_vm1, %v661_v27, %v663_v34  ;;  %v488_v27 = vand.u32 127, %v7338_v16 }
  0xb8   : > { %6087 = vmatprep.subr.msk.mxu1 %vm7175_vm2, %v701_v38 }
  0xb9   : > { %6088 = vmatpush1.msk.msra.mxu1 %vm7185_vm3, %v702_v40  ;;  %vm7383_vm14 = vcmp.ne.s32.totalorder %v488_v27, 0 }
  0xba   : > { %v7213_v44 = vpop.permute.xlu0 %670  ;;  %6089 = vmatmul.mubr.msk.f32.vlgmr.msra.gmra.mxu1 %vm10347_vm0, %v7195_v39  ;;  %v667_v45 = vpop.permute.xlu1 %666 }
  0xbb   : > { %v698_v47 = vsel %vm10348_vm1, %v667_v45, %v669_v35  ;;  %v697_v48 = vsel %vm10348_vm1, %v669_v35, %v7213_v44  ;;  %1654 = vmatprep.mubr.f32.mxu1 %v10408_v0 }
  0xbc   : > { %6099 = vmatprep.subr.msk.mxu1 %vm7205_vm4, %v697_v48 }
  0xbd   : > { %6100 = vmatpush1.msk.msra.mxu1 %vm7219_vm5, %v698_v47  ;;  %v7388_v47 = vadd.s32 1792, %v7156_v22 }
  0xbe   : > { %6090 = vmatmul.mubr.msk.f32.gmra.mxu1 %vm10347_vm0, %v7232_v49  ;;  %v687_v53 = vpop.permute.xlu1 %686  ;;  %v657_v54 = vpop.permute.xlu0 %656 }
  0xbf   : > { %v704_v56 = vsel %vm10348_vm1, %v687_v53, %v657_v54  ;;  %v703_v57 = vsel %vm10348_vm1, %v657_v54, %v659_v28  ;;  %1660 = vmatprep.mubr.f32.mxu1 %v10408_v0  ;;  %v10544_v28 = vmov 0 }
  0xc0   : > { %6081 = vmatprep.subr.msk.mxu0 %vm7240_vm6, %v703_v57  ;;  %v10545_v28 = vsel %vm7364_vm13, 4294967295, %v10544_v28  ;;  %v530_v57 = vand.u32 127, %v7388_v47 }
  0xc1   : > { %6082 = vmatpush1.msk.msra.mxu0 %vm10346_vm7, %v704_v56  ;;  %10546 = vst [vmem:[#allocation14_spill] sm:$0xff] %v10545_v28 }
  0xc2   : > { %6091 = vmatmul.mubr.msk.f32.gmra.mxu1 %vm10347_vm0, %v7262_v58  ;;  %v7283_v63 = vpop.permute.xlu1 %678  ;;  %v677_v1 = vpop.permute.xlu0 %676  ;;  %6083 = vmatmul.mubr.msk.f32.vlgmr.msra.gmra.mxu0 %vm10347_vm0, %v7195_v39  ;;  %vm7424_vm7 = vcmp.ne.s32.totalorder %v530_v57, 0 }
  0xc3   : > { %1565 = vmatprep.mubr.f32.mxu0 %v10408_v0  ;;  %1666 = vmatprep.mubr.f32.mxu1 %v10408_v0  ;;  %v693_v4 = vsel %vm10348_vm1, %v677_v1, %v7283_v63 }
  0xc4   : > { %6111 = vmatprep.subr.msk.mxu1 %vm7274_vm8, %v693_v4 }
  0xc6   : > { %6092 = vmatmul.mubr.msk.f32.gmra.mxu1 %vm10347_vm0, %v7293_v3  ;;  %v665_v9 = vpop.permute.xlu1 %664  ;;  %v675_v10 = vpop.permute.xlu0 %674  ;;  %6084 = vmatmul.mubr.msk.f32.gmra.mxu0 %vm10347_vm0, %v7232_v49 }
  0xc7   : > { %v700_v12 = vsel %vm10348_vm1, %v663_v34, %v665_v9  ;;  %v699_v13 = vsel %vm10348_vm1, %v665_v9, %v667_v45  ;;  %1571 = vmatprep.mubr.f32.mxu0 %v10408_v0  ;;  %1826 = vmatprep.mubr.f32.mxu1 %v10408_v0  ;;  %v694_v14 = vsel %vm10348_vm1, %v675_v10, %v677_v1  ;;  %v7369_v34 = vadd.s32 1664, %v7156_v22 }
  0xc8   : > { %6093 = vmatprep.subr.msk.mxu0 %vm7303_vm9, %v699_v13  ;;  %v10547_v45 = vmov 0 }
  0xc9   : > { %6094 = vmatpush1.msk.msra.mxu0 %vm7317_vm10, %v700_v12  ;;  %v10548_v45 = vsel %vm7383_vm14, 4294967295, %v10547_v45  ;;  %v523_v48 = vand.u32 127, %v7369_v34  ;;  %v7431_v12 = vadd.s32 1536, %v7156_v22 }
  0xca   : > { %6101 = vmatmul.mubr.msk.f32.vlgmr.msra.gmra.mxu1 %vm10347_vm0, %v7195_v39  ;;  %v685_v19 = vpop.permute.xlu0 %684  ;;  %6085 = vmatmul.mubr.msk.f32.gmra.mxu0 %vm10347_vm0, %v7262_v58  ;;  %v683_v20 = vpop.permute.xlu1 %682  ;;  %10549 = vst [vmem:[#allocation15_spill] sm:$0xff] %v10548_v45 }
  0xcb   : > { %6112 = vmatpush1.msk.msra.mxu1 %vm7333_vm11, %v694_v14  ;;  %v689_v21 = vsel %vm10348_vm1, %v685_v19, %v687_v53  ;;  %1577 = vmatprep.mubr.f32.mxu0 %v10408_v0  ;;  %vm7407_vm15 = vcmp.ne.s32.totalorder %v523_v48, 0  ;;  %v690_v9 = vsel %vm10348_vm1, %v683_v20, %v685_v19  ;;  %v10556_v14 = vmov 0 }
  0xcc   : > { %6123 = vmatprep.subr.msk.mxu1 %vm7344_vm12, %v689_v21  ;;  %1832 = vmatprep.mubr.f32.mxu1 %v10408_v0  ;;  %v516_v23 = vand.u32 127, %v7431_v12  ;;  %v10564_v21 = vmov 0 }
  0xce   : > { %6102 = vmatmul.mubr.msk.f32.gmra.mxu1 %vm10347_vm0, %v7232_v49  ;;  %v673_v35 = vpop.permute.xlu0 %672  ;;  %6086 = vmatmul.mubr.msk.f32.gmra.mxu0 %vm10347_vm0, %v7293_v3  ;;  %v2219_v38 = vpop.permute.xlu1 %2218 }
  0xcf   : > { %1737 = vmatprep.mubr.f32.mxu0 %v10408_v0  ;;  %1838 = vmatprep.mubr.f32.mxu1 %v10408_v0  ;;  %v695_v40 = vsel %vm10348_vm1, %v673_v35, %v675_v10  ;;  %v696_v53 = vsel %vm10348_vm1, %v7213_v44, %v673_v35  ;;  %v10550_v44 = vmov 0  ;;  %v10553_v10 = vmov 0 }
  0xd0   : > { %6105 = vmatprep.subr.msk.mxu0 %vm7364_vm13, %v695_v40  ;;  %v10551_v44 = vsel %vm7407_vm15, 4294967295, %v10550_v44  ;;  %v10554_v10 = vsel %vm7424_vm7, 4294967295, %v10553_v10  ;;  %v10567_v40 = vmov 0 }
  0xd1   : > { %10552 = vst [vmem:[#allocation16_spill] sm:$0xff] %v10551_v44  ;;  %10555 = vst [vmem:[#allocation17_spill] sm:$0xff] %v10554_v10 }
  0xd2   : > { %6103 = vmatmul.mubr.msk.f32.gmra.mxu1 %vm10347_vm0, %v7262_v58  ;;  %v7396_v54 = vpop.permute.xlu0 %2220  ;;  %6095 = vmatmul.mubr.msk.f32.vlgmr.msra.gmra.mxu0 %vm10347_vm0, %v7195_v39  ;;  %v2217_v56 = vpop.permute.xlu1 %2216 }
  0xd3   : > { %6106 = vmatpush1.msk.msra.mxu0 %vm7383_vm14, %v696_v53  ;;  %1743 = vmatprep.mubr.f32.mxu0 %v10408_v0  ;;  %vm10560_vm14 = vcmask 64512  }
  0xd4   : > { %1844 = vmatprep.mubr.f32.mxu1 %v10408_v0 }
  0xd6   : > { %6104 = vmatmul.mubr.msk.f32.gmra.mxu1 %vm10347_vm0, %v7293_v3  ;;  %v681_v1 = vpop.permute.xlu0 %680  ;;  %6096 = vmatmul.mubr.msk.f32.gmra.mxu0 %vm10347_vm0, %v7232_v49  ;;  %v7433_v13 = vpop.permute.xlu1 %2226  ;;  %vm7437_vm0 = vcmp.ne.s32.totalorder %v453_v25, 127 }
  0xd7   : > { %1749 = vmatprep.mubr.f32.mxu0 %v10408_v0  ;;  %2004 = vmatprep.mubr.f32.mxu1 %v10408_v0  ;;  %v691_v4 = vsel %vm10348_vm1, %v681_v1, %v683_v20  ;;  %v10557_v14 = vsel %vm7437_vm0, 4294967295, %v10556_v14  ;;  %vm10559_vm1 = vcmp.lt.s32.totalorder %v7156_v22, 127 }
  0xd8   : > { %6117 = vmatprep.subr.msk.mxu0 %vm7407_vm15, %v691_v4  ;;  %10558 = vst [vmem:[#allocation18_spill] sm:$0xff] %v10557_v14  ;;  %v2256_v19 = vsel %vm10559_vm1, %v2219_v38, %v7396_v54  ;;  %vm10561_vm15 = vmmov %vm10560_vm14 }
  0xd9   : > { %vm10562_vm1 = vmmov %vm10560_vm14 }
  0xda   : > { %6097 = vmatmul.mubr.msk.f32.gmra.mxu0 %vm10560_vm14, %v7262_v58  ;;  %6113 = vmatmul.mubr.msk.f32.vlgmr.msra.gmra.mxu1 %vm10561_vm15, %v7195_v39  ;;  %v7448_v20 = vpop.permute.xlu0 %2228  ;;  %vm10563_vm14 = vmmov %vm10562_vm1  ;;  %v2225_v25 = vpop.permute.xlu1 %2224  ;;  %vm7465_vm15 = vcmp.ne.s32.totalorder %v516_v23, 0 }
  0xdb   : > { %6124 = vmatpush1.msk.msra.mxu1 %vm7424_vm7, %v690_v9  ;;  %1755 = vmatprep.mubr.f32.mxu0 %v10408_v0  ;;  %v10565_v21 = vsel %vm7465_vm15, 4294967295, %v10564_v21  ;;  %vm10572_vm7 = vcmask 64512  }
  0xdc   : > { %2010 = vmatprep.mubr.f32.mxu1 %v10408_v0  ;;  %6139 = vmatprep.subr.msk.mxu1 %vm7437_vm0, %v2256_v19  ;;  %10566 = vst [vmem:[#allocation19_spill] sm:$0xff] %v10565_v21  ;;  %vm7471_vm0 = vcmp.ne.s32.totalorder %v439_v42, 127  ;;  %vm10573_vm13 = vmmov %vm10572_vm7 }
  0xdd   : > { %v10568_v40 = vsel %vm7471_vm0, 4294967295, %v10567_v40 }
  0xde   : > { %6098 = vmatmul.mubr.msk.f32.gmra.mxu0 %vm10562_vm1, %v7293_v3  ;;  %6114 = vmatmul.mubr.msk.f32.gmra.mxu1 %vm10563_vm14, %v7232_v49  ;;  %v2215_v35 = vpop.permute.xlu0 %2214  ;;  %10569 = vst [vmem:[#allocation20_spill] sm:$0xff] %v10568_v40  ;;  %vm10570_vm1 = vcmp.lt.s32.totalorder %v7156_v22, 127  ;;  %vm10571_vm14 = vcmp.lt.s32.totalorder %v7156_v22, 1  ;;  %v7490_v33 = vpop.permute.xlu1 %2212 }
  0xdf   : > { %1915 = vmatprep.mubr.f32.mxu0 %v10408_v0  ;;  %2016 = vmatprep.mubr.f32.mxu1 %v10408_v0  ;;  %v2258_v53 = vsel %vm10570_vm1, %v2215_v35, %v2217_v56  ;;  %v692_v4 = vsel %vm10571_vm14, %v7283_v63, %v681_v1  ;;  %vm10574_vm1 = vmmov %vm10572_vm7  ;;  %vm7502_vm14 = vcmp.ne.s32.totalorder %v446_v29, 127  ;;  %v10577_v63 = vmov 0 }
  0xe0   : > { %v10578_v63 = vsel %vm7502_vm14, 4294967295, %v10577_v63  ;;  %v10582_v1 = vmov 0 }
  0xe1   : > { %10579 = vst [vmem:[#allocation21_spill] sm:$0xff] %v10578_v63 }
  0xe2   : > { %6107 = vmatmul.mubr.msk.f32.vlgmr.msra.gmra.mxu0 %vm10572_vm7, %v7195_v39  ;;  %6115 = vmatmul.mubr.msk.f32.gmra.mxu1 %vm10573_vm13, %v7262_v58  ;;  %vm10575_vm7 = vmmov %vm10574_vm1  ;;  %vm10576_vm13 = vcmp.lt.s32.totalorder %v7156_v22, 127  ;;  %v7520_v29 = vpop.permute.xlu1 %2236  ;;  %v2235_v26 = vpop.permute.xlu0 %2234 }
  0xe3   : > { %6118 = vmatpush1.msk.msra.mxu0 %vm7465_vm15, %v692_v4  ;;  %1921 = vmatprep.mubr.f32.mxu0 %v10408_v0  ;;  %v2257_v42 = vsel %vm10576_vm13, %v2217_v56, %v2219_v38  ;;  %v2252_v24 = vsel %vm10576_vm13, %v7433_v13, %v7448_v20  ;;  %v2259_v38 = vsel %vm10576_vm13, %v7490_v33, %v2215_v35  ;;  %v10587_v56 = vmov 0  ;;  %vm10590_vm15 = vmmov %vm10576_vm13 }
  0xe4   : > { %2022 = vmatprep.mubr.f32.mxu1 %v10408_v0  ;;  %6133 = vmatprep.subr.msk.mxu0 %vm7471_vm0, %v2258_v53  ;;  %vm10580_vm0 = vmmov %vm10574_vm1  ;;  %v2253_v51 = vsel %vm10590_vm15, %v2225_v25, %v7433_v13  ;;  %v10615_v4 = vmov 0 }
  0xe5   : > { %vm10592_vm13 = vmmov %vm10580_vm0 }
  0xe6   : > { %6116 = vmatmul.mubr.msk.f32.gmra.mxu1 %vm10574_vm1, %v7293_v3  ;;  %6108 = vmatmul.mubr.msk.f32.gmra.mxu0 %vm10575_vm7, %v7232_v49  ;;  %vm10581_vm1 = vmmov %vm10580_vm0  ;;  %vm7512_vm7 = vcmp.ne.s32.totalorder %v481_v32, 127  ;;  %v2223_v32 = vpop.permute.xlu1 %2222  ;;  %v2233_v19 = vpop.permute.xlu0 %2232 }
  0xe7   : > { %1927 = vmatprep.mubr.f32.mxu0 %v10408_v0  ;;  %2182 = vmatprep.mubr.f32.mxu1 %v10408_v0  ;;  %v10583_v1 = vsel %vm7512_vm7, 4294967295, %v10582_v1  ;;  %v2254_v9 = vsel %vm10590_vm15, %v2223_v32, %v2225_v25 }
  0xe8   : > { %10584 = vst [vmem:[#allocation22_spill] sm:$0xff] %v10583_v1 }
  0xea   : > { %6125 = vmatmul.mubr.msk.f32.vlgmr.msra.gmra.mxu1 %vm10580_vm0, %v7195_v39  ;;  %6109 = vmatmul.mubr.msk.f32.gmra.mxu0 %vm10581_vm1, %v7262_v58  ;;  %vm10585_vm1 = vmmov %vm10580_vm0  ;;  %v7585_v53 = vpop.permute.xlu0 %2242 }
  0xeb   : > { %1933 = vmatprep.mubr.f32.mxu0 %v10408_v0  ;;  %2188 = vmatprep.mubr.f32.mxu1 %v10408_v0  ;;  %v2241_v59 = vpop.permute.xlu1 %2240 }
  0xec   : > { %6140 = vmatpush1.msk.msra.mxu1 %vm7502_vm14, %v2257_v42  ;;  %vm10367_vm14 = vcmp.ne.s32.totalorder %v7156_v22, 127 }
  0xed   : > { %6151 = vmatprep.subr.msk.mxu1 %vm7512_vm7, %v2252_v24  ;;  %vm10586_vm7 = vmmov %vm10580_vm0  ;;  %v10618_v24 = vmov 0 }
  0xee   : > { %6126 = vmatmul.mubr.msk.f32.gmra.mxu1 %vm10580_vm0, %v7232_v49  ;;  %6110 = vmatmul.mubr.msk.f32.gmra.mxu0 %vm10585_vm1, %v7293_v3  ;;  %vm7544_vm1 = vcmp.ne.s32.totalorder %v467_v60, 127  ;;  %v10593_v60 = vmov 0  ;;  %v2231_v43 = vpop.permute.xlu0 %2230 }
  0xef   : > { %2093 = vmatprep.mubr.f32.mxu0 %v10408_v0  ;;  %2194 = vmatprep.mubr.f32.mxu1 %v10408_v0  ;;  %v10588_v56 = vsel %vm7544_vm1, 4294967295, %v10587_v56 }
  0xf0   : > { %10589 = vst [vmem:[#allocation23_spill] sm:$0xff] %v10588_v56 }
  0xf2   : > { %6127 = vmatmul.mubr.msk.f32.gmra.mxu1 %vm10586_vm7, %v7262_v58  ;;  %6119 = vmatmul.mubr.msk.f32.vlgmr.msra.gmra.mxu0 %vm10580_vm0, %v7195_v39  ;;  %vm10591_vm7 = vmmov %vm10580_vm0  ;;  %v7565_v39 = vld [vmem:[%s10342_s2 + $0x40] sm:$0xff]  ;;  %vm7572_vm0 = vcmp.ne.s32.totalorder %v474_v37, 127  ;;  %v7611_v37 = vld [vmem:[%s10342_s2 + $0x50] sm:$0xff] }
  0xf3   : > { %2099 = vmatprep.mubr.f32.mxu0 %v10408_v0  ;;  %2200 = vmatprep.mubr.f32.mxu1 %v10408_v0  ;;  %v10594_v60 = vsel %vm7572_vm0, 4294967295, %v10593_v60 }
  0xf4   : > { %6134 = vmatpush1.msk.msra.mxu0 %vm10367_vm14, %v2259_v38  ;;  %10595 = vst [vmem:[#allocation24_spill] sm:$0xff] %v10594_v60 }
  0xf5   : > { %6145 = vmatprep.subr.msk.mxu0 %vm7544_vm1, %v2254_v9 }
  0xf6   : > { %6128 = vmatmul.mubr.msk.f32.gmra.mxu1 %vm10591_vm7, %v7293_v3  ;;  %6120 = vmatmul.mubr.msk.f32.gmra.mxu0 %vm10592_vm13, %v7232_v49  ;;  %vm7578_vm7 = vcmp.ne.s32.totalorder %v509_v52, 127  ;;  %v10596_v49 = vmov 0  ;;  %vm10599_vm13 = vmmov %vm10590_vm15  ;;  %vm10600_vm15 = vcmask 64512   ;;  %v10604_v52 = vmov 0 }
  0xf7   : > { %2105 = vmatprep.mubr.f32.mxu0 %v10408_v0  ;;  %2474 = vmatprep.mubr.f32.mxu1 %v10408_v0  ;;  %v10597_v49 = vsel %vm7578_vm7, 4294967295, %v10596_v49  ;;  %v2248_v35 = vsel %vm10599_vm13, %v2235_v26, %v7520_v29  ;;  %vm10601_vm14 = vmmov %vm10600_vm15 }
  0xf8   : > { %10598 = vst [vmem:[#allocation25_spill] sm:$0xff] %v10597_v49  ;;  %vm10602_vm13 = vmmov %vm10601_vm14 }
  0xfa   : > { %6141 = vmatmul.mubr.msk.f32.vlgmr.msra.gmra.mxu1 %vm10600_vm15, %v7565_v39  ;;  %6121 = vmatmul.mubr.msk.f32.gmra.mxu0 %vm10601_vm14, %v7262_v58  ;;  %vm10603_vm14 = vmmov %vm10602_vm13  ;;  %vm7615_vm15 = vcmp.ne.s32.totalorder %v460_v2, 127  ;;  %v10607_v58 = vmov 0 }
  0xfb   : > { %6152 = vmatpush1.msk.msra.mxu1 %vm7572_vm0, %v2253_v51  ;;  %2111 = vmatprep.mubr.f32.mxu0 %v10408_v0  ;;  %v10605_v52 = vsel %vm7615_vm15, 4294967295, %v10604_v52  ;;  %vm10612_vm0 = vcmask 64512  }
  0xfc   : > { %2480 = vmatprep.mubr.f32.mxu1 %v10408_v0  ;;  %6163 = vmatprep.subr.msk.mxu1 %vm7578_vm7, %v2248_v35  ;;  %10606 = vst [vmem:[#allocation26_spill] sm:$0xff] %v10605_v52  ;;  %vm10613_vm1 = vmmov %vm10612_vm0 }
  0xfe   : > { %6122 = vmatmul.mubr.msk.f32.gmra.mxu0 %vm10602_vm13, %v7293_v3  ;;  %6142 = vmatmul.mubr.msk.f32.gmra.mxu1 %vm10603_vm14, %v7597_v30  ;;  %vm7621_vm13 = vcmp.ne.s32.totalorder %v495_v18, 127  ;;  %vm10610_vm14 = vcmp.lt.s32.totalorder %v7156_v22, 127 }
  0xff   : > { %2385 = vmatprep.mubr.f32.mxu0 %v10408_v0  ;;  %2486 = vmatprep.mubr.f32.mxu1 %v10408_v0  ;;  %v10608_v58 = vsel %vm7621_vm13, 4294967295, %v10607_v58  ;;  %v2250_v3 = vsel %vm10610_vm14, %v2231_v43, %v2233_v19  ;;  %vm10611_vm7 = vmmov %vm10610_vm14  ;;  %vm7663_vm14 = vcmp.ne.s32.totalorder %v502_v5, 127 }
 0x100   : > { %10609 = vst [vmem:[#allocation27_spill] sm:$0xff] %v10608_v58  ;;  %v2255_v13 = vsel %vm10611_vm7, %v7396_v54, %v2223_v32  ;;  %v2249_v25 = vsel %vm10611_vm7, %v2233_v19, %v2235_v26  ;;  %v10616_v4 = vsel %vm7663_vm14, 4294967295, %v10615_v4  ;;  %vm10621_vm7 = vmmov %vm10612_vm0  ;;  %v2239_v26 = vpop.permute.xlu1 %2238  ;;  %v10627_v19 = vmov 0 }
 0x101   : > { %10617 = vst [vmem:[#allocation28_spill] sm:$0xff] %v10616_v4 }
 0x102   : > { %6135 = vmatmul.mubr.msk.f32.vlgmr.msra.gmra.mxu0 %vm10612_vm0, %v7565_v39  ;;  %6143 = vmatmul.mubr.msk.f32.gmra.mxu1 %vm10613_vm1, %v7611_v37  ;;  %vm10614_vm1 = vmmov %vm10612_vm0 }
 0x103   : > { %6146 = vmatpush1.msk.msra.mxu0 %vm7615_vm15, %v2255_v13  ;;  %2391 = vmatprep.mubr.f32.mxu0 %v10408_v0  ;;  %v7642_v2 = vpop.f32.mrf.mxu1  ;;  %v7647_v8 = vpop.f32.mrf.mxu0 }
 0x104   : > { %2492 = vmatprep.mubr.f32.mxu1 %v10408_v0  ;;  %6157 = vmatprep.subr.msk.mxu0 %vm7621_vm13, %v2250_v3  ;;  %vm10622_vm13 = vcmp.lt.s32.totalorder %v7156_v22, 127 }
 0x105   : > { %v7649_v18 = vpop.f32.mrf.mxu1  ;;  %v7667_v42 = vpop.f32.mrf.mxu0  ;;  %v2260_v62 = vsel %vm10622_vm13, %v7585_v53, %v7490_v33  ;;  %vm7705_vm13 = vcmp.ne.s32.totalorder %v488_v27, 127  ;;  %v10624_v33 = vmov 0 }
 0x106   : > { %6136 = vmatmul.mubr.msk.f32.gmra.mxu0 %vm10614_vm1, %v7597_v30  ;;  %6144 = vmatmul.mubr.msk.f32.gmra.mxu1 %vm10612_vm0, %v7640_v55  ;;  %vm7671_vm1 = vcmp.ne.s32.totalorder %v537_v7, 127  ;;  %v10625_v33 = vsel %vm7705_vm13, 4294967295, %v10624_v33 }
 0x107   : > { %2397 = vmatprep.mubr.f32.mxu0 %v10408_v0  ;;  %2652 = vmatprep.mubr.f32.mxu1 %v10408_v0  ;;  %v7657_v54 = vpop.f32.mrf.mxu1  ;;  %v10619_v24 = vsel %vm7671_vm1, 4294967295, %v10618_v24  ;;  %v7693_v7 = vpop.f32.mrf.mxu0  ;;  %10626 = vst [vmem:[#allocation30_spill] sm:$0xff] %v10625_v33 }
 0x108   : > { %10620 = vst [vmem:[#allocation29_spill] sm:$0xff] %v10619_v24 }
 0x109   : > { %v7675_v32 = vpop.f32.mrf.mxu1  ;;  %v7709_v9 = vpop.f32.mrf.mxu0 }
 0x10a   : > { %6137 = vmatmul.mubr.msk.f32.gmra.mxu0 %vm10612_vm0, %v7611_v37  ;;  %6153 = vmatmul.mubr.msk.f32.vlgmr.msra.gmra.mxu1 %vm10621_vm7, %v7565_v39  ;;  %vm10623_vm7 = vmmov %vm10612_vm0 }
 0x10b   : > { %6164 = vmatpush1.msk.msra.mxu1 %vm7663_vm14, %v2249_v25  ;;  %2403 = vmatprep.mubr.f32.mxu0 %v10408_v0  ;;  %v7688_v5 = vpop.f32.mrf.mxu1  ;;  %vm10632_vm14 = vcmask 64512   ;;  %v7734_v27 = vpop.f32.mrf.mxu0  ;;  %v10644_v25 = vmov 0 }
 0x10c   : > { %6175 = vmatprep.subr.msk.mxu1 %vm7671_vm1, %v2260_v62  ;;  %2658 = vmatprep.mubr.f32.mxu1 %v10408_v0  ;;  %vm10633_vm15 = vmmov %vm10632_vm14 }
 0x10d   : > { %v7699_v38 = vpop.f32.mrf.mxu1 }
 0x10e   : > { %6138 = vmatmul.mubr.msk.f32.gmra.mxu0 %vm10612_vm0, %v7640_v55  ;;  %6154 = vmatmul.mubr.msk.f32.gmra.mxu1 %vm10623_vm7, %v7597_v30  ;;  %vm7713_vm0 = vcmp.ne.s32.totalorder %v523_v48, 127  ;;  %vm10630_vm7 = vcmp.lt.s32.totalorder %v7156_v22, 127  ;;  %v7744_v48 = vpop.f32.mrf.mxu0 }
 0x10f   : > { %2563 = vmatprep.mubr.f32.mxu0 %v10408_v0  ;;  %2664 = vmatprep.mubr.f32.mxu1 %v10408_v0  ;;  %v10628_v19 = vsel %vm7713_vm0, 4294967295, %v10627_v19  ;;  %v2246_v51 = vsel %vm10630_vm7, %v2239_v26, %v2241_v59  ;;  %vm10631_vm1 = vmmov %vm10630_vm7  ;;  %v7726_v16 = vpop.f32.mrf.mxu1 }
 0x110   : > { %10629 = vst [vmem:[#allocation31_spill] sm:$0xff] %v10628_v19  ;;  %v2251_v35 = vsel %vm10631_vm1, %v7448_v20, %v2231_v43  ;;  %vm10634_vm1 = vmmov %vm10632_vm14  ;;  %v10637_v43 = vmov 0  ;;  %v7765_v47 = vpop.f32.mrf.mxu0 }
 0x111   : > { %v7740_v34 = vpop.f32.mrf.mxu1 }
 0x112   : > { %6147 = vmatmul.mubr.msk.f32.vlgmr.msra.gmra.mxu0 %vm10632_vm14, %v7565_v39  ;;  %6155 = vmatmul.mubr.msk.f32.gmra.mxu1 %vm10633_vm15, %v7611_v37  ;;  %vm10635_vm14 = vmmov %vm10634_vm1 }
 0x113   : > { %6158 = vmatpush1.msk.msra.mxu0 %vm7705_vm13, %v2251_v35  ;;  %2569 = vmatprep.mubr.f32.mxu0 %v10408_v0  ;;  %vm10636_vm15 = vmmov %vm10630_vm7  ;;  %vm7751_vm7 = vcmp.ne.s32.totalorder %v530_v57, 127  ;;  %v7759_v3 = vpop.f32.mrf.mxu1 }
 0x114   : > { %2670 = vmatprep.mubr.f32.mxu1 %v10408_v0  ;;  %6169 = vmatprep.subr.msk.mxu0 %vm7713_vm0, %v2246_v51  ;;  %v2245_v20 = vsel %vm10636_vm15, %v2241_v59, %v7585_v53  ;;  %v10638_v43 = vsel %vm7751_vm7, 4294967295, %v10637_v43  ;;  %vm10641_vm15 = vmmov %vm10634_vm1  ;;  %v7775_v53 = vpop.f32.mrf.mxu0 }
 0x115   : > { %10639 = vst [vmem:[#allocation32_spill] sm:$0xff] %v10638_v43  ;;  %vm10642_vm0 = vmmov %vm10634_vm1  ;;  %v7771_v57 = vpop.f32.mrf.mxu1 }
 0x116   : > { %6148 = vmatmul.mubr.msk.f32.gmra.mxu0 %vm10634_vm1, %v7597_v30  ;;  %6156 = vmatmul.mubr.msk.f32.gmra.mxu1 %vm10635_vm14, %v7640_v55  ;;  %vm10640_vm14 = vmmov %vm10634_vm1  ;;  %v7796_v12 = vpop.f32.mrf.mxu0 }
 0x117   : > { %2575 = vmatprep.mubr.f32.mxu0 %v10408_v0  ;;  %2830 = vmatprep.mubr.f32.mxu1 %v10408_v0  ;;  %v7790_v59 = vpop.f32.mrf.mxu1 }
 0x11a   : > { %6149 = vmatmul.mubr.msk.f32.gmra.mxu0 %vm10634_vm1, %v7611_v37  ;;  %6165 = vmatmul.mubr.msk.f32.vlgmr.msra.gmra.mxu1 %vm10640_vm14, %v7565_v39  ;;  %vm10643_vm1 = vcmp.lt.s32.totalorder %v7156_v22, 127  ;;  %vm7782_vm14 = vcmp.ne.s32.totalorder %v516_v23, 127  ;;  %v7802_v23 = vpop.f32.mrf.mxu1 }
 0x11b   : > { %2581 = vmatprep.mubr.f32.mxu0 %v10408_v0  ;;  %2836 = vmatprep.mubr.f32.mxu1 %v10408_v0  ;;  %v2247_v13 = vsel %vm10643_vm1, %v7520_v29, %v2239_v26  ;;  %v10645_v25 = vsel %vm7782_vm14, 4294967295, %v10644_v25  ;;  %vm10648_vm1 = vmmov %vm10642_vm0  ;;  %v7806_v29 = vpop.f32.mrf.mxu0 }
 0x11c   : > { %6176 = vmatpush1.msk.msra.mxu1 %vm7751_vm7, %v2245_v20  ;;  %10646 = vst [vmem:[#allocation33_spill] sm:$0xff] %v10645_v25  ;;  %vm10649_vm7 = vmmov %vm10642_vm0  ;;  %v7812_v62 = vpop.f32.mrf.mxu1 }
 0x11d   : > { %v7816_v26 = vpop.f32.mrf.mxu0 }
 0x11e   : > { %6150 = vmatmul.mubr.msk.f32.gmra.mxu0 %vm10641_vm15, %v7640_v55  ;;  %6166 = vmatmul.mubr.msk.f32.gmra.mxu1 %vm10642_vm0, %v7597_v30  ;;  %vm10647_vm15 = vmmov %vm10642_vm0  ;;  %v7822_v51 = vpop.f32.mrf.mxu1 }
 0x11f   : > { %2741 = vmatprep.mubr.f32.mxu0 %v10408_v0  ;;  %2842 = vmatprep.mubr.f32.mxu1 %v10408_v0  ;;  %v7826_v35 = vpop.f32.mrf.mxu0 }
 0x120   : > { %10653 = vst [vmem:[#allocation34_spill] sm:$0xff] %v7826_v35  ;;  %v7832_v20 = vpop.f32.mrf.mxu1 }
 0x121   : > { %10655 = vst [vmem:[#allocation35_spill] sm:$0xff] %v7832_v20 }
 0x122   : > { %6159 = vmatmul.mubr.msk.f32.vlgmr.msra.gmra.mxu0 %vm10642_vm0, %v7565_v39  ;;  %6167 = vmatmul.mubr.msk.f32.gmra.mxu1 %vm10647_vm15, %v7611_v37  ;;  %vm10650_vm15 = vmmov %vm10642_vm0  ;;  %v7842_v25 = vpop.f32.mrf.mxu1 }
 0x123   : > { %2747 = vmatprep.mubr.f32.mxu0 %v10408_v0  ;;  %2848 = vmatprep.mubr.f32.mxu1 %v10408_v0  ;;  %10659 = vst [vmem:[#allocation37_spill] sm:$0xff] %v7842_v25 }
 0x124   : > { %6170 = vmatpush1.msk.msra.mxu0 %vm7782_vm14, %v2247_v13  ;;  %v7836_v13 = vpop.f32.mrf.mxu0  ;;  %v7850_v43 = vpop.f32.mrf.mxu1 }
 0x125   : > { %10656 = vst [vmem:[#allocation36_spill] sm:$0xff] %v7836_v13  ;;  %10661 = vst [vmem:[#allocation39_spill] sm:$0xff] %v7850_v43 }
 0x126   : > { %6160 = vmatmul.mubr.msk.f32.gmra.mxu0 %vm10648_vm1, %v7597_v30  ;;  %6168 = vmatmul.mubr.msk.f32.gmra.mxu1 %vm10649_vm7, %v7640_v55  ;;  %vm10651_vm7 = vmmov %vm10642_vm0 }
 0x127   : > { %2753 = vmatprep.mubr.f32.mxu0 %v10408_v0  ;;  %3008 = vmatprep.mubr.f32.mxu1 %v10408_v0  ;;  %vm10652_vm1 = vmmov %vm10642_vm0 }
 0x12a   : > { %6161 = vmatmul.mubr.msk.f32.gmra.mxu0 %vm10642_vm0, %v7611_v37  ;;  %6177 = vmatmul.mubr.msk.f32.vlgmr.msra.gmra.mxu1 %vm10650_vm15, %v7565_v39  ;;  %vm10654_vm15 = vmmov %vm10642_vm0 }
 0x12b   : > { %2759 = vmatprep.mubr.f32.mxu0 %v10408_v0  ;;  %3014 = vmatprep.mubr.f32.mxu1 %v10408_v0 }
 0x12e   : > { %6162 = vmatmul.mubr.msk.f32.gmra.mxu0 %vm10651_vm7, %v7640_v55  ;;  %6178 = vmatmul.mubr.msk.f32.gmra.mxu1 %vm10652_vm1, %v7597_v30  ;;  %vm10657_vm7 = vmmov %vm10642_vm0 }
 0x12f   : > { %2919 = vmatprep.mubr.f32.mxu0 %v10408_v0  ;;  %3020 = vmatprep.mubr.f32.mxu1 %v10408_v0  ;;  %vm10658_vm1 = vmmov %vm10642_vm0 }
 0x132   : > { %6171 = vmatmul.mubr.msk.f32.vlgmr.msra.gmra.mxu0 %vm10642_vm0, %v7565_v39  ;;  %6179 = vmatmul.mubr.msk.f32.gmra.mxu1 %vm10654_vm15, %v7611_v37  ;;  %v7846_v39 = vpop.f32.mrf.mxu0  ;;  %vm10663_vm15 = vmmov %vm10642_vm0 }
 0x133   : > { %2925 = vmatprep.mubr.f32.mxu0 %v10408_v0  ;;  %3026 = vmatprep.mubr.f32.mxu1 %v10408_v0  ;;  %10660 = vst [vmem:[#allocation38_spill] sm:$0xff] %v7846_v39 }
 0x134   : > { %v7853_v19 = vpop.f32.mrf.mxu0 }
 0x135   : > { %10662 = vst [vmem:[#allocation40_spill] sm:$0xff] %v7853_v19 }
 0x136   : > { %6172 = vmatmul.mubr.msk.f32.gmra.mxu0 %vm10657_vm7, %v7597_v30  ;;  %6180 = vmatmul.mubr.msk.f32.gmra.mxu1 %vm10658_vm1, %v7640_v55  ;;  %v7857_v30 = vpop.f32.mrf.mxu1  ;;  %v7860_v24 = vpop.f32.mrf.mxu0  ;;  %vm3932_vm7 = vcmask 261120  }
 0x137   : > { %2931 = vmatprep.mubr.f32.mxu0 %v10408_v0  ;;  %4071 = vmatprep.mubr.f32.mxu1 %v10408_v0  ;;  %10664 = vst [vmem:[#allocation41_spill] sm:$0xff] %v7857_v30  ;;  %10665 = vst [vmem:[#allocation42_spill] sm:$0xff] %v7860_v24 }
 0x138   : > { %v7862_v33 = vpop.f32.mrf.mxu1  ;;  %v7864_v4 = vpop.f32.mrf.mxu0 }
 0x139   : > { %10666 = vst [vmem:[#allocation43_spill] sm:$0xff] %v7862_v33  ;;  %10667 = vst [vmem:[#allocation44_spill] sm:$0xff] %v7864_v4 }
 0x13a   : > { %6173 = vmatmul.mubr.msk.f32.gmra.mxu0 %vm10642_vm0, %v7611_v37  ;;  %v7866_v37 = vpop.f32.mrf.mxu1  ;;  %v7868_v58 = vpop.f32.mrf.mxu0 }
 0x13b   : > { %2937 = vmatprep.mubr.f32.mxu0 %v10408_v0  ;;  %10668 = vst [vmem:[#allocation45_spill] sm:$0xff] %v7866_v37  ;;  %10669 = vst [vmem:[#allocation46_spill] sm:$0xff] %v7868_v58 }
 0x13c   : > { %v7870_v49 = vpop.f32.mrf.mxu1  ;;  %v7872_v52 = vpop.f32.mrf.mxu0 }
 0x13d   : > { %10670 = vst [vmem:[#allocation47_spill] sm:$0xff] %v7870_v49  ;;  %10671 = vst [vmem:[#allocation48_spill] sm:$0xff] %v7872_v52 }
 0x13e   : > { %6174 = vmatmul.mubr.msk.f32.gmra.mxu0 %vm10663_vm15, %v7640_v55  ;;  %v7874_v60 = vpop.f32.mrf.mxu1  ;;  %v7876_v55 = vpop.f32.mrf.mxu0 }
 0x13f   : > { %4000 = vmatprep.mubr.f32.mxu0 %v10408_v0  ;;  %10672 = vst [vmem:[#allocation49_spill] sm:$0xff] %v7874_v60  ;;  %10673 = vst [vmem:[#allocation50_spill] sm:$0xff] %v7876_v55 }
 0x140   : > { %v7878_v56 = vpop.f32.mrf.mxu1  ;;  %v7880_v0 = vpop.f32.mrf.mxu0 }
 0x141   : > { %10674 = vst [vmem:[#allocation51_spill] sm:$0xff] %v7878_v56  ;;  %10675 = vst [vmem:[#allocation52_spill] sm:$0xff] %v7880_v0 }
 0x142   : > { %v7882_v1 = vpop.f32.mrf.mxu1  ;;  %v7884_v63 = vpop.f32.mrf.mxu0 }
 0x143   : > { %10676 = vst [vmem:[#allocation53_spill] sm:$0xff] %v7882_v1  ;;  %10677 = vst [vmem:[#allocation54_spill] sm:$0xff] %v7884_v63 }
 0x144   : > { %v7886_v40 = vpop.f32.mrf.mxu1  ;;  %v7888_v14 = vpop.f32.mrf.mxu0 }
 0x145   : > { %10678 = vst [vmem:[#allocation55_spill] sm:$0xff] %v7886_v40  ;;  %10679 = vst [vmem:[#allocation56_spill] sm:$0xff] %v7888_v14 }
 0x146   : > { %v7890_v21 = vpop.f32.mrf.mxu1  ;;  %v7892_v44 = vpop.f32.mrf.mxu0 }
 0x147   : > { %10680 = vst [vmem:[#allocation57_spill] sm:$0xff] %v7890_v21  ;;  %10681 = vst [vmem:[#allocation58_spill] sm:$0xff] %v7892_v44 }
 0x148   : > { %v7894_v10 = vpop.f32.mrf.mxu1  ;;  %v7896_v45 = vpop.f32.mrf.mxu0 }
 0x149   : > { %10682 = vst [vmem:[#allocation59_spill] sm:$0xff] %v7894_v10  ;;  %10683 = vst [vmem:[#allocation60_spill] sm:$0xff] %v7896_v45 }
 0x14a   : > { %v7898_v28 = vpop.f32.mrf.mxu1  ;;  %v7900_v11 = vpop.f32.mrf.mxu0 }
 0x14b   : > { %10684 = vst [vmem:[#allocation61_spill] sm:$0xff] %v7898_v28  ;;  %10685 = vst [vmem:[#allocation62_spill] sm:$0xff] %v7900_v11 }
 0x14c   : > { %v7902_v6 = vpop.f32.mrf.mxu1  ;;  %v7904_v17 = vpop.f32.mrf.mxu0 }
 0x14d   : > { %10686 = vst [vmem:[#allocation63_spill] sm:$0xff] %v7902_v6  ;;  %10687 = vst [vmem:[#allocation64_spill] sm:$0xff] %v7904_v17 }
 0x14e   : > { %v7906_v15 = vpop.f32.mrf.mxu1  ;;  %v7908_v61 = vpop.f32.mrf.mxu0 }
 0x14f   : > { %10688 = vst [vmem:[#allocation65_spill] sm:$0xff] %v7906_v15  ;;  %10689 = vst [vmem:[#allocation66_spill] sm:$0xff] %v7908_v61 }
 0x150   : > { %v7910_v46 = vpop.f32.mrf.mxu1  ;;  %v7912_v41 = vpop.f32.mrf.mxu0 }
 0x151   : > { %10690 = vst [vmem:[#allocation67_spill] sm:$0xff] %v7910_v46  ;;  %10691 = vst [vmem:[#allocation68_spill] sm:$0xff] %v7912_v41 }
 0x152   : > { %v7914_v36 = vpop.f32.mrf.mxu1  ;;  %v7916_v31 = vpop.f32.mrf.mxu0 }
 0x153   : > { %10692 = vst [vmem:[#allocation69_spill] sm:$0xff] %v7916_v31 }
 0x154   : > { %v7922_v11 = vpop.f32.mrf.mxu0 }
 0x155   : > { %10693 = vst [vmem:[#allocation70_spill] sm:$0xff] %v7922_v11 }
 0x156   : > { %v7926_v17 = vpop.f32.mrf.mxu0 }
 0x17a   : > { %v7918_v50 = vpop.f32.mrf.mxu1 }
 0x17c   : > { %v7920_v22 = vpop.f32.mrf.mxu1 }
 0x17e   : > { %v7924_v6 = vpop.f32.mrf.mxu1 }
 0x180   : > { %v7928_v15 = vpop.f32.mrf.mxu1 }
 0x182   : > { %v7930_v61 = vpop.f32.mrf.mxu0  ;;  %v7932_v46 = vpop.f32.mrf.mxu1 }
 0x184   : > { %v7934_v41 = vpop.f32.mrf.mxu0  ;;  %v7936_v45 = vpop.f32.mrf.mxu1 }
 0x186   : > { %v7938_v31 = vpop.f32.mrf.mxu0  ;;  %v7940_v28 = vpop.f32.mrf.mxu1 }
 0x188   : > { %v7942_v44 = vpop.f32.mrf.mxu0  ;;  %v7944_v11 = vpop.f32.mrf.mxu1 }
 0x18a   : > { %v7946_v10 = vpop.f32.mrf.mxu0  ;;  %v7948_v14 = vpop.f32.mrf.mxu1 }
 0x18c   : > { %v7950_v21 = vpop.f32.mrf.mxu0  ;;  %v7952_v63 = vpop.f32.mrf.mxu1 }
 0x18e   : > { %v7954_v40 = vpop.f32.mrf.mxu0  ;;  %v7956_v0 = vpop.f32.mrf.mxu1 }
 0x190   : > { %v7958_v1 = vpop.f32.mrf.mxu0  ;;  %v7960_v55 = vpop.f32.mrf.mxu1 }
 0x192   : > { %v7962_v56 = vpop.f32.mrf.mxu0  ;;  %v7964_v52 = vpop.f32.mrf.mxu1 }
 0x194   : > { %v7966_v60 = vpop.f32.mrf.mxu0  ;;  %v7968_v58 = vpop.f32.mrf.mxu1 }
 0x196   : > { %v7970_v49 = vpop.f32.mrf.mxu0  ;;  %v7972_v4 = vpop.f32.mrf.mxu1 }
 0x197   : > { %10694 = vst [vmem:[#allocation71_spill] sm:$0xff] %v7972_v4 }
 0x198   : > { %v7974_v37 = vpop.f32.mrf.mxu0  ;;  %v7976_v24 = vpop.f32.mrf.mxu1 }
 0x199   : > { %10695 = vst [vmem:[#allocation72_spill] sm:$0xff] %v7974_v37  ;;  %10696 = vst [vmem:[#allocation73_spill] sm:$0xff] %v7976_v24 }
 0x19a   : > { %v7978_v33 = vpop.f32.mrf.mxu0  ;;  %v7980_v19 = vpop.f32.mrf.mxu1 }
 0x19b   : > { %10697 = vst [vmem:[#allocation74_spill] sm:$0xff] %v7978_v33  ;;  %10698 = vst [vmem:[#allocation75_spill] sm:$0xff] %v7980_v19 }
 0x19c   : > { %v7982_v30 = vpop.f32.mrf.mxu0  ;;  %v7984_v39 = vpop.f32.mrf.mxu1 }
 0x19d   : > { %10699 = vst [vmem:[#allocation76_spill] sm:$0xff] %v7982_v30  ;;  %10700 = vst [vmem:[#allocation77_spill] sm:$0xff] %v7984_v39 }
 0x19e   : > { %v7986_v43 = vpop.f32.mrf.mxu0  ;;  %v7988_v13 = vpop.f32.mrf.mxu1 }
 0x19f   : > { %10701 = vst [vmem:[#allocation78_spill] sm:$0xff] %v7986_v43  ;;  %10702 = vst [vmem:[#allocation79_spill] sm:$0xff] %v7988_v13 }
 0x1a0   : > { %v7990_v25 = vpop.f32.mrf.mxu0  ;;  %v7992_v35 = vpop.f32.mrf.mxu1 }
 0x1a1   : > { %10703 = vst [vmem:[#allocation80_spill] sm:$0xff] %v7990_v25  ;;  %10704 = vst [vmem:[#allocation81_spill] sm:$0xff] %v7992_v35 }
 0x1a2   : > { %v7994_v4 = vpop.f32.mrf.mxu0  ;;  %v7996_v24 = vpop.f32.mrf.mxu1 }
 0x1a3   : > { %10705 = vst [vmem:[#allocation82_spill] sm:$0xff] %v7994_v4  ;;  %10706 = vst [vmem:[#allocation83_spill] sm:$0xff] %v7996_v24 }
 0x1a4   : > { %v7998_v33 = vpop.f32.mrf.mxu0  ;;  %v8000_v19 = vpop.f32.mrf.mxu1 }
 0x1a5   : > { %10707 = vst [vmem:[#allocation84_spill] sm:$0xff] %v7998_v33  ;;  %10708 = vst [vmem:[#allocation85_spill] sm:$0xff] %v8000_v19 }
 0x1a6   : > { %v8002_v30 = vpop.f32.mrf.mxu0  ;;  %v8004_v39 = vpop.f32.mrf.mxu1 }
 0x1a7   : > { %10709 = vst [vmem:[#allocation86_spill] sm:$0xff] %v8002_v30  ;;  %10710 = vst [vmem:[#allocation87_spill] sm:$0xff] %v8004_v39  ;;  %v3115_v39 = vld [vmem:[%s8048_s18 + $0x90] sm:$0xff] }
 0x1a8   : > { %v8006_v43 = vpop.f32.mrf.mxu0  ;;  %v8008_v13 = vpop.f32.mrf.mxu1 }
 0x1a9   : > { %10711 = vst [vmem:[#allocation88_spill] sm:$0xff] %v8006_v43  ;;  %10712 = vst [vmem:[#allocation89_spill] sm:$0xff] %v8008_v13 }
 0x1aa   : > { %v8010_v25 = vpop.f32.mrf.mxu0  ;;  %v8012_v35 = vpop.f32.mrf.mxu1 }
 0x1ab   : > { %10713 = vst [vmem:[#allocation90_spill] sm:$0xff] %v8010_v25  ;;  %10714 = vst [vmem:[#allocation91_spill] sm:$0xff] %v8012_v35 }
 0x1ac   : > { %v8014_v4 = vpop.f32.mrf.mxu0  ;;  %v8016_v37 = vpop.f32.mrf.mxu1 }
 0x1ad   : > { %10715 = vst [vmem:[#allocation92_spill] sm:$0xff] %v8014_v4  ;;  %10716 = vst [vmem:[#allocation93_spill] sm:$0xff] %v8016_v37 }
 0x1ae   : > { %v8018_v24 = vpop.f32.mrf.mxu0  ;;  %v8020_v33 = vpop.f32.mrf.mxu1 }
 0x1af   : > { %10717 = vst [vmem:[#allocation94_spill] sm:$0xff] %v8018_v24  ;;  %10718 = vst [vmem:[#allocation95_spill] sm:$0xff] %v8020_v33 }
 0x1b0   : > { %v8022_v19 = vpop.f32.mrf.mxu0  ;;  %v8024_v30 = vpop.f32.mrf.mxu1 }
 0x1b1   : > { %10719 = vst [vmem:[#allocation96_spill] sm:$0xff] %v8022_v19  ;;  %10720 = vst [vmem:[#allocation97_spill] sm:$0xff] %v8024_v30  ;;  %v1651_v30 = vadd.f32 %v7918_v50, %v7642_v2  ;;  %v3100_v50 = vld [vmem:[%s8048_s18 + $0x18] sm:$0xff] }
 0x1b2   : > { %v8027_v43 = vpop.f32.mrf.mxu0  ;;  %v8029_v13 = vpop.f32.mrf.mxu1 }
 0x1b3   : > { %10721 = vst [vmem:[#allocation98_spill] sm:$0xff] %v8027_v43  ;;  %10722 = vst [vmem:[#allocation99_spill] sm:$0xff] %v8029_v13 }
 0x1b4   : > { %v8031_v25 = vpop.f32.mrf.mxu0  ;;  %v8033_v35 = vpop.f32.mrf.mxu1 }
 0x1b5   : > { %10723 = vst [vmem:[#allocation100_spill] sm:$0xff] %v8031_v25  ;;  %10724 = vst [vmem:[#allocation101_spill] sm:$0xff] %v8033_v35 }
 0x1b6   : > { %v8035_v4 = vpop.f32.mrf.mxu0  ;;  %v8037_v37 = vpop.f32.mrf.mxu1 }
 0x1b7   : > { %10725 = vst [vmem:[#allocation102_spill] sm:$0xff] %v8035_v4  ;;  %10726 = vst [vmem:[#allocation103_spill] sm:$0xff] %v8037_v37  ;;  %v3099_v4 = vld [vmem:[%s8048_s18 + $0x10] sm:$0xff]  ;;  %v1653_v37 = vadd.f32 %v7920_v22, %v7649_v18 }
 0x1b8   : > { %v8039_v24 = vpop.f32.mrf.mxu0  ;;  %v2204_v33 = vpop.f32.mrf.mxu1 }
 0x1b9   : > { %10727 = vst [vmem:[#allocation104_spill] sm:$0xff] %v8039_v24  ;;  %v8044_v19 = vadd.f32 %v2204_v33, %v7914_v36  ;;  %v1657_v36 = vadd.f32 %v7924_v6, %v7657_v54  ;;  %v1562_v6 = vadd.f32 %v7930_v61, %v7647_v8  ;;  %v3097_v61 = vld [vmem:[%s8048_s18] sm:$0xff] }
 0x1ba   : > { %v8046_v43 = vpop.f32.mrf.mxu0  ;;  %v2476_v13 = vpop.f32.mrf.mxu1 }
 0x1bb   : > { %10728 = vst [vmem:[#allocation105_spill] sm:$0xff] %v8044_v19  ;;  %10729 = vst [vmem:[#allocation106_spill] sm:$0xff] %v8046_v43  ;;  %v3035_v24 = vadd.f32 %v2476_v13, %v1651_v30  ;;  %v1659_v13 = vadd.f32 %v7928_v15, %v7675_v32  ;;  %v1564_v15 = vadd.f32 %v7934_v41, %v7667_v42  ;;  %v3098_v42 = vld [vmem:[%s8048_s18 + $0x8] sm:$0xff] }
 0x1bc   : > { %v8053_v35 = vpop.f32.mrf.mxu0  ;;  %v2478_v25 = vpop.f32.mrf.mxu1 }
 0x1bd   : > { %10730 = vst [vmem:[#allocation107_spill] sm:$0xff] %v8053_v35  ;;  %v8058_v2 = vadd.f32 %v3099_v4, %v3035_v24  ;;  %v3036_v33 = vadd.f32 %v2478_v25, %v1653_v37  ;;  %v1663_v24 = vadd.f32 %v7932_v46, %v7688_v5 }
 0x1be   : > { %v8060_v19 = vpop.f32.mrf.mxu0  ;;  %v2482_v43 = vpop.f32.mrf.mxu1 }
 0x1bf   : > { %10731 = vst [vmem:[#allocation108_spill] sm:$0xff] %v8060_v19  ;;  %v6183_v20 = vmul.f32 -1.442695, %v8058_v2  ;;  %v8064_v22 = vadd.f32 %v3100_v50, %v3036_v33  ;;  %v3051_v18 = vadd.f32 %v2482_v43, %v1657_v36  ;;  %v3116_v43 = vld [vmem:[%s8048_s18 + $0x98] sm:$0xff]  ;;  %v3131_v36 = vld [vmem:[%s8048_s18 + $0x110] sm:$0xff]  ;;  %v1568_v33 = vadd.f32 %v7938_v31, %v7693_v7 }
 0x1c0   : > { %v2115_v54 = vpop.f32.mrf.mxu0  ;;  %v2484_v4 = vpop.f32.mrf.mxu1  ;;  %v10771_v19 = vld [vmem:[#allocation82_spill] sm:$0xff] }
 0x1c1   : > { %v6184_v25 = vmul.f32 -1.442695, %v8064_v22  ;;  %v8073_v30 = vadd.f32 %v3115_v39, %v3051_v18  ;;  %v8076_v37 = vadd.f32 %v2115_v54, %v7926_v17  ;;  %v3052_v32 = vadd.f32 %v2484_v4, %v1659_v13 }
 0x1c2   : > { %v2387_v50 = vpop.f32.mrf.mxu0  ;;  %v2488_v8 = vpop.f32.mrf.mxu1  ;;  %6431 = vpow2.f32 %v6183_v20  ;;  %v1665_v17 = vadd.f32 %v7936_v45, %v7699_v38  ;;  %v1669_v45 = vadd.f32 %v7940_v28, %v7726_v16  ;;  %v1570_v38 = vadd.f32 %v7942_v44, %v7709_v9 }
 0x1c3   : > { %10732 = vst [vmem:[#allocation109_spill] sm:$0xff] %v8076_v37  ;;  %v6199_v46 = vmul.f32 -1.442695, %v8073_v30  ;;  %v3033_v5 = vadd.f32 %v2387_v50, %v1562_v6  ;;  %v3067_v39 = vadd.f32 %v2488_v8, %v1663_v24  ;;  %v8088_v18 = vadd.f32 %v3116_v43, %v3052_v32  ;;  %v3132_v6 = vld [vmem:[%s8048_s18 + $0x118] sm:$0xff]  ;;  %v3113_v43 = vld [vmem:[%s8048_s18 + $0x80] sm:$0xff] }
 0x1c4   : > { %v2389_v41 = vpop.f32.mrf.mxu0  ;;  %v2490_v13 = vpop.f32.mrf.mxu1  ;;  %6433 = vpow2.f32 %v6184_v25  ;;  %v1671_v28 = vadd.f32 %v7944_v11, %v7740_v34 }
 0x1c5   : > { %v8091_v54 = vadd.f32 %v3097_v61, %v3033_v5  ;;  %v8093_v20 = vadd.f32 %v3131_v36, %v3067_v39  ;;  %v3034_v4 = vadd.f32 %v2389_v41, %v1564_v15  ;;  %v6200_v31 = vmul.f32 -1.442695, %v8088_v18  ;;  %v3147_v61 = vld [vmem:[%s8048_s18 + $0x190] sm:$0xff]  ;;  %v3148_v41 = vld [vmem:[%s8048_s18 + $0x198] sm:$0xff] }
 0x1c6   : > { %v3068_v7 = vadd.f32 %v2490_v13, %v1665_v17  ;;  %v2393_v24 = vpop.f32.mrf.mxu0  ;;  %v2494_v25 = vpop.f32.mrf.mxu1  ;;  %6435 = vpow2.f32 %v6199_v46  ;;  %v3114_v17 = vld [vmem:[%s8048_s18 + $0x88] sm:$0xff] }
 0x1c7   : > { %v6181_v32 = vmul.f32 -1.442695, %v8091_v54  ;;  %v8103_v50 = vadd.f32 %v3098_v42, %v3034_v4  ;;  %v3049_v15 = vadd.f32 %v2393_v24, %v1568_v33  ;;  %v6215_v16 = vmul.f32 -1.442695, %v8093_v20  ;;  %v3129_v24 = vld [vmem:[%s8048_s18 + $0x100] sm:$0xff] }
 0x1c8   : > { %v8108_v44 = vadd.f32 %v3132_v6, %v3068_v7  ;;  %v3083_v9 = vadd.f32 %v2494_v25, %v1669_v45  ;;  %v2395_v8 = vpop.f32.mrf.mxu0  ;;  %v2496_v36 = vpop.f32.mrf.mxu1  ;;  %v1574_v33 = vadd.f32 %v7946_v10, %v7734_v27  ;;  %6437 = vpow2.f32 %v6200_v31 }
 0x1c9   : > { %v6182_v5 = vmul.f32 -1.442695, %v8103_v50  ;;  %v8112_v46 = vadd.f32 %v3113_v43, %v3049_v15  ;;  %v3050_v39 = vadd.f32 %v2395_v8, %v1570_v38  ;;  %v3084_v34 = vadd.f32 %v2496_v36, %v1671_v28  ;;  %v3103_v28 = vld [vmem:[%s8048_s18 + $0x30] sm:$0xff] }
 0x1ca   : > { %v6216_v11 = vmul.f32 -1.442695, %v8108_v44  ;;  %v2399_v42 = vpop.f32.mrf.mxu0  ;;  %v2654_v13 = vpop.f32.mrf.mxu1  ;;  %6439 = vpow2.f32 %v6181_v32  ;;  %v8120_v6 = vadd.f32 %v3147_v61, %v3083_v9  ;;  %v1829_v45 = vadd.f32 %v7948_v14, %v7759_v3 }
 0x1cb   : > { %v6197_v4 = vmul.f32 -1.442695, %v8112_v46  ;;  %6441 = vpow2.f32 %v6215_v16  ;;  %v8124_v38 = vadd.f32 %v3114_v17, %v3050_v39  ;;  %v3065_v10 = vadd.f32 %v2399_v42, %v1574_v33 }
 0x1cc   : > { %v2401_v27 = vpop.f32.mrf.mxu0  ;;  %v2656_v31 = vpop.f32.mrf.mxu1  ;;  %6443 = vpow2.f32 %v6182_v5  ;;  %v8126_v7 = vadd.f32 %v3148_v41, %v3084_v34  ;;  %v1576_v43 = vadd.f32 %v7950_v21, %v7744_v48  ;;  %v3039_v25 = vadd.f32 %v2654_v13, %v1829_v45  ;;  %v3130_v48 = vld [vmem:[%s8048_s18 + $0x108] sm:$0xff] }
 0x1cd   : > { %10733 = vst [vmem:[#allocation110_spill] sm:$0xff] %v8124_v38  ;;  %6445 = vpow2.f32 %v6216_v11  ;;  %v1831_v14 = vadd.f32 %v7952_v63, %v7771_v57  ;;  %v6231_v3 = vmul.f32 -1.442695, %v8120_v6  ;;  %v6198_v9 = vmul.f32 -1.442695, %v8124_v38  ;;  %v3104_v63 = vld [vmem:[%s8048_s18 + $0x38] sm:$0xff] }
 0x1ce   : > { %v2405_v32 = vpop.f32.mrf.mxu0  ;;  %v2660_v15 = vpop.f32.mrf.mxu1  ;;  %6447 = vpow2.f32 %v6197_v4  ;;  %v8136_v61 = vadd.f32 %v3129_v24, %v3065_v10  ;;  %v3066_v8 = vadd.f32 %v2401_v27, %v1576_v43  ;;  %v6232_v21 = vmul.f32 -1.442695, %v8126_v7 }
 0x1cf   : > { %v6432_v16 = vpop.eup %6431  ;;  %v3040_v5 = vadd.f32 %v2656_v31, %v1831_v14  ;;  %v8140_v33 = vadd.f32 %v3103_v28, %v3039_v25  ;;  %6449 = vpow2.f32 %v6231_v3  ;;  %v1580_v27 = vadd.f32 %v7954_v40, %v7765_v47 }
 0x1d0   : > { %10734 = vst [vmem:[#allocation111_spill] sm:$0xff] %v8136_v61  ;;  %v2407_v36 = vpop.f32.mrf.mxu0  ;;  %v2662_v39 = vpop.f32.mrf.mxu1  ;;  %v3419_v11 = vadd.f32 1.0, %v6432_v16  ;;  %6451 = vpow2.f32 %v6198_v9  ;;  %v6213_v41 = vmul.f32 -1.442695, %v8136_v61  ;;  %v8146_v42 = vadd.f32 %v3130_v48, %v3066_v8 }
 0x1d1   : > { %v6434_v17 = vpop.eup %6433  ;;  %10735 = vst [vmem:[#allocation112_spill] sm:$0xff] %v8140_v33  ;;  %6453 = vpow2.f32 %v6232_v21  ;;  %v8150_v45 = vadd.f32 %v3104_v63, %v3040_v5  ;;  %v6187_v31 = vmul.f32 -1.442695, %v8140_v33  ;;  %v1582_v25 = vadd.f32 %v7958_v1, %v7775_v53  ;;  %v3145_v53 = vld [vmem:[%s8048_s18 + $0x180] sm:$0xff] }
 0x1d2   : > { %v8143_v57 = vpop.f32.mrf.mxu0  ;;  %10736 = vst [vmem:[#allocation113_spill] sm:$0xff] %v8146_v42  ;;  %v3420_v4 = vadd.f32 1.0, %v6434_v17  ;;  %v2666_v10 = vpop.f32.mrf.mxu1  ;;  %6455 = vrcp.f32 %v3419_v11  ;;  %v1835_v28 = vadd.f32 %v7956_v0, %v7790_v59  ;;  %v6214_v16 = vmul.f32 -1.442695, %v8146_v42  ;;  %v3146_v17 = vld [vmem:[%s8048_s18 + $0x188] sm:$0xff]  ;;  %v10781_v33 = vld [vmem:[#allocation51_spill] sm:$0xff] }
 0x1d3   : > { %v6436_v34 = vpop.eup %6435  ;;  %10737 = vst [vmem:[#allocation114_spill] sm:$0xff] %v8150_v45  ;;  %6457 = vpow2.f32 %v6213_v41  ;;  %v3081_v40 = vadd.f32 %v2405_v32, %v1580_v27  ;;  %v1837_v8 = vadd.f32 %v7960_v55, %v7802_v23  ;;  %v6188_v1 = vmul.f32 -1.442695, %v8150_v45  ;;  %v10739_v27 = vld [vmem:[#allocation35_spill] sm:$0xff]  ;;  %v10802_v42 = vld [vmem:[#allocation56_spill] sm:$0xff] }
 0x1d4   : > { %v8148_v13 = vpop.f32.mrf.mxu0  ;;  %v3435_v14 = vadd.f32 1.0, %v6436_v34  ;;  %6459 = vrcp.f32 %v3420_v4  ;;  %v3082_v21 = vadd.f32 %v2407_v36, %v1582_v25  ;;  %v2668_v48 = vpop.f32.mrf.mxu1  ;;  %v1740_v0 = vadd.f32 %v7962_v56, %v7796_v12  ;;  %v3119_v36 = vld [vmem:[%s8048_s18 + $0xb0] sm:$0xff] }
 0x1d5   : > { %v6438_v43 = vpop.eup %6437  ;;  %6461 = vpow2.f32 %v6187_v31  ;;  %v3055_v32 = vadd.f32 %v2660_v15, %v1835_v28  ;;  %v1841_v11 = vadd.f32 %v7964_v52, %v7812_v62  ;;  %v8175_v23 = vadd.f32 %v7966_v60, %v7806_v29  ;;  %v10740_v31 = vld [vmem:[#allocation71_spill] sm:$0xff]  ;;  %v10742_v28 = vld [vmem:[#allocation72_spill] sm:$0xff] }
 0x1d6   : > { %v8155_v24 = vpop.f32.mrf.mxu0  ;;  %v3436_v59 = vadd.f32 1.0, %v6438_v43  ;;  %6463 = vrcp.f32 %v3435_v14  ;;  %v1843_v41 = vadd.f32 %v7968_v58, %v7822_v51  ;;  %v8180_v12 = vadd.f32 %v3145_v53, %v3081_v40  ;;  %v2672_v62 = vpop.f32.mrf.mxu1  ;;  %v3120_v14 = vld [vmem:[%s8048_s18 + $0xb8] sm:$0xff] }
 0x1d7   : > { %v6440_v3 = vpop.eup %6439  ;;  %6465 = vpow2.f32 %v6214_v16  ;;  %v8186_v52 = vadd.f32 %v7970_v49, %v7816_v26  ;;  %v8188_v29 = vadd.f32 %v3146_v17, %v3082_v21  ;;  %v8190_v58 = vadd.f32 %v3119_v36, %v3055_v32  ;;  %v10744_v21 = vld [vmem:[#allocation73_spill] sm:$0xff]  ;;  %v10746_v32 = vld [vmem:[#allocation74_spill] sm:$0xff] }
 0x1d8   : > { %v8162_v47 = vpop.f32.mrf.mxu0  ;;  %v6442_v9 = vpop.eup %6441  ;;  %v3417_v55 = vadd.f32 1.0, %v6440_v3  ;;  %6467 = vpow2.f32 %v6188_v1  ;;  %v3056_v51 = vadd.f32 %v2662_v39, %v1837_v8  ;;  %v1847_v43 = vadd.f32 %v10740_v31, %v10739_v27  ;;  %v10741_v3 = vld [vmem:[#allocation34_spill] sm:$0xff]  ;;  %v10743_v8 = vld [vmem:[#allocation37_spill] sm:$0xff] }
 0x1d9   : > { %v6444_v5 = vpop.eup %6443  ;;  %v3451_v56 = vadd.f32 1.0, %v6442_v9  ;;  %6469 = vrcp.f32 %v3436_v59  ;;  %10738 = vst [vmem:[#allocation115_spill] sm:$0xff] %v8190_v58  ;;  %v3037_v49 = vadd.f32 %v8143_v57, %v1740_v0  ;;  %v1748_v16 = vadd.f32 %v10742_v28, %v10741_v3  ;;  %v3101_v9 = vld [vmem:[%s8048_s18 + $0x20] sm:$0xff]  ;;  %v10745_v59 = vld [vmem:[#allocation36_spill] sm:$0xff]  ;;  %v3135_v0 = vld [vmem:[%s8048_s18 + $0x130] sm:$0xff] }
 0x1da   : > { %v6446_v63 = vpop.eup %6445  ;;  %v8182_v15 = vpop.f32.mrf.mxu0  ;;  %v3418_v60 = vadd.f32 1.0, %v6444_v5  ;;  %6471 = vrcp.f32 %v3417_v55  ;;  %v6229_v40 = vmul.f32 -1.442695, %v8180_v12  ;;  %v3071_v1 = vadd.f32 %v2666_v10, %v1841_v11  ;;  %v3136_v27 = vld [vmem:[%s8048_s18 + $0x138] sm:$0xff] }
 0x1db   : > { %v6448_v34 = vpop.eup %6447  ;;  %v3452_v4 = vadd.f32 1.0, %v6446_v63  ;;  %6473 = vrcp.f32 %v3451_v56  ;;  %v1849_v5 = vadd.f32 %v10744_v21, %v10743_v8  ;;  %v8206_v17 = vadd.f32 %v10746_v32, %v10745_v59  ;;  %v2674_v63 = vpop.f32.mrf.mxu1  ;;  %v3151_v8 = vld [vmem:[%s8048_s18 + $0x1b0] sm:$0xff] }
 0x1dc   : > { %v3433_v25 = vadd.f32 1.0, %v6448_v34  ;;  %v6450_v26 = vpop.eup %6449  ;;  %v8200_v53 = vpop.f32.mrf.mxu0  ;;  %6475 = vrcp.f32 %v3418_v60  ;;  %v6230_v57 = vmul.f32 -1.442695, %v8188_v29  ;;  %v6203_v10 = vmul.f32 -1.442695, %v8190_v58  ;;  %v10755_v32 = vld [vmem:[#allocation41_spill] sm:$0xff] }
 0x1dd   : > { %v6452_v39 = vpop.eup %6451  ;;  %6477 = vrcp.f32 %v3452_v4  ;;  %v8211_v11 = vadd.f32 %v3120_v14, %v3056_v51  ;;  %v3072_v36 = vadd.f32 %v2668_v48, %v1843_v41  ;;  %v3467_v34 = vadd.f32 1.0, %v6450_v26  ;;  %v10750_v51 = vld [vmem:[#allocation39_spill] sm:$0xff]  ;;  %v10752_v41 = vld [vmem:[#allocation38_spill] sm:$0xff] }
 0x1de   : > { %v6454_v55 = vpop.eup %6453  ;;  %6479 = vrcp.f32 %v3433_v25  ;;  %v8213_v56 = vadd.f32 %v3101_v9, %v3037_v49  ;;  %v3087_v31 = vadd.f32 %v2672_v62, %v1847_v43  ;;  %v3434_v3 = vadd.f32 1.0, %v6452_v39  ;;  %v8219_v4 = vpop.f32.mrf.mxu0  ;;  %v10751_v14 = vld [vmem:[#allocation75_spill] sm:$0xff]  ;;  %v10753_v25 = vld [vmem:[#allocation76_spill] sm:$0xff]  ;;  %v3152_v62 = vld [vmem:[%s8048_s18 + $0x1b8] sm:$0xff] }
 0x1df   : > { %10747 = vst [vmem:[#allocation35_spill] sm:$0xff] %v8211_v11  ;;  %v6456_v60 = vpop.eup %6455  ;;  %6481 = vpow2.f32 %v6229_v40  ;;  %v8216_v28 = vadd.f32 %v3135_v0, %v3071_v1  ;;  %v3088_v21 = vadd.f32 %v2674_v63, %v1849_v5  ;;  %v2007_v48 = vadd.f32 %v10751_v14, %v10750_v51  ;;  %v2832_v43 = vpop.f32.mrf.mxu1  ;;  %v10756_v0 = vld [vmem:[#allocation77_spill] sm:$0xff] }
 0x1e0   : > { %10748 = vst [vmem:[#allocation71_spill] sm:$0xff] %v8213_v56  ;;  %v6458_v59 = vpop.eup %6457  ;;  %v8225_v49 = vadd.f32 %v10753_v25, %v10752_v41  ;;  %v3468_v26 = vadd.f32 1.0, %v6454_v55  ;;  %6483 = vpow2.f32 %v6230_v57  ;;  %v6204_v9 = vmul.f32 -1.442695, %v8211_v11  ;;  %v3102_v55 = vld [vmem:[%s8048_s18 + $0x28] sm:$0xff]  ;;  %v10760_v41 = vld [vmem:[#allocation78_spill] sm:$0xff] }
 0x1e1   : > { %10749 = vst [vmem:[#allocation34_spill] sm:$0xff] %v8216_v28  ;;  %v8228_v40 = vpop.eup %6459  ;;  %6485 = vpow2.f32 %v6203_v10  ;;  %v3038_v1 = vadd.f32 %v8148_v13, %v8175_v23  ;;  %v8233_v39 = vadd.f32 %v3136_v27, %v3072_v36  ;;  %v8237_v63 = vadd.f32 %v10756_v0, %v10755_v32  ;;  %v8250_v27 = vpop.f32.mrf.mxu0 }
 0x1e2   : > { %v6462_v5 = vpop.eup %6461  ;;  %6487 = vrcp.f32 %v3467_v34  ;;  %v6185_v57 = vmul.f32 -1.442695, %v8213_v56  ;;  %v8241_v51 = vadd.f32 %v3151_v8, %v3087_v31  ;;  %v6219_v13 = vmul.f32 -1.442695, %v8216_v28  ;;  %v10759_v34 = vld [vmem:[#allocation40_spill] sm:$0xff]  ;;  %v3117_v8 = vld [vmem:[%s8048_s18 + $0xa0] sm:$0xff]  ;;  %v2834_v32 = vpop.f32.mrf.mxu1 }
 0x1e3   : > { %10754 = vst [vmem:[#allocation72_spill] sm:$0xff] %v8233_v39  ;;  %v8243_v10 = vpop.eup %6463  ;;  %6489 = vrcp.f32 %v3434_v3  ;;  %v3053_v23 = vadd.f32 %v8155_v24, %v8186_v52  ;;  %v8248_v36 = vadd.f32 %v3152_v62, %v3088_v21  ;;  %v8254_v25 = vadd.f32 %v10760_v41, %v10759_v34  ;;  %v3118_v52 = vld [vmem:[%s8048_s18 + $0xa8] sm:$0xff]  ;;  %v10762_v34 = vld [vmem:[#allocation43_spill] sm:$0xff] }
 0x1e4   : > { %10757 = vst [vmem:[#allocation37_spill] sm:$0xff] %v8241_v51  ;;  %v6466_v14 = vpop.eup %6465  ;;  %6491 = vrcp.f32 %v3468_v26  ;;  %v3449_v31 = vadd.f32 1.0, %v6458_v59  ;;  %v3054_v3 = vadd.f32 %v8162_v47, %v1748_v16  ;;  %v8258_v37 = vadd.f32 %v3102_v55, %v3038_v1  ;;  %v10763_v26 = vld [vmem:[#allocation79_spill] sm:$0xff]  ;;  %v10764_v1 = vld [vmem:[#allocation42_spill] sm:$0xff]  ;;  %v10765_v55 = vld [vmem:[#allocation80_spill] sm:$0xff] }
 0x1e5   : > { %10758 = vst [vmem:[#allocation73_spill] sm:$0xff] %v8248_v36  ;;  %v6468_v0 = vpop.eup %6467  ;;  %6493 = vpow2.f32 %v6204_v9  ;;  %v6220_v24 = vmul.f32 -1.442695, %v8233_v39  ;;  %v8263_v21 = vmul.f32 %v6456_v60, %v8058_v2  ;;  %v8269_v59 = vadd.f32 %v10763_v26, %v10762_v34  ;;  %v3133_v56 = vld [vmem:[%s8048_s18 + $0x120] sm:$0xff]  ;;  %v10767_v26 = vld [vmem:[#allocation45_spill] sm:$0xff] }
 0x1e6   : > { %10761 = vst [vmem:[#allocation36_spill] sm:$0xff] %v8258_v37  ;;  %v8265_v62 = vpop.eup %6469  ;;  %6495 = vpow2.f32 %v6185_v57  ;;  %v6235_v47 = vmul.f32 -1.442695, %v8241_v51  ;;  %v3069_v16 = vadd.f32 %v8182_v15, %v8206_v17  ;;  %v8276_v41 = vadd.f32 %v10765_v55, %v10764_v1  ;;  %v8284_v57 = vpop.f32.mrf.mxu0  ;;  %v10768_v15 = vld [vmem:[#allocation81_spill] sm:$0xff]  ;;  %v10782_v39 = vld [vmem:[#allocation87_spill] sm:$0xff] }
 0x1e7   : > { %v6472_v9 = vpop.eup %6471  ;;  %6497 = vpow2.f32 %v6219_v13  ;;  %v8278_v2 = vadd.f32 %v3117_v8, %v3053_v23  ;;  %v6236_v60 = vmul.f32 -1.442695, %v8248_v36  ;;  %5093 = vrot.lane.b32.xlu0 %v8263_v21, %s6713_s26  ;;  %v8290_v17 = vadd.f32 %v10768_v15, %v10767_v26  ;;  %v8294_v13 = vpop.f32.mrf.mxu1  ;;  %v10770_v8 = vld [vmem:[#allocation44_spill] sm:$0xff]  ;;  %v10774_v15 = vld [vmem:[#allocation83_spill] sm:$0xff] }
 0x1e8   : > { %v8286_v34 = vpop.eup %6473  ;;  %6499 = vrcp.f32 %v3449_v31  ;;  %v3423_v1 = vadd.f32 1.0, %v6462_v5  ;;  %v8292_v55 = vadd.f32 %v3118_v52, %v3054_v3  ;;  %v8298_v35 = vadd.f32 %v10771_v19, %v10770_v8  ;;  %v10773_v52 = vld [vmem:[#allocation47_spill] sm:$0xff]  ;;  %v10775_v19 = vld [vmem:[#allocation46_spill] sm:$0xff]  ;;  %v10776_v8 = vld [vmem:[#allocation84_spill] sm:$0xff] }
 0x1e9   : > { %10766 = vst [vmem:[#allocation74_spill] sm:$0xff] %v8278_v2  ;;  %v6476_v23 = vpop.eup %6475  ;;  %v6186_v45 = vmul.f32 -1.442695, %v8258_v37  ;;  %6501 = vpow2.f32 %v6220_v24  ;;  %v3043_v58 = vadd.f32 %v2832_v43, %v2007_v48  ;;  %v3450_v26 = vadd.f32 1.0, %v6466_v14  ;;  %v3107_v43 = vld [vmem:[%s8048_s18 + $0x50] sm:$0xff]  ;;  %v8320_v14 = vpop.f32.mrf.mxu0 }
 0x1ea   : > { %10769 = vst [vmem:[#allocation39_spill] sm:$0xff] %v8292_v55  ;;  %v8301_v11 = vpop.eup %6477  ;;  %6503 = vpow2.f32 %v6235_v47  ;;  %v8303_v5 = vadd.f32 %v3133_v56, %v3069_v16  ;;  %v3070_v31 = vadd.f32 %v8200_v53, %v8225_v49  ;;  %v8311_v28 = vadd.f32 %v10774_v15, %v10773_v52  ;;  %v3134_v56 = vld [vmem:[%s8048_s18 + $0x128] sm:$0xff]  ;;  %v10777_v53 = vld [vmem:[#allocation49_spill] sm:$0xff]  ;;  %v8328_v15 = vpop.f32.mrf.mxu1 }
 0x1eb   : > { %v8307_v3 = vpop.eup %6479  ;;  %v8315_v37 = vadd.f32 %v10776_v8, %v10775_v19  ;;  %v6201_v48 = vmul.f32 -1.442695, %v8278_v2  ;;  %6505 = vpow2.f32 %v6236_v60  ;;  %v10778_v49 = vld [vmem:[#allocation85_spill] sm:$0xff]  ;;  %v6202_v16 = vmul.f32 -1.442695, %v8292_v55  ;;  %v10779_v8 = vld [vmem:[#allocation48_spill] sm:$0xff] }
 0x1ec   : > { %10772 = vst [vmem:[#allocation75_spill] sm:$0xff] %v8303_v5  ;;  %v6482_v24 = vpop.eup %6481  ;;  %v8324_v47 = vadd.f32 %v10778_v49, %v10777_v53  ;;  %6507 = vrcp.f32 %v3423_v1  ;;  %v3044_v52 = vadd.f32 %v2834_v32, %v8237_v63  ;;  %v10780_v2 = vld [vmem:[#allocation86_spill] sm:$0xff]  ;;  %v8336_v51 = vadd.f32 %v10782_v39, %v10781_v33  ;;  %v8348_v39 = vpop.f32.mrf.mxu0 }
 0x1ed   : > { %v6484_v19 = vpop.eup %6483  ;;  %v8332_v60 = vadd.f32 %v10780_v2, %v10779_v8  ;;  %v3424_v36 = vadd.f32 1.0, %v6468_v0  ;;  %6509 = vpow2.f32 %v6186_v45  ;;  %v3108_v53 = vld [vmem:[%s8048_s18 + $0x58] sm:$0xff]  ;;  %v6217_v1 = vmul.f32 -1.442695, %v8303_v5 }
 0x1ee   : > { %v6486_v49 = vpop.eup %6485  ;;  %6511 = vrcp.f32 %v3450_v26  ;;  %v8340_v55 = vadd.f32 %v3107_v43, %v3043_v58  ;;  %v8342_v63 = vadd.f32 %v3134_v56, %v3070_v31  ;;  %v3465_v38 = vadd.f32 1.0, %v6482_v24  ;;  %v2844_v26 = vpop.f32.mrf.mxu1  ;;  %v10788_v56 = vld [vmem:[#allocation88_spill] sm:$0xff] }
 0x1ef   : > { %v8344_v32 = vpop.eup %6487  ;;  %6513 = vpow2.f32 %v6201_v48  ;;  %v3085_v33 = vadd.f32 %v8219_v4, %v8254_v25  ;;  %v8351_v45 = vmul.f32 %v6472_v9, %v8091_v54  ;;  %v3466_v2 = vadd.f32 1.0, %v6484_v19  ;;  %v10787_v48 = vld [vmem:[#allocation50_spill] sm:$0xff]  ;;  %v10789_v4 = vld [vmem:[#allocation53_spill] sm:$0xff]  ;;  %v3149_v9 = vld [vmem:[%s8048_s18 + $0x1a0] sm:$0xff] }
 0x1f0   : > { %10783 = vst [vmem:[#allocation38_spill] sm:$0xff] %v8340_v55  ;;  %10784 = vst [vmem:[#allocation76_spill] sm:$0xff] %v8342_v63  ;;  %v8353_v0 = vpop.eup %6489  ;;  %6515 = vpow2.f32 %v6202_v16  ;;  %v8355_v58 = vadd.f32 %v3108_v53, %v3044_v52  ;;  %v8358_v31 = vmul.f32 %v6476_v23, %v8103_v50  ;;  %v8362_v24 = vadd.f32 %v10788_v56, %v10787_v48  ;;  %v10790_v25 = vld [vmem:[#allocation89_spill] sm:$0xff]  ;;  %v10791_v52 = vld [vmem:[#allocation52_spill] sm:$0xff] }
 0x1f1   : > { %10785 = vst [vmem:[#allocation41_spill] sm:$0xff] %v8353_v0  ;;  %v6492_v43 = vpop.eup %6491  ;;  %v8366_v8 = vadd.f32 %v10790_v25, %v10789_v4  ;;  %6517 = vrcp.f32 %v3424_v36  ;;  %v3439_v54 = vadd.f32 1.0, %v6486_v49  ;;  %3674 = vrot.lane.b32.xlu1 %v8351_v45, %s6712_s13  ;;  %v10792_v19 = vld [vmem:[#allocation90_spill] sm:$0xff]  ;;  %v10793_v23 = vld [vmem:[#allocation55_spill] sm:$0xff]  ;;  %v6191_v48 = vmul.f32 -1.442695, %v8340_v55 }
 0x1f2   : > { %10786 = vst [vmem:[#allocation77_spill] sm:$0xff] %v8355_v58  ;;  %v6494_v16 = vpop.eup %6493  ;;  %v8373_v50 = vadd.f32 %v10792_v19, %v10791_v52  ;;  %v10794_v53 = vld [vmem:[#allocation91_spill] sm:$0xff]  ;;  %6519 = vpow2.f32 %v6217_v1  ;;  %3682 = vrot.lane.b32.xlu0 %v8358_v31, %s6712_s13  ;;  %v10796_v49 = vld [vmem:[#allocation54_spill] sm:$0xff]  ;;  %v10797_v56 = vld [vmem:[#allocation92_spill] sm:$0xff]  ;;  %v6218_v19 = vmul.f32 -1.442695, %v8342_v63  ;;  %v8394_v55 = vadd.f32 %v3149_v9, %v3085_v33 }
 0x1f3   : > { %v8377_v5 = vadd.f32 %v10794_v53, %v10793_v23  ;;  %v6496_v36 = vpop.eup %6495  ;;  %v8384_v4 = vadd.f32 %v10797_v56, %v10796_v49  ;;  %v10798_v25 = vld [vmem:[#allocation57_spill] sm:$0xff]  ;;  %6521 = vrcp.f32 %v3465_v38  ;;  %v8391_v23 = vpop.f32.mrf.mxu0  ;;  %v6192_v53 = vmul.f32 -1.442695, %v8355_v58  ;;  %v10805_v38 = vld [vmem:[#allocation59_spill] sm:$0xff]  ;;  %v3150_v58 = vld [vmem:[%s8048_s18 + $0x1a8] sm:$0xff] }
 0x1f4   : > { %v10799_v0 = vld [vmem:[#allocation93_spill] sm:$0xff]  ;;  %v6498_v1 = vpop.eup %6497  ;;  %6523 = vrcp.f32 %v3466_v2  ;;  %v3086_v49 = vadd.f32 %v8250_v27, %v8276_v41  ;;  %v2846_v56 = vpop.f32.mrf.mxu1  ;;  %v10806_v63 = vld [vmem:[#allocation95_spill] sm:$0xff]  ;;  %v3440_v2 = vadd.f32 1.0, %v6494_v16  ;;  %v10808_v27 = vld [vmem:[#allocation58_spill] sm:$0xff] }
 0x1f5   : > { %10795 = vst [vmem:[#allocation40_spill] sm:$0xff] %v8377_v5  ;;  %v8388_v52 = vadd.f32 %v10799_v0, %v10798_v25  ;;  %v8398_v5 = vpop.eup %6499  ;;  %v10803_v0 = vld [vmem:[#allocation94_spill] sm:$0xff]  ;;  %6525 = vrcp.f32 %v3439_v54  ;;  %3690 = vrot.lane.b32.xlu1 %v8263_v21, %s6712_s13  ;;  %v10809_v41 = vld [vmem:[#allocation96_spill] sm:$0xff]  ;;  %v8423_v54 = vmul.f32 %v8243_v10, %v8073_v30  ;;  %v3455_v16 = vadd.f32 1.0, %v6498_v1  ;;  %v8426_v61 = vpop.f32.mrf.mxu0 }
 0x1f6   : > { %10801 = vst [vmem:[#allocation43_spill] sm:$0xff] %v8398_v5  ;;  %v8402_v25 = vadd.f32 %v10803_v0, %v10802_v42  ;;  %v6502_v33 = vpop.eup %6501  ;;  %v8413_v9 = vadd.f32 %v10809_v41, %v10808_v27  ;;  %v3421_v5 = vadd.f32 1.0, %v6496_v36  ;;  %6527 = vpow2.f32 %v6191_v48  ;;  %v2850_v36 = vpop.f32.mrf.mxu1 }
 0x1f7   : > { %10800 = vst [vmem:[#allocation78_spill] sm:$0xff] %v8388_v52  ;;  %v8406_v52 = vadd.f32 %v10806_v63, %v10805_v38  ;;  %v3059_v42 = vadd.f32 %v8294_v13, %v8269_v59  ;;  %v6504_v0 = vpop.eup %6503  ;;  %v10811_v63 = vld [vmem:[#allocation97_spill] sm:$0xff]  ;;  %6529 = vpow2.f32 %v6218_v19  ;;  %v6233_v48 = vmul.f32 -1.442695, %v8394_v55 }
 0x1f8   : > { %10804 = vst [vmem:[#allocation79_spill] sm:$0xff] %v8402_v25  ;;  %v10810_v25 = vld [vmem:[#allocation61_spill] sm:$0xff]  ;;  %v6506_v27 = vpop.eup %6505  ;;  %6531 = vpow2.f32 %v6192_v53  ;;  %v8429_v59 = vadd.f32 %v3150_v58, %v3086_v49  ;;  %v3075_v13 = vadd.f32 %v2844_v26, %v8311_v28  ;;  %v8435_v10 = vmul.f32 %v6492_v43, %v8126_v7  ;;  %v8455_v49 = vpop.f32.mrf.mxu0 }
 0x1f9   : > { %10807 = vst [vmem:[#allocation42_spill] sm:$0xff] %v8406_v52  ;;  %v8419_v38 = vadd.f32 %v10811_v63, %v10810_v25  ;;  %v3123_v52 = vld [vmem:[%s8048_s18 + $0xd0] sm:$0xff]  ;;  %v8432_v25 = vpop.eup %6507  ;;  %6533 = vrcp.f32 %v3440_v2  ;;  %v3472_v30 = vadd.f32 1.0, %v6506_v27  ;;  %v8439_v19 = vmul.f32 %v8228_v40, %v8064_v22  ;;  %5077 = vrot.lane.b32.xlu1 %v8351_v45, %s6713_s26  ;;  %v2852_v2 = vpop.f32.mrf.mxu1 }
 0x1fa   : > { %10812 = vst [vmem:[#allocation80_spill] sm:$0xff] %v8435_v10  ;;  %v6510_v58 = vpop.eup %6509  ;;  %v8445_v28 = vmul.f32 %v8344_v32, %v8120_v6  ;;  %6535 = vrcp.f32 %v3421_v5  ;;  %v3471_v26 = vadd.f32 1.0, %v6504_v0  ;;  %v8447_v1 = vadd.f32 %v3123_v52, %v3059_v42  ;;  %v3139_v7 = vld [vmem:[%s8048_s18 + $0x150] sm:$0xff]  ;;  %4031 = vmatprep.subr.mxu1 %v8435_v10  ;;  %v3140_v32 = vld [vmem:[%s8048_s18 + $0x158] sm:$0xff]  ;;  %v10830_v10 = vld [vmem:[#allocation100_spill] sm:$0xff] }
 0x1fb   : > { %v8450_v43 = vpop.eup %6511  ;;  %6537 = vrcp.f32 %v3455_v16  ;;  %v3456_v22 = vadd.f32 1.0, %v6502_v33  ;;  %v3060_v40 = vadd.f32 %v8328_v15, %v8290_v17  ;;  %v3076_v53 = vadd.f32 %v2846_v56, %v8324_v47  ;;  %3698 = vrot.lane.b32.xlu0 %v8439_v19, %s6712_s13  ;;  %v3124_v33 = vld [vmem:[%s8048_s18 + $0xd8] sm:$0xff]  ;;  %v3155_v42 = vld [vmem:[%s8048_s18 + $0x1d0] sm:$0xff]  ;;  %v3121_v16 = vld [vmem:[%s8048_s18 + $0xc0] sm:$0xff] }
 0x1fc   : > { %10813 = vst [vmem:[#allocation45_spill] sm:$0xff] %v8447_v1  ;;  %v6514_v6 = vpop.eup %6513  ;;  %6539 = vpow2.f32 %v6233_v48  ;;  %v6234_v5 = vmul.f32 -1.442695, %v8429_v59  ;;  %v3091_v52 = vadd.f32 %v2850_v36, %v8336_v51  ;;  %4032 = vmatpush1.msra.mxu1 %v8445_v28  ;;  %v8466_v17 = vmul.f32 %v8301_v11, %v8108_v44  ;;  %v8492_v48 = vpop.f32.mrf.mxu0 }
 0x1fd   : > { %v6516_v47 = vpop.eup %6515  ;;  %v8470_v15 = vmul.f32 %v8286_v34, %v8093_v20  ;;  %v3422_v56 = vadd.f32 1.0, %v6510_v58  ;;  %6541 = vrcp.f32 %v3472_v30  ;;  %v8473_v41 = vadd.f32 %v3139_v7, %v3075_v13  ;;  %5085 = vrot.lane.b32.xlu1 %v8358_v31, %s6713_s26  ;;  %v8516_v7 = vld [vmem:[%s10343_s3 + $0x8] sm:$0xff] }
 0x1fe   : > { %v8478_v51 = vpop.eup %6517  ;;  %6543 = vrcp.f32 %v3471_v26  ;;  %v6207_v44 = vmul.f32 -1.442695, %v8447_v1  ;;  %v3057_v11 = vadd.f32 %v8348_v39, %v8332_v60  ;;  %4033 = vmatprep.subr.mxu1 %v8466_v17  ;;  %v8486_v20 = vmul.f32 %v8265_v62, %v8088_v18  ;;  %v3156_v18 = vld [vmem:[%s8048_s18 + $0x1d8] sm:$0xff]  ;;  %v8500_v62 = vpop.f32.mrf.mxu1  ;;  %v10837_v1 = vld [vmem:[#allocation73_spill] sm:$0xff] }
 0x1ff   : > { %v6520_v34 = vpop.eup %6519  ;;  %6545 = vrcp.f32 %v3456_v22  ;;  %v3437_v0 = vadd.f32 1.0, %v6514_v6  ;;  %v8488_v63 = vadd.f32 %v3140_v32, %v3076_v53  ;;  %v3092_v27 = vadd.f32 %v2852_v2, %v8366_v8  ;;  %4034 = vmatpush1.msra.mxu1 %v8470_v15  ;;  %v3137_v32 = vld [vmem:[%s8048_s18 + $0x140] sm:$0xff] }
 0x200   : > { %v6522_v60 = vpop.eup %6521  ;;  %v3438_v39 = vadd.f32 1.0, %v6516_v47  ;;  %6547 = vpow2.f32 %v6234_v5  ;;  %v8495_v13 = vadd.f32 %v3124_v33, %v3060_v40  ;;  %v8497_v36 = vadd.f32 %v3155_v42, %v3091_v52  ;;  %4035 = vmatprep.subr.mxu1 %v8486_v20  ;;  %v8534_v52 = vpop.f32.mrf.mxu0 }
 0x201   : > { %v6524_v30 = vpop.eup %6523  ;;  %6549 = vrcp.f32 %v3422_v56  ;;  %v6223_v8 = vmul.f32 -1.442695, %v8473_v41  ;;  %v3058_v58 = vadd.f32 %v8391_v23, %v8362_v24  ;;  %v8508_v26 = vmul.f32 %v8307_v3, %v8112_v46  ;;  %4036 = vmatpush1.msra.mxu1 %v8423_v54  ;;  %5101 = vrot.lane.b32.xlu1 %v8439_v19, %s6713_s26  ;;  %v3122_v46 = vld [vmem:[%s8048_s18 + $0xc8] sm:$0xff] }
 0x202   : > { %v8518_v22 = vpop.eup %6525  ;;  %v3453_v40 = vadd.f32 1.0, %v6520_v34  ;;  %6551 = vpow2.f32 %v6207_v44  ;;  %v8520_v24 = vadd.f32 %v3121_v16, %v3057_v11  ;;  %v3073_v3 = vadd.f32 %v8426_v61, %v8373_v50  ;;  %4037 = vmatprep.subr.mxu1 %v8439_v19  ;;  %v3105_v19 = vld [vmem:[%s8048_s18 + $0x40] sm:$0xff]  ;;  %v10817_v44 = vld [vmem:[#allocation60_spill] sm:$0xff]  ;;  %v10818_v11 = vld [vmem:[#allocation98_spill] sm:$0xff] }
 0x203   : > { %v8526_v23 = vpop.eup %6527  ;;  %6553 = vrcp.f32 %v3437_v0  ;;  %v3041_v53 = vadd.f32 %v8284_v57, %v8298_v35  ;;  %v6224_v6 = vmul.f32 -1.442695, %v8488_v63  ;;  %v8531_v5 = vadd.f32 %v3156_v18, %v3092_v27  ;;  %3676 = vrot.lane.b32.xlu0 %v8508_v26, %s6712_s13  ;;  %4038 = vmatpush1.msra.mxu1 %v8263_v21  ;;  %v8542_v35 = vpop.f32.mrf.mxu1  ;;  %v3138_v16 = vld [vmem:[%s8048_s18 + $0x148] sm:$0xff] }
 0x204   : > { %10814 = vst [vmem:[#allocation81_spill] sm:$0xff] %v8520_v24  ;;  %v6530_v61 = vpop.eup %6529  ;;  %6555 = vrcp.f32 %v3438_v39  ;;  %v6208_v50 = vmul.f32 -1.442695, %v8495_v13  ;;  %v6239_v2 = vmul.f32 -1.442695, %v8497_v36  ;;  %v8545_v57 = vmul.f32 %v6524_v30, %v8188_v29  ;;  %6247 = vmatmul.mubr.msk.f32.vlgmr.msra.gmra.mxu1 %vm3932_vm7, %v8516_v7  ;;  %v8579_v39 = vpop.f32.mrf.mxu0  ;;  %v10821_v30 = vld [vmem:[#allocation111_spill] sm:$0xff] }
 0x205   : > { %v8549_v47 = vpop.eup %6531  ;;  %v8552_v21 = vmul.f32 %v6522_v60, %v8180_v12  ;;  %6557 = vpow2.f32 %v6223_v8  ;;  %v8554_v56 = vadd.f32 %v3122_v46, %v3058_v58  ;;  %v3074_v33 = vadd.f32 %v8455_v49, %v8384_v4  ;;  %5095 = vrot.lane.b32.xlu1 %v8423_v54, %s6713_s26  ;;  %v10822_v8 = vld [vmem:[#allocation43_spill] sm:$0xff]  ;;  %v8588_v46 = vpop.f32.mrf.mxu1 }
 0x206   : > { %v10816_v42 = vmov 0.0   ;;  %v8561_v29 = vpop.eup %6533  ;;  %v8565_v34 = vadd.f32 %v10818_v11, %v10817_v44  ;;  %6559 = vrcp.f32 %v3453_v40  ;;  %v6205_v12 = vmul.f32 -1.442695, %v8520_v24  ;;  %3960 = vmatprep.subr.mxu0 %v8545_v57  ;;  %v10825_v11 = vld [vmem:[#allocation63_spill] sm:$0xff] }
 0x207   : > { %10815 = vst [vmem:[#allocation44_spill] sm:$0xff] %v8554_v56  ;;  %4213 = vmatprep.mubr.f32.mxu1 %v10816_v42  ;;  %v8568_v0 = vadd.f32 %v3137_v32, %v3073_v3  ;;  %v8572_v4 = vpop.eup %6535  ;;  %v8574_v49 = vadd.f32 %v3105_v19, %v3041_v53  ;;  %v3042_v27 = vadd.f32 %v8320_v14, %v8315_v37  ;;  %6561 = vpow2.f32 %v6224_v6  ;;  %v10823_v37 = vld [vmem:[#allocation113_spill] sm:$0xff]  ;;  %v3106_v53 = vld [vmem:[%s8048_s18 + $0x48] sm:$0xff] }
 0x208   : > { %v6240_v60 = vmul.f32 -1.442695, %v8531_v5  ;;  %3692 = vrot.lane.b32.xlu0 %v8423_v54, %s6712_s13  ;;  %3961 = vmatpush1.msra.mxu0 %v8552_v21  ;;  %v6538_v18 = vpop.eup %6537  ;;  %v8586_v58 = vmul.f32 %v10822_v8, %v10821_v30  ;;  %v3454_v40 = vadd.f32 1.0, %v6530_v61  ;;  %6563 = vpow2.f32 %v6208_v50  ;;  %v10824_v6 = vld [vmem:[#allocation40_spill] sm:$0xff]  ;;  %v10826_v61 = vld [vmem:[#allocation99_spill] sm:$0xff]  ;;  %v10827_v8 = vld [vmem:[#allocation110_spill] sm:$0xff] }
 0x209   : > { %10819 = vst [vmem:[#allocation82_spill] sm:$0xff] %v8568_v0  ;;  %10820 = vst [vmem:[#allocation47_spill] sm:$0xff] %v8574_v49  ;;  %v8592_v14 = vmul.f32 %v8450_v43, %v10823_v37  ;;  %v6540_v3 = vpop.eup %6539  ;;  %6565 = vpow2.f32 %v6239_v2  ;;  %v6206_v54 = vmul.f32 -1.442695, %v8554_v56  ;;  %v3047_v32 = vadd.f32 %v8500_v62, %v10824_v6  ;;  %v3111_v43 = vld [vmem:[%s8048_s18 + $0x70] sm:$0xff]  ;;  %v10829_v56 = vld [vmem:[#allocation62_spill] sm:$0xff] }
 0x20a   : > { %v8598_v19 = vadd.f32 %v3138_v16, %v3074_v33  ;;  %v6542_v44 = vpop.eup %6541  ;;  %v8602_v50 = vadd.f32 %v10826_v61, %v10825_v11  ;;  %6567 = vpow2.f32 %v6205_v12  ;;  %v6221_v30 = vmul.f32 -1.442695, %v8568_v0  ;;  %v10828_v2 = vld [vmem:[#allocation41_spill] sm:$0xff]  ;;  %v8617_v12 = vpop.f32.mrf.mxu0 }
 0x20b   : > { %3962 = vmatprep.subr.mxu0 %v8592_v14  ;;  %v3626_v37 = vmul.f32 %v10828_v2, %v10827_v8  ;;  %v6544_v24 = vpop.eup %6543  ;;  %v8611_v62 = vadd.f32 %v10830_v10, %v10829_v56  ;;  %v10831_v33 = vld [vmem:[#allocation65_spill] sm:$0xff]  ;;  %v3469_v11 = vadd.f32 1.0, %v6540_v3  ;;  %6569 = vpow2.f32 %v6240_v60  ;;  %v10833_v8 = vld [vmem:[#allocation64_spill] sm:$0xff]  ;;  %v10834_v2 = vld [vmem:[#allocation102_spill] sm:$0xff] }
 0x20c   : > { %v10832_v16 = vld [vmem:[#allocation101_spill] sm:$0xff]  ;;  %3963 = vmatpush1.msra.mxu0 %v8586_v58  ;;  %5079 = vrot.lane.b32.xlu0 %v8508_v26, %s6713_s26  ;;  %v6546_v61 = vpop.eup %6545  ;;  %v8624_v0 = vadd.f32 %v10834_v2, %v10833_v8  ;;  %6571 = vrcp.f32 %v3454_v40  ;;  %v6189_v10 = vmul.f32 -1.442695, %v8574_v49  ;;  %v8627_v56 = vadd.f32 %v3106_v53, %v3042_v27 }
 0x20d   : > { %v8615_v6 = vadd.f32 %v10832_v16, %v10831_v33  ;;  %v3018_v33 = vpop.f32.mrf.mxu1  ;;  %3964 = vmatprep.subr.mxu0 %v3626_v37  ;;  %3684 = vrot.lane.b32.xlu1 %v3626_v37, %s6712_s13  ;;  %v6548_v60 = vpop.eup %6547  ;;  %6573 = vpow2.f32 %v6206_v54  ;;  %v8630_v3 = vadd.f32 %v3111_v43, %v3047_v32  ;;  %v6222_v16 = vmul.f32 -1.442695, %v8598_v19  ;;  %v10839_v2 = vld [vmem:[#allocation37_spill] sm:$0xff] }
 0x20e   : > { %10835 = vst [vmem:[#allocation83_spill] sm:$0xff] %v8627_v56  ;;  %3965 = vmatpush1.msra.mxu0 %v8508_v26  ;;  %v8635_v8 = vmul.f32 %v6542_v44, %v10837_v1  ;;  %v8637_v40 = vpop.eup %6549  ;;  %v8640_v27 = vmul.f32 %v6544_v24, %v10839_v2  ;;  %v3427_v53 = vadd.f32 1.0, %v8526_v23  ;;  %v3470_v49 = vadd.f32 1.0, %v6548_v60  ;;  %v10841_v26 = vld [vmem:[#allocation79_spill] sm:$0xff]  ;;  %v8647_v44 = vpop.f32.mrf.mxu0  ;;  %v10842_v24 = vld [vmem:[#allocation72_spill] sm:$0xff] }
 0x20f   : > { %10836 = vst [vmem:[#allocation46_spill] sm:$0xff] %v8630_v3  ;;  %6575 = vpow2.f32 %v6221_v30  ;;  %3966 = vmatprep.subr.mxu0 %v8358_v31  ;;  %v6552_v54 = vpop.eup %6551  ;;  %v3428_v32 = vadd.f32 1.0, %v8549_v47  ;;  %v3089_v1 = vadd.f32 %v8492_v48, %v10841_v26  ;;  %v8652_v23 = vmul.f32 %v6546_v61, %v10842_v24  ;;  %v10844_v30 = vld [vmem:[#allocation112_spill] sm:$0xff]  ;;  %v10845_v47 = vld [vmem:[#allocation34_spill] sm:$0xff]  ;;  %v3153_v60 = vld [vmem:[%s8048_s18 + $0x1c0] sm:$0xff]  ;;  %v3022_v2 = vpop.f32.mrf.mxu1 }
 0x210   : > { %10838 = vst [vmem:[#allocation84_spill] sm:$0xff] %v8635_v8  ;;  %10840 = vst [vmem:[#allocation49_spill] sm:$0xff] %v8640_v27  ;;  %6577 = vrcp.f32 %v3469_v11  ;;  %3967 = vmatpush1.msra.mxu0 %v8351_v45  ;;  %4173 = vmatprep.subr.mxu1 %v8635_v8  ;;  %v8654_v43 = vpop.eup %6553  ;;  %v8658_v31 = vmul.f32 %v8432_v25, %v10844_v30  ;;  %v8661_v11 = vmul.f32 %v6538_v18, %v10845_v47  ;;  %v10847_v25 = vld [vmem:[#allocation78_spill] sm:$0xff]  ;;  %v10850_v24 = vld [vmem:[#allocation115_spill] sm:$0xff] }
 0x211   : > { %10843 = vst [vmem:[#allocation85_spill] sm:$0xff] %v8652_v23  ;;  %6579 = vrcp.f32 %v3470_v49  ;;  %v6190_v48 = vmul.f32 -1.442695, %v8627_v56  ;;  %5087 = vrot.lane.b32.xlu0 %v3626_v37, %s6713_s26  ;;  %4174 = vmatpush1.msra.mxu1 %v8640_v27  ;;  %v8667_v45 = vpop.eup %6555  ;;  %v6195_v61 = vmul.f32 -1.442695, %v8630_v3  ;;  %v3048_v18 = vadd.f32 %v8542_v35, %v10847_v25  ;;  %v10848_v49 = vld [vmem:[#allocation35_spill] sm:$0xff] }
 0x212   : > { %10846 = vst [vmem:[#allocation48_spill] sm:$0xff] %v8661_v11  ;;  %6581 = vpow2.f32 %v6222_v16  ;;  %4175 = vmatprep.subr.mxu1 %v8652_v23  ;;  %v8675_v26 = vmul.f32 %v8561_v29, %v10848_v49  ;;  %3700 = vrot.lane.b32.xlu1 %v8486_v20, %s6712_s13  ;;  %v6558_v37 = vpop.eup %6557  ;;  %v8681_v30 = vmul.f32 %v8518_v22, %v10850_v24  ;;  %v3443_v16 = vadd.f32 1.0, %v6552_v54  ;;  %v10852_v47 = vld [vmem:[#allocation42_spill] sm:$0xff]  ;;  %v3127_v49 = vld [vmem:[%s8048_s18 + $0xf0] sm:$0xff]  ;;  %v10857_v3 = vld [vmem:[#allocation104_spill] sm:$0xff] }
 0x213   : > { %6583 = vrcp.f32 %v3427_v53  ;;  %v3063_v8 = vadd.f32 %v8588_v46, %v10852_v47  ;;  %4176 = vmatpush1.msra.mxu1 %v8661_v11  ;;  %6246 = vmatmul.mubr.msk.f32.vlgmr.msra.gmra.mxu0 %vm3932_vm7, %v8516_v7  ;;  %v8688_v35 = vpop.eup %6559  ;;  %v3112_v29 = vld [vmem:[%s8048_s18 + $0x78] sm:$0xff]  ;;  %v8691_v25 = vadd.f32 %v3153_v60, %v3089_v1  ;;  %v3090_v22 = vadd.f32 %v8534_v52, %v8413_v9  ;;  %v8696_v53 = vpop.f32.mrf.mxu0  ;;  %v3154_v60 = vld [vmem:[%s8048_s18 + $0x1c8] sm:$0xff]  ;;  %v10854_v47 = vld [vmem:[#allocation67_spill] sm:$0xff] }
 0x214   : > { %10849 = vst [vmem:[#allocation86_spill] sm:$0xff] %v8675_v26  ;;  %10851 = vst [vmem:[#allocation51_spill] sm:$0xff] %v8681_v30  ;;  %6585 = vrcp.f32 %v3428_v32  ;;  %4177 = vmatprep.subr.mxu1 %v8675_v26  ;;  %v10853_v46 = vld [vmem:[#allocation114_spill] sm:$0xff]  ;;  %4142 = vmatprep.mubr.f32.mxu0 %v10816_v42  ;;  %v6562_v32 = vpop.eup %6561  ;;  %v3459_v1 = vadd.f32 1.0, %v6558_v37  ;;  %v3064_v24 = vadd.f32 %v3018_v33, %v8419_v38  ;;  %v3024_v52 = vpop.f32.mrf.mxu1  ;;  %v3143_v38 = vld [vmem:[%s8048_s18 + $0x170] sm:$0xff] }
 0x215   : > { %v8701_v54 = vmul.f32 %v8478_v51, %v10853_v46  ;;  %6587 = vpow2.f32 %v6189_v10  ;;  %v3079_v9 = vadd.f32 %v3022_v2, %v8602_v50  ;;  %5103 = vrot.lane.b32.xlu0 %v8486_v20, %s6713_s26  ;;  %4178 = vmatpush1.msra.mxu1 %v8681_v30  ;;  %v6564_v51 = vpop.eup %6563  ;;  %v10855_v46 = vld [vmem:[#allocation103_spill] sm:$0xff]  ;;  %v10856_v23 = vld [vmem:[#allocation66_spill] sm:$0xff]  ;;  %v3460_v10 = vadd.f32 1.0, %v6562_v32  ;;  %v10858_v50 = vld [vmem:[#allocation68_spill] sm:$0xff]  ;;  %v8736_v30 = vpop.f32.mrf.mxu0 }
 0x216   : > { %v2203_v27 = vadd.f32 %v10855_v46, %v10854_v47  ;;  %v8714_v11 = vadd.f32 %v10857_v3, %v10856_v23  ;;  %6589 = vpow2.f32 %v6190_v48  ;;  %v3128_v37 = vld [vmem:[%s8048_s18 + $0xf8] sm:$0xff]  ;;  %3678 = vrot.lane.b32.xlu1 %v8586_v58, %s6712_s13  ;;  %v6566_v20 = vpop.eup %6565  ;;  %v8725_v47 = vadd.f32 %v3112_v29, %v3048_v18  ;;  %v10862_v23 = vld [vmem:[#allocation69_spill] sm:$0xff]  ;;  %v10863_v48 = vld [vmem:[#allocation107_spill] sm:$0xff] }
 0x217   : > { %4179 = vmatprep.subr.mxu1 %v8701_v54  ;;  %v10859_v33 = vld [vmem:[#allocation106_spill] sm:$0xff]  ;;  %6591 = vrcp.f32 %v3443_v16  ;;  %v8727_v46 = vadd.f32 %v3127_v49, %v3063_v8  ;;  %v6568_v3 = vpop.eup %6567  ;;  %v8732_v32 = vadd.f32 %v10863_v48, %v10862_v23  ;;  %v3475_v26 = vadd.f32 1.0, %v6566_v20  ;;  %v3028_v49 = vpop.f32.mrf.mxu1 }
 0x218   : > { %v8723_v2 = vadd.f32 %v10859_v33, %v10858_v50  ;;  %10860 = vst [vmem:[#allocation87_spill] sm:$0xff] %v8725_v47  ;;  %4180 = vmatpush1.msra.mxu1 %v8658_v31  ;;  %6593 = vpow2.f32 %v6195_v61  ;;  %v8734_v56 = vadd.f32 %v3154_v60, %v3090_v22  ;;  %v6570_v18 = vpop.eup %6569  ;;  %v6237_v8 = vmul.f32 -1.442695, %v8691_v25  ;;  %v10866_v22 = vld [vmem:[#allocation70_spill] sm:$0xff]  ;;  %v10867_v60 = vld [vmem:[#allocation108_spill] sm:$0xff] }
 0x219   : > { %10861 = vst [vmem:[#allocation50_spill] sm:$0xff] %v8727_v46  ;;  %6249 = vmatmul.mubr.msk.f32.vlgmr.msra.gmra.mxu1 %vm3932_vm7, %v8516_v7  ;;  %6595 = vrcp.f32 %v3459_v1  ;;  %v8741_v16 = vadd.f32 %v3128_v37, %v3064_v24  ;;  %v8743_v29 = vadd.f32 %v3143_v38, %v3079_v9  ;;  %5097 = vrot.lane.b32.xlu0 %v8470_v15, %s6713_s26  ;;  %v6572_v61 = vpop.eup %6571  ;;  %v3444_v50 = vadd.f32 1.0, %v6564_v51 }
 0x21a   : > { %4355 = vmatprep.mubr.f32.mxu1 %v10816_v42  ;;  %v8750_v20 = vadd.f32 %v10867_v60, %v10866_v22  ;;  %6597 = vrcp.f32 %v3460_v10  ;;  %v3476_v1 = vadd.f32 1.0, %v6570_v18  ;;  %3694 = vrot.lane.b32.xlu1 %v8470_v15, %s6712_s13  ;;  %v6574_v24 = vpop.eup %6573  ;;  %v6196_v9 = vmul.f32 -1.442695, %v8725_v47  ;;  %v3144_v10 = vld [vmem:[%s8048_s18 + $0x178] sm:$0xff]  ;;  %v2935_v18 = vpop.f32.mrf.mxu0  ;;  %v10868_v22 = vld [vmem:[#allocation71_spill] sm:$0xff] }
 0x21b   : > { %10864 = vst [vmem:[#allocation88_spill] sm:$0xff] %v8741_v16  ;;  %10865 = vst [vmem:[#allocation53_spill] sm:$0xff] %v8743_v29  ;;  %6599 = vrcp.f32 %v3475_v26  ;;  %v6211_v37 = vmul.f32 -1.442695, %v8727_v46  ;;  %v3080_v38 = vadd.f32 %v3024_v52, %v8615_v6  ;;  %v3441_v23 = vadd.f32 1.0, %v6568_v3  ;;  %v3110_v52 = vld [vmem:[%s8048_s18 + $0x68] sm:$0xff]  ;;  %v3030_v3 = vpop.f32.mrf.mxu1 }
 0x21c   : > { %v6576_v33 = vpop.eup %6575  ;;  %6601 = vrcp.f32 %v3476_v1  ;;  %v6238_v48 = vmul.f32 -1.442695, %v8734_v56  ;;  %v3046_v51 = vadd.f32 %v8617_v12, %v8611_v62  ;;  %v8763_v26 = vmul.f32 %v8572_v4, %v10868_v22  ;;  %v3159_v46 = vld [vmem:[%s8048_s18 + $0x1f0] sm:$0xff] }
 0x21d   : > { %v6578_v15 = vpop.eup %6577  ;;  %6603 = vpow2.f32 %v6237_v8  ;;  %v6212_v60 = vmul.f32 -1.442695, %v8741_v16  ;;  %v8767_v6 = vmul.f32 -1.442695, %v8743_v29  ;;  %3686 = vrot.lane.b32.xlu0 %v8592_v14, %s6712_s13  ;;  %v3442_v12 = vadd.f32 1.0, %v6574_v24 }
 0x21e   : > { %v6580_v62 = vpop.eup %6579  ;;  %6605 = vrcp.f32 %v3444_v50  ;;  %v3061_v4 = vadd.f32 %v8647_v44, %v8624_v0  ;;  %v3095_v1 = vadd.f32 %v3028_v49, %v2203_v27  ;;  %5081 = vrot.lane.b32.xlu1 %v8586_v58, %s6713_s26  ;;  %v3457_v22 = vadd.f32 1.0, %v6576_v33  ;;  %v3125_v58 = vld [vmem:[%s8048_s18 + $0xe0] sm:$0xff]  ;;  %v10869_v27 = vld [vmem:[#allocation105_spill] sm:$0xff]  ;;  %v2939_v49 = vpop.f32.mrf.mxu0 }
 0x21f   : > { %v6582_v8 = vpop.eup %6581  ;;  %6607 = vpow2.f32 %v6196_v9  ;;  %v8776_v47 = vadd.f32 %v3144_v10, %v3080_v38  ;;  %v8780_v16 = vmul.f32 %v6580_v62, %v8429_v59  ;;  %v8785_v50 = vmul.f32 %v6578_v15, %v8394_v55  ;;  %v3160_v38 = vld [vmem:[%s8048_s18 + $0x1f8] sm:$0xff]  ;;  %v10870_v55 = vld [vmem:[#allocation76_spill] sm:$0xff] }
 0x220   : > { %v8782_v29 = vpop.eup %6583  ;;  %6609 = vrcp.f32 %v3441_v23  ;;  %v8787_v0 = vadd.f32 %v3110_v52, %v3046_v51  ;;  %v3096_v44 = vadd.f32 %v3030_v3, %v10869_v27  ;;  %v3458_v9 = vadd.f32 1.0, %v6582_v8  ;;  %v10871_v51 = vld [vmem:[#allocation75_spill] sm:$0xff] }
 0x221   : > { %v8791_v24 = vpop.eup %6585  ;;  %6611 = vpow2.f32 %v6238_v48  ;;  %v3062_v59 = vadd.f32 %v8696_v53, %v8714_v11  ;;  %4102 = vmatprep.subr.mxu0 %v8780_v16  ;;  %v8798_v33 = vmul.f32 %v6572_v61, %v10870_v55  ;;  %3702 = vrot.lane.b32.xlu0 %v8466_v17, %s6712_s13  ;;  %v8806_v10 = vmul.f32 %v8688_v35, %v10871_v51  ;;  %v3126_v11 = vld [vmem:[%s8048_s18 + $0xe8] sm:$0xff]  ;;  %v3141_v52 = vld [vmem:[%s8048_s18 + $0x160] sm:$0xff] }
 0x222   : > { %v8802_v23 = vpop.eup %6587  ;;  %6613 = vrcp.f32 %v3442_v12  ;;  %v8808_v48 = vadd.f32 %v3159_v46, %v3095_v1  ;;  %v3077_v53 = vadd.f32 %v8736_v30, %v8723_v2  ;;  %4103 = vmatpush1.msra.mxu0 %v8785_v50  ;;  %5089 = vrot.lane.b32.xlu1 %v8592_v14, %s6713_s26  ;;  %v6228_v15 = vmul.f32 -1.442695, %v8776_v47  ;;  %v10872_v46 = vld [vmem:[#allocation39_spill] sm:$0xff]  ;;  %v10873_v2 = vld [vmem:[#allocation74_spill] sm:$0xff] }
 0x223   : > { %v8816_v61 = vpop.eup %6589  ;;  %6615 = vrcp.f32 %v3457_v22  ;;  %v8819_v35 = vadd.f32 %v3125_v58, %v3061_v4  ;;  %4104 = vmatprep.subr.mxu0 %v8798_v33  ;;  %v8825_v3 = vmul.f32 %v8667_v45, %v10872_v46  ;;  %v8831_v14 = vmul.f32 %v8654_v43, %v10873_v2  ;;  %v2941_v4 = vpop.f32.mrf.mxu0  ;;  %v3142_v22 = vld [vmem:[%s8048_s18 + $0x168] sm:$0xff]  ;;  %v3109_v51 = vld [vmem:[%s8048_s18 + $0x60] sm:$0xff] }
 0x224   : > { %v8827_v30 = vpop.eup %6591  ;;  %6617 = vpow2.f32 %v6211_v37  ;;  %v8833_v62 = vadd.f32 %v3160_v38, %v3096_v44  ;;  %v3078_v12 = vadd.f32 %v2935_v18, %v8732_v32  ;;  %4105 = vmatpush1.msra.mxu0 %v8806_v10  ;;  %v6194_v45 = vmul.f32 -1.442695, %v8787_v0  ;;  %v10874_v43 = vld [vmem:[#allocation36_spill] sm:$0xff] }
 0x225   : > { %v8837_v1 = vpop.eup %6593  ;;  %6619 = vrcp.f32 %v3458_v9  ;;  %v8840_v8 = vadd.f32 %v3126_v11, %v3062_v59  ;;  %4106 = vmatprep.subr.mxu0 %v8825_v3  ;;  %v8846_v37 = vmul.f32 %v8637_v40, %v10874_v43  ;;  %3680 = vrot.lane.b32.xlu0 %v8552_v21, %s6712_s13  ;;  %v6243_v18 = vmul.f32 -1.442695, %v8808_v48  ;;  %v3157_v9 = vld [vmem:[%s8048_s18 + $0x1e0] sm:$0xff] }
 0x226   : > { %v6596_v32 = vpop.eup %6595  ;;  %6621 = vpow2.f32 %v6212_v60  ;;  %v8851_v58 = vadd.f32 %v3141_v52, %v3077_v53  ;;  %v3093_v27 = vadd.f32 %v2939_v49, %v8750_v20  ;;  %4107 = vmatpush1.msra.mxu0 %v8831_v14  ;;  %5105 = vrot.lane.b32.xlu1 %v8466_v17, %s6713_s26  ;;  %v6209_v44 = vmul.f32 -1.442695, %v8819_v35  ;;  %v10875_v60 = vld [vmem:[#allocation109_spill] sm:$0xff]  ;;  %v3158_v17 = vld [vmem:[%s8048_s18 + $0x1e8] sm:$0xff] }
 0x227   : > { %v6598_v40 = vpop.eup %6597  ;;  %6623 = vpow2.f32 %v8767_v6  ;;  %v3094_v59 = vadd.f32 %v2941_v4, %v10875_v60  ;;  %4108 = vmatprep.subr.mxu0 %v8846_v37  ;;  %v3045_v20 = vadd.f32 %v8579_v39, %v8565_v34  ;;  %v6244_v49 = vmul.f32 -1.442695, %v8833_v62 }
 0x228   : > { %v6600_v38 = vpop.eup %6599  ;;  %6625 = vpow2.f32 %v6228_v15  ;;  %v8865_v55 = vadd.f32 %v3142_v22, %v3078_v12  ;;  %4109 = vmatpush1.msra.mxu0 %v8763_v26  ;;  %v6210_v11 = vmul.f32 -1.442695, %v8840_v8  ;;  %v6225_v39 = vmul.f32 -1.442695, %v8851_v58 }
 0x229   : > { %v6602_v6 = vpop.eup %6601  ;;  %6627 = vpow2.f32 %v6194_v45  ;;  %3696 = vrot.lane.b32.xlu0 %v8445_v28, %s6712_s13  ;;  %6248 = vmatmul.mubr.msk.f32.vlgmr.msra.gmra.mxu0 %vm3932_vm7, %v8516_v7  ;;  %v8876_v53 = vadd.f32 %v3157_v9, %v3093_v27  ;;  %v8885_v46 = vmul.f32 %v6600_v38, %v8497_v36  ;;  %v8887_v12 = vadd.f32 %v3158_v17, %v3094_v59  ;;  %v10877_v9 = vld [vmem:[#allocation77_spill] sm:$0xff] }
 0x22a   : > { %v6604_v34 = vpop.eup %6603  ;;  %6629 = vpow2.f32 %v6243_v18  ;;  %v8879_v15 = vmul.f32 %v6602_v6, %v8531_v5  ;;  %5099 = vrot.lane.b32.xlu1 %v8445_v28, %s6713_s26  ;;  %4284 = vmatprep.mubr.f32.mxu0 %v10816_v42  ;;  %v8891_v45 = vadd.f32 %v3109_v51, %v3045_v20  ;;  %v6226_v5 = vmul.f32 -1.442695, %v8865_v55 }
 0x22b   : > { %v6606_v52 = vpop.eup %6605  ;;  %v3473_v2 = vadd.f32 1.0, %v6604_v34  ;;  %6631 = vpow2.f32 %v6209_v44  ;;  %v8896_v28 = vmul.f32 %v6598_v40, %v8488_v63  ;;  %v8901_v36 = vmul.f32 %v6596_v32, %v8473_v41  ;;  %v10876_v32 = vld [vmem:[#allocation45_spill] sm:$0xff] }
 0x22c   : > { %v8889_v4 = vpop.eup %6607  ;;  %6633 = vpow2.f32 %v6244_v49  ;;  %4315 = vmatprep.subr.mxu1 %v8879_v15  ;;  %v6241_v18 = vmul.f32 -1.442695, %v8876_v53  ;;  %v8909_v63 = vmul.f32 %v6606_v52, %v8495_v13  ;;  %v8917_v27 = vmul.f32 %v8827_v30, %v10876_v32  ;;  %v10878_v30 = vld [vmem:[#allocation38_spill] sm:$0xff] }
 0x22d   : > { %v8898_v22 = vpop.eup %6609  ;;  %6635 = vpow2.f32 %v6210_v11  ;;  %4316 = vmatpush1.msra.mxu1 %v8885_v46  ;;  %5083 = vrot.lane.b32.xlu0 %v8552_v21, %s6713_s26  ;;  %v6242_v21 = vmul.f32 -1.442695, %v8887_v12  ;;  %v6193_v13 = vmul.f32 -1.442695, %v8891_v45  ;;  %v8927_v60 = vmul.f32 %v8791_v24, %v10877_v9  ;;  %v10879_v24 = vld [vmem:[#allocation80_spill] sm:$0xff] }
 0x22e   : > { %v6612_v43 = vpop.eup %6611  ;;  %6637 = vrcp.f32 %v3473_v2  ;;  %4317 = vmatprep.subr.mxu1 %v8896_v28  ;;  %3688 = vrot.lane.b32.xlu1 %v8545_v57, %s6712_s13  ;;  %v8931_v38 = vmul.f32 %v8782_v29, %v10878_v30  ;;  %v3426_v20 = vadd.f32 1.0, %v8816_v61  ;;  %v3425_v17 = vadd.f32 1.0, %v8802_v23 }
 0x22f   : > { %v8913_v41 = vpop.eup %6613  ;;  %v3474_v40 = vadd.f32 1.0, %v6612_v43  ;;  %6639 = vpow2.f32 %v6225_v39  ;;  %4318 = vmatpush1.msra.mxu1 %v8901_v36 }
 0x230   : > { %v8921_v44 = vpop.eup %6615  ;;  %6641 = vpow2.f32 %v6226_v5  ;;  %4319 = vmatprep.subr.mxu1 %v8909_v63 }
 0x231   : > { %v6618_v59 = vpop.eup %6617  ;;  %6643 = vrcp.f32 %v3474_v40  ;;  %4320 = vmatpush1.msra.mxu1 %v8917_v27  ;;  %5091 = vrot.lane.b32.xlu0 %v8545_v57, %s6713_s26  ;;  %v3431_v57 = vadd.f32 1.0, %v8837_v1 }
 0x232   : > { %v6620_v49 = vpop.eup %6619  ;;  %6645 = vpow2.f32 %v6241_v18  ;;  %4321 = vmatprep.subr.mxu1 %v8927_v60  ;;  %3704 = vrot.lane.b32.xlu1 %v10879_v24, %s6712_s13  ;;  %v3447_v32 = vadd.f32 1.0, %v6618_v59 }
 0x233   : > { %v6622_v6 = vpop.eup %6621  ;;  %6647 = vpow2.f32 %v6242_v21  ;;  %4322 = vmatpush1.msra.mxu1 %v8931_v38  ;;  %v3432_v21 = vadd.f32 1.0, %v8889_v4 }
 0x234   : > { %v6624_v29 = vpop.eup %6623  ;;  %6649 = vpow2.f32 %v6193_v13  ;;  %6251 = vmatmul.mubr.msk.f32.vlgmr.msra.gmra.mxu1 %vm3932_vm7, %v8516_v7  ;;  %v3448_v5 = vadd.f32 1.0, %v6622_v6 }
 0x235   : > { %v6626_v61 = vpop.eup %6625  ;;  %6651 = vrcp.f32 %v3426_v20  ;;  %5107 = vrot.lane.b32.xlu0 %v10879_v24, %s6713_s26  ;;  %4497 = vmatprep.mubr.f32.mxu1 %v10816_v42  ;;  %v3463_v2 = vadd.f32 1.0, %v6624_v29 }
 0x236   : > { %v6628_v23 = vpop.eup %6627  ;;  %6653 = vrcp.f32 %v3425_v17  ;;  %v3464_v51 = vadd.f32 1.0, %v6626_v61  ;;  %3714 = vrot.lane.b32.xlu1 %v8846_v37, %s6712_s13 }
 0x237   : > { %v6630_v11 = vpop.eup %6629  ;;  %6655 = vrcp.f32 %v3431_v57 }
 0x238   : > { %v6632_v34 = vpop.eup %6631  ;;  %v3479_v39 = vadd.f32 1.0, %v6630_v11  ;;  %6657 = vrcp.f32 %v3464_v51  ;;  %v8967_v51 = vmul.f32 %v6620_v49, %v8598_v19  ;;  %v10880_v11 = vld [vmem:[#allocation82_spill] sm:$0xff]  ;;  %v10882_v19 = vld [vmem:[#allocation44_spill] sm:$0xff]  ;;  %v10883_v49 = vld [vmem:[#allocation81_spill] sm:$0xff] }
 0x239   : > { %v6634_v52 = vpop.eup %6633  ;;  %3706 = vrot.lane.b32.xlu0 %v8763_v26, %s6712_s13 }
 0x23a   : > { %v6636_v1 = vpop.eup %6635  ;;  %v3480_v43 = vadd.f32 1.0, %v6634_v52  ;;  %3730 = vrot.lane.b32.xlu1 %v8701_v54, %s6712_s13  ;;  %6659 = vrcp.f32 %v3479_v39  ;;  %v8973_v39 = vmul.f32 %v8921_v44, %v10880_v11  ;;  %v10881_v52 = vld [vmem:[#allocation51_spill] sm:$0xff]  ;;  %v8985_v44 = vmul.f32 %v8898_v22, %v10883_v49 }
 0x23b   : > { %v6638_v18 = vpop.eup %6637  ;;  %v3446_v61 = vadd.f32 1.0, %v6636_v1  ;;  %v3430_v1 = vadd.f32 1.0, %v6628_v23 }
 0x23c   : > { %v6640_v40 = vpop.eup %6639  ;;  %6661 = vrcp.f32 %v3480_v43  ;;  %v8963_v4 = vmul.f32 %v6638_v18, %v8691_v25  ;;  %v3445_v25 = vadd.f32 1.0, %v6632_v34 }
 0x23d   : > { %v6642_v13 = vpop.eup %6641  ;;  %6663 = vrcp.f32 %v3463_v2  ;;  %3722 = vrot.lane.b32.xlu0 %v8658_v31, %s6712_s13  ;;  %v3461_v24 = vadd.f32 1.0, %v6640_v40 }
 0x23e   : > { %v6644_v9 = vpop.eup %6643  ;;  %6665 = vrcp.f32 %v3448_v5  ;;  %v3462_v30 = vadd.f32 1.0, %v6642_v13  ;;  %5111 = vrot.lane.b32.xlu1 %v8831_v14, %s6713_s26  ;;  %v10884_v5 = vld [vmem:[#allocation83_spill] sm:$0xff]  ;;  %v10886_v13 = vld [vmem:[#allocation86_spill] sm:$0xff] }
 0x23f   : > { %v6646_v20 = vpop.eup %6645  ;;  %6667 = vrcp.f32 %v3447_v32  ;;  %v8960_v59 = vmul.f32 %v6644_v9, %v8734_v56 }
 0x240   : > { %v6648_v17 = vpop.eup %6647  ;;  %6669 = vrcp.f32 %v3432_v21  ;;  %v3477_v6 = vadd.f32 1.0, %v6646_v20 }
 0x241   : > { %v6650_v29 = vpop.eup %6649  ;;  %6671 = vrcp.f32 %v3462_v30  ;;  %v3478_v57 = vadd.f32 1.0, %v6648_v17  ;;  %4244 = vmatprep.subr.mxu0 %v8960_v59  ;;  %5109 = vrot.lane.b32.xlu0 %v8763_v26, %s6713_s26  ;;  %v8981_v26 = vmul.f32 %v8913_v41, %v10882_v19  ;;  %v10885_v41 = vld [vmem:[#allocation47_spill] sm:$0xff] }
 0x242   : > { %v6652_v56 = vpop.eup %6651  ;;  %6673 = vrcp.f32 %v3477_v6  ;;  %4245 = vmatpush1.msra.mxu0 %v8963_v4  ;;  %5127 = vrot.lane.b32.xlu1 %v10881_v52, %s6713_s26  ;;  %v3429_v34 = vadd.f32 1.0, %v6650_v29  ;;  %v10887_v6 = vld [vmem:[#allocation53_spill] sm:$0xff] }
 0x243   : > { %v6654_v2 = vpop.eup %6653  ;;  %6675 = vrcp.f32 %v3478_v57  ;;  %4246 = vmatprep.subr.mxu0 %v8967_v51  ;;  %v8990_v23 = vmul.f32 %v6652_v56, %v10884_v5  ;;  %v10889_v57 = vld [vmem:[#allocation48_spill] sm:$0xff]  ;;  %v10890_v56 = vld [vmem:[#allocation50_spill] sm:$0xff] }
 0x244   : > { %6677 = vrcp.f32 %v3461_v24  ;;  %4247 = vmatpush1.msra.mxu0 %v8973_v39  ;;  %v6656_v43 = vpop.eup %6655  ;;  %v8995_v18 = vmul.f32 %v6654_v2, %v10885_v41 }
 0x245   : > { %6679 = vrcp.f32 %v3446_v61  ;;  %4248 = vmatprep.subr.mxu0 %v8981_v26  ;;  %3708 = vrot.lane.b32.xlu0 %v8831_v14, %s6712_s13  ;;  %v6658_v22 = vpop.eup %6657 }
 0x246   : > { %6681 = vrcp.f32 %v3445_v25  ;;  %4249 = vmatpush1.msra.mxu0 %v8985_v44  ;;  %3716 = vrot.lane.b32.xlu1 %v8825_v3, %s6712_s13  ;;  %v9017_v17 = vmul.f32 %v6658_v22, %v8776_v47 }
 0x247   : > { %6683 = vrcp.f32 %v3430_v1  ;;  %4250 = vmatprep.subr.mxu0 %v8990_v23  ;;  %v6660_v32 = vpop.eup %6659  ;;  %v10892_v1 = vld [vmem:[#allocation46_spill] sm:$0xff] }
 0x248   : > { %6685 = vrcp.f32 %v3429_v34  ;;  %4251 = vmatpush1.msra.mxu0 %v8995_v18  ;;  %v9013_v30 = vmul.f32 %v6660_v32, %v8808_v48  ;;  %v10888_v48 = vld [vmem:[#allocation88_spill] sm:$0xff]  ;;  %v9040_v19 = vmul.f32 %v6656_v43, %v10892_v1 }
 0x249   : > { %v6662_v40 = vpop.eup %6661  ;;  %6250 = vmatmul.mubr.msk.f32.vlgmr.msra.gmra.mxu0 %vm3932_vm7, %v8516_v7  ;;  %3724 = vrot.lane.b32.xlu0 %v10881_v52, %s6712_s13  ;;  %v10891_v52 = vld [vmem:[#allocation87_spill] sm:$0xff] }
 0x24a   : > { %v6664_v14 = vpop.eup %6663  ;;  %v9007_v21 = vmul.f32 %v6662_v40, %v8833_v62  ;;  %3732 = vrot.lane.b32.xlu1 %v10886_v13, %s6712_s13  ;;  %4426 = vmatprep.mubr.f32.mxu0 %v10816_v42 }
 0x24b   : > { %v6666_v9 = vpop.eup %6665  ;;  %v9020_v29 = vmul.f32 %v6664_v14, %v10887_v6 }
 0x24c   : > { %v6668_v20 = vpop.eup %6667  ;;  %4457 = vmatprep.subr.mxu1 %v9007_v21  ;;  %v9027_v61 = vmul.f32 %v6666_v9, %v10888_v48 }
 0x24d   : > { %v6670_v24 = vpop.eup %6669  ;;  %4458 = vmatpush1.msra.mxu1 %v9013_v30  ;;  %5119 = vrot.lane.b32.xlu0 %v8825_v3, %s6713_s26  ;;  %v9032_v11 = vmul.f32 %v6668_v20, %v10890_v56 }
 0x24e   : > { %v6672_v62 = vpop.eup %6671  ;;  %4459 = vmatprep.subr.mxu1 %v9017_v17  ;;  %5129 = vrot.lane.b32.xlu1 %v10889_v57, %s6713_s26  ;;  %v9037_v3 = vmul.f32 %v6670_v24, %v10891_v52 }
 0x24f   : > { %v6674_v47 = vpop.eup %6673  ;;  %4460 = vmatpush1.msra.mxu1 %v9020_v29 }
 0x250   : > { %v6676_v25 = vpop.eup %6675  ;;  %4461 = vmatprep.subr.mxu1 %v9027_v61  ;;  %v9049_v5 = vmul.f32 %v6674_v47, %v8876_v53 }
 0x251   : > { %v6678_v2 = vpop.eup %6677  ;;  %4462 = vmatpush1.msra.mxu1 %v9032_v11  ;;  %v9044_v49 = vmul.f32 %v6676_v25, %v8887_v12  ;;  %5135 = vrot.lane.b32.xlu0 %v10886_v13, %s6713_s26  ;;  %v9057_v12 = vmul.f32 %v6672_v62, %v8865_v55 }
 0x252   : > { %v6680_v34 = vpop.eup %6679  ;;  %4463 = vmatprep.subr.mxu1 %v9037_v3  ;;  %3718 = vrot.lane.b32.xlu1 %v8798_v33, %s6712_s13  ;;  %v9060_v22 = vmul.f32 %v6678_v2, %v8851_v58  ;;  %v10893_v58 = vld [vmem:[#allocation85_spill] sm:$0xff] }
 0x253   : > { %v6682_v41 = vpop.eup %6681  ;;  %4464 = vmatpush1.msra.mxu1 %v9040_v19  ;;  %4386 = vmatprep.subr.mxu0 %v9044_v49  ;;  %v9067_v32 = vmul.f32 %v6680_v34, %v8840_v8 }
 0x254   : > { %v6684_v43 = vpop.eup %6683  ;;  %4387 = vmatpush1.msra.mxu0 %v9049_v5  ;;  %6253 = vmatmul.mubr.msk.f32.vlgmr.msra.gmra.mxu1 %vm3932_vm7, %v8516_v7  ;;  %v9072_v55 = vmul.f32 %v6682_v41, %v8819_v35 }
 0x255   : > { %v6686_v53 = vpop.eup %6685  ;;  %4388 = vmatprep.subr.mxu0 %v9057_v12  ;;  %3710 = vrot.lane.b32.xlu0 %v8806_v10, %s6712_s13  ;;  %v9079_v40 = vmul.f32 %v6684_v43, %v8787_v0  ;;  %v10894_v0 = vld [vmem:[#allocation49_spill] sm:$0xff] }
 0x256   : > { %4389 = vmatpush1.msra.mxu0 %v9060_v22  ;;  %3734 = vrot.lane.b32.xlu1 %v10893_v58, %s6712_s13  ;;  %v9083_v8 = vmul.f32 %v6686_v53, %v8891_v45  ;;  %v10896_v45 = vld [vmem:[#allocation84_spill] sm:$0xff] }
 0x257   : > { %4390 = vmatprep.subr.mxu0 %v9067_v32  ;;  %4642 = vmatprep.mubr.f32.mxu1 %v10816_v42 }
 0x258   : > { %4391 = vmatpush1.msra.mxu0 %v9072_v55 }
 0x259   : > { %4392 = vmatprep.subr.mxu0 %v9079_v40  ;;  %3726 = vrot.lane.b32.xlu0 %v10889_v57, %s6712_s13 }
 0x25a   : > { %4393 = vmatpush1.msra.mxu0 %v9083_v8  ;;  %5115 = vrot.lane.b32.xlu1 %v8785_v50, %s6713_s26 }
 0x25b   : > { %6252 = vmatmul.mubr.msk.f32.vlgmr.msra.gmra.mxu0 %vm3932_vm7, %v8516_v7  ;;  %v9107_v7 = vpop.permute.xlu0 %5093 }
 0x25c   : > { %4571 = vmatprep.mubr.f32.mxu0 %v10816_v42  ;;  %10895 = vst [vmem:[#allocation89_spill] sm:$0xff] %v9107_v7 }
 0x25d   : > { %5113 = vrot.lane.b32.xlu0 %v8806_v10, %s6713_s26 }
 0x25e   : > { %5131 = vrot.lane.b32.xlu1 %v10894_v0, %s6713_s26 }
 0x261   : > { %5121 = vrot.lane.b32.xlu0 %v8798_v33, %s6713_s26 }
 0x262   : > { %3720 = vrot.lane.b32.xlu1 %v8780_v16, %s6712_s13 }
 0x263   : > { %v9103_v35 = vpop.permute.xlu1 %3674 }
 0x264   : > { %v9115_v14 = vpop.permute.xlu0 %3682 }
 0x265   : > { %5137 = vrot.lane.b32.xlu0 %v10893_v58, %s6713_s26 }
 0x266   : > { %3736 = vrot.lane.b32.xlu1 %v10896_v45, %s6712_s13 }
 0x267   : > { %v9111_v10 = vpop.permute.xlu1 %3690 }
 0x269   : > { %3712 = vrot.lane.b32.xlu0 %v8785_v50, %s6712_s13 }
 0x26a   : > { %3746 = vrot.lane.b32.xlu1 %v8990_v23, %s6712_s13 }
 0x26b   : > { %v9119_v33 = vpop.permute.xlu1 %5077 }
 0x26c   : > { %10897 = vst [vmem:[#allocation52_spill] sm:$0xff] %v9119_v33 }
 0x26d   : > { %3728 = vrot.lane.b32.xlu0 %v10894_v0, %s6712_s13  ;;  %v9125_v13 = vpop.permute.xlu0 %3698  ;;  %v10907_v0 = vld [vmem:[#allocation3_spill] sm:$0xff] }
 0x26e   : > { %3762 = vrot.lane.b32.xlu1 %v8927_v60, %s6712_s13  ;;  %vm10908_vm1 = vcmp.lt.s32.totalorder %v10907_v0, 1 }
 0x26f   : > { %v9127_v9 = vpop.permute.xlu1 %5085  ;;  %vm10910_vm0 = vmmov %vm10908_vm1 }
 0x270   : > { %10898 = vst [vmem:[#allocation90_spill] sm:$0xff] %v9127_v9  ;;  %vm10911_vm15 = vmmov %vm10910_vm0 }
 0x271   : > { %5123 = vrot.lane.b32.xlu0 %v8780_v16, %s6713_s26 }
 0x272   : > { %5143 = vrot.lane.b32.xlu1 %v8985_v44, %s6713_s26 }
 0x273   : > { %v9133_v50 = vpop.permute.xlu1 %5101 }
 0x274   : > { %10899 = vst [vmem:[#allocation55_spill] sm:$0xff] %v9133_v50 }
 0x275   : > { %5139 = vrot.lane.b32.xlu0 %v10896_v45, %s6713_s26  ;;  %v9137_v20 = vpop.permute.xlu0 %3676 }
 0x276   : > { %3748 = vrot.lane.b32.xlu1 %v8981_v26, %s6712_s13 }
 0x277   : > { %v9143_v24 = vpop.permute.xlu1 %5095 }
 0x278   : > { %10900 = vst [vmem:[#allocation91_spill] sm:$0xff] %v9143_v24 }
 0x279   : > { %3738 = vrot.lane.b32.xlu0 %v8995_v18, %s6712_s13 }
 0x27a   : > { %v3693_v6 = vpop.permute.xlu0 %3692  ;;  %3764 = vrot.lane.b32.xlu1 %v8909_v63, %s6712_s13 }
 0x27d   : > { %3754 = vrot.lane.b32.xlu0 %v8931_v38, %s6712_s13 }
 0x27e   : > { %v9149_v16 = vpop.permute.xlu0 %5079  ;;  %5145 = vrot.lane.b32.xlu1 %v8973_v39, %s6713_s26 }
 0x27f   : > { %10901 = vst [vmem:[#allocation54_spill] sm:$0xff] %v9149_v16  ;;  %v9153_v62 = vpop.permute.xlu1 %3684 }
 0x281   : > { %3740 = vrot.lane.b32.xlu0 %v8985_v44, %s6712_s13 }
 0x282   : > { %3750 = vrot.lane.b32.xlu1 %v8967_v51, %s6712_s13 }
 0x283   : > { %v9159_v48 = vpop.permute.xlu0 %5087 }
 0x284   : > { %10902 = vst [vmem:[#allocation92_spill] sm:$0xff] %v9159_v48  ;;  %v9161_v57 = vpop.permute.xlu1 %3700 }
 0x285   : > { %3756 = vrot.lane.b32.xlu0 %v8917_v27, %s6712_s13 }
 0x286   : > { %3766 = vrot.lane.b32.xlu1 %v8896_v28, %s6712_s13 }
 0x287   : > { %v9167_v47 = vpop.permute.xlu0 %5103 }
 0x288   : > { %10903 = vst [vmem:[#allocation57_spill] sm:$0xff] %v9167_v47  ;;  %v9169_v56 = vpop.permute.xlu1 %3678 }
 0x289   : > { %3742 = vrot.lane.b32.xlu0 %v8973_v39, %s6712_s13 }
 0x28a   : > { %5147 = vrot.lane.b32.xlu1 %v8963_v4, %s6713_s26 }
 0x28b   : > { %v9175_v44 = vpop.permute.xlu0 %5097 }
 0x28c   : > { %10904 = vst [vmem:[#allocation93_spill] sm:$0xff] %v9175_v44  ;;  %v3695_v25 = vpop.permute.xlu1 %3694 }
 0x28d   : > { %3758 = vrot.lane.b32.xlu0 %v8901_v36, %s6712_s13 }
 0x28e   : > { %3752 = vrot.lane.b32.xlu1 %v8960_v59, %s6712_s13 }
 0x28f   : > { %v9181_v52 = vpop.permute.xlu0 %3686 }
 0x290   : > { %v9183_v2 = vpop.permute.xlu1 %5081 }
 0x291   : > { %10905 = vst [vmem:[#allocation56_spill] sm:$0xff] %v9183_v2  ;;  %3744 = vrot.lane.b32.xlu0 %v8963_v4, %s6712_s13  ;;  %v3856_v2 = vsel %vm10910_vm0, %v9181_v52, %v3695_v25 }
 0x292   : > { %3768 = vrot.lane.b32.xlu1 %v8879_v15, %s6712_s13 }
 0x293   : > { %v9189_v39 = vpop.permute.xlu0 %3702 }
 0x294   : > { %v9191_v1 = vpop.permute.xlu1 %5089 }
 0x295   : > { %10906 = vst [vmem:[#allocation94_spill] sm:$0xff] %v9191_v1  ;;  %3760 = vrot.lane.b32.xlu0 %v8885_v46, %s6712_s13 }
 0x296   : > { %3770 = vrot.lane.b32.xlu1 %v9083_v8, %s6712_s13 }
 0x297   : > { %v9197_v34 = vpop.permute.xlu0 %3680 }
 0x298   : > { %v9199_v41 = vpop.permute.xlu1 %5105 }
 0x299   : > { %3778 = vrot.lane.b32.xlu0 %v9079_v40, %s6712_s13 }
 0x29a   : > { %3786 = vrot.lane.b32.xlu1 %v9040_v19, %s6712_s13 }
 0x29b   : > { %v3697_v4 = vpop.permute.xlu0 %3696 }
 0x29c   : > { %v9205_v43 = vpop.permute.xlu1 %5099 }
 0x29d   : > { %3772 = vrot.lane.b32.xlu0 %v9072_v55, %s6712_s13 }
 0x29e   : > { %3794 = vrot.lane.b32.xlu1 %v9037_v3, %s6712_s13 }
 0x29f   : > { %v9211_v53 = vpop.permute.xlu0 %5083 }
 0x2a0   : > { %v3689_v58 = vpop.permute.xlu1 %3688 }
 0x2a1   : > { %3788 = vrot.lane.b32.xlu0 %v9032_v11, %s6712_s13  ;;  %v3861_v45 = vsel %vm10908_vm1, %v9197_v34, %v3689_v58  ;;  %v3857_v16 = vsel %vm10911_vm15, %v3689_v58, %v3697_v4  ;;  %vm10914_vm1 = vmmov %vm10910_vm0 }
 0x2a2   : > { %3780 = vrot.lane.b32.xlu1 %v9067_v32, %s6712_s13  ;;  %6254 = vmatprep.subr.msk.mxu0 %vm7240_vm6, %v3861_v45  ;;  %v3852_v47 = vsel %vm10914_vm1, %v3695_v25, %v9189_v39  ;;  %vm10915_vm15 = vmmov %vm10910_vm0  ;;  %v3850_v25 = vsel %vm10910_vm0, %v9111_v10, %v9125_v13 }
 0x2a3   : > { %v9222_v9 = vpop.permute.xlu0 %5091  ;;  %vm10916_vm1 = vmmov %vm10910_vm0 }
 0x2a4   : > { %v9224_v7 = vpop.permute.xlu1 %3704 }
 0x2a5   : > { %3796 = vrot.lane.b32.xlu0 %v9027_v61, %s6712_s13  ;;  %v3853_v50 = vsel %vm10910_vm0, %v3697_v4, %v9224_v7 }
 0x2a6   : > { %3774 = vrot.lane.b32.xlu1 %v9060_v22, %s6712_s13  ;;  %6263 = vmatprep.subr.msk.mxu1 %vm7175_vm2, %v3853_v50  ;;  %v3851_v50 = vsel %vm10915_vm15, %v3693_v6, %v9161_v57  ;;  %vm10917_vm15 = vmmov %vm10910_vm0 }
 0x2a7   : > { %v9237_v45 = vpop.permute.xlu0 %5107  ;;  %6264 = vmatpush1.msk.msra.mxu1 %vm7185_vm3, %v3857_v16  ;;  %v3855_v16 = vsel %vm10916_vm1, %v9153_v62, %v3693_v6  ;;  %v9276_v6 = vld [vmem:[%s10343_s3] sm:$0xff]  ;;  %vm10918_vm1 = vmmov %vm10910_vm0 }
 0x2a8   : > { %6265 = vmatprep.subr.msk.mxu1 %vm7175_vm2, %v3852_v47  ;;  %v9249_v4 = vpop.permute.xlu1 %3714 }
 0x2a9   : > { %3782 = vrot.lane.b32.xlu0 %v9057_v12, %s6712_s13  ;;  %6266 = vmatpush1.msk.msra.mxu1 %vm7185_vm3, %v3856_v2  ;;  %v3854_v2 = vsel %vm10917_vm15, %v9115_v14, %v9111_v10 }
 0x2aa   : > { %3790 = vrot.lane.b32.xlu1 %v9020_v29, %s6712_s13  ;;  %6267 = vmatprep.subr.msk.mxu1 %vm7175_vm2, %v3851_v50 }
 0x2ab   : > { %v9265_v47 = vpop.permute.xlu0 %3706  ;;  %6268 = vmatpush1.msk.msra.mxu1 %vm7185_vm3, %v3855_v16 }
 0x2ac   : > { %v9286_v58 = vsel %vm10918_vm1, %v9265_v47, %v9249_v4  ;;  %6269 = vmatprep.subr.msk.mxu1 %vm7175_vm2, %v3850_v25  ;;  %v9290_v50 = vpop.permute.xlu1 %3730  ;;  %vm10921_vm2 = vmmov %vm10910_vm0 }
 0x2ad   : > { %3776 = vrot.lane.b32.xlu0 %v9049_v5, %s6712_s13  ;;  %6270 = vmatpush1.msk.msra.mxu1 %vm7185_vm3, %v3854_v2  ;;  %vm10922_vm3 = vcmp.lt.s32.totalorder %v10907_v0, 127 }
 0x2ae   : > { %3798 = vrot.lane.b32.xlu1 %v9017_v17, %s6712_s13  ;;  %6271 = vmatmul.mubr.msk.f32.vlgmr.msra.gmra.mxu1 %vm3932_vm7, %v9276_v6  ;;  %vm10924_vm0 = vmmov %vm10922_vm3 }
 0x2af   : > { %v9300_v10 = vpop.permute.xlu0 %3722  ;;  %4784 = vmatprep.mubr.f32.mxu1 %v10816_v42  ;;  %vm10927_vm15 = vmmov %vm10924_vm0 }
 0x2b0   : > { %v9303_v48 = vpop.permute.xlu1 %5111 }
 0x2b1   : > { %10919 = vst [vmem:[#allocation59_spill] sm:$0xff] %v9303_v48  ;;  %3792 = vrot.lane.b32.xlu0 %v9013_v30, %s6712_s13 }
 0x2b2   : > { %5125 = vrot.lane.b32.xlu1 %v8658_v31, %s6713_s26 }
 0x2b3   : > { %v9309_v24 = vpop.permute.xlu0 %5109 }
 0x2b4   : > { %10920 = vst [vmem:[#allocation95_spill] sm:$0xff] %v9309_v24  ;;  %v5128_v16 = vpop.permute.xlu1 %5127 }
 0x2b5   : > { %3800 = vrot.lane.b32.xlu0 %v9007_v21, %s6712_s13 }
 0x2b6   : > { %5141 = vrot.lane.b32.xlu1 %v8995_v18, %s6713_s26 }
 0x2b7   : > { %v9315_v25 = vpop.permute.xlu0 %3708 }
 0x2b8   : > { %v9317_v2 = vpop.permute.xlu1 %3716 }
 0x2b9   : > { %5117 = vrot.lane.b32.xlu0 %v8846_v37, %s6713_s26  ;;  %v9325_v31 = vsel %vm10921_vm2, %v9315_v25, %v9317_v2  ;;  %vm10929_vm2 = vmmov %vm10924_vm0 }
 0x2ba   : > { %5163 = vrot.lane.b32.xlu1 %v8885_v46, %s6713_s26 }
 0x2bb   : > { %v9329_v24 = vpop.permute.xlu0 %3724 }
 0x2bc   : > { %v9331_v1 = vpop.permute.xlu1 %3732 }
 0x2bd   : > { %5133 = vrot.lane.b32.xlu0 %v8701_v54, %s6713_s26 }
 0x2be   : > { %5179 = vrot.lane.b32.xlu1 %v9049_v5, %s6713_s26 }
 0x2bf   : > { %v5120_v37 = vpop.permute.xlu0 %5119 }
 0x2c0   : > { %v9339_v18 = vsel %vm10922_vm3, %v5120_v37, %v5128_v16  ;;  %v9344_v44 = vsel %vm10924_vm0, %v9303_v48, %v5120_v37  ;;  %v5130_v46 = vpop.permute.xlu1 %5129  ;;  %vm10931_vm3 = vmmov %vm10924_vm0 }
 0x2c1   : > { %10923 = vst [vmem:[#allocation58_spill] sm:$0xff] %v9339_v18  ;;  %10925 = vst [vmem:[#allocation96_spill] sm:$0xff] %v9344_v44  ;;  %5155 = vrot.lane.b32.xlu0 %v8960_v59, %s6713_s26 }
 0x2c2   : > { %5161 = vrot.lane.b32.xlu1 %v8901_v36, %s6713_s26 }
 0x2c3   : > { %v9350_v54 = vpop.permute.xlu0 %5135 }
 0x2c4   : > { %10926 = vst [vmem:[#allocation61_spill] sm:$0xff] %v9350_v54  ;;  %v9355_v5 = vsel %vm10927_vm15, %v5128_v16, %v9350_v54  ;;  %v3719_v18 = vpop.permute.xlu1 %3718  ;;  %vm10935_vm15 = vmmov %vm10918_vm1 }
 0x2c5   : > { %10928 = vst [vmem:[#allocation97_spill] sm:$0xff] %v9355_v5  ;;  %5171 = vrot.lane.b32.xlu0 %v8879_v15, %s6713_s26 }
 0x2c6   : > { %5177 = vrot.lane.b32.xlu1 %v9060_v22, %s6713_s26 }
 0x2c7   : > { %v9361_v37 = vpop.permute.xlu0 %3710 }
 0x2c8   : > { %v9366_v36 = vsel %vm10918_vm1, %v9361_v37, %v3719_v18  ;;  %v9368_v59 = vpop.permute.xlu1 %3734 }
 0x2c9   : > { %5153 = vrot.lane.b32.xlu0 %v8967_v51, %s6713_s26 }
 0x2ca   : > { %3784 = vrot.lane.b32.xlu1 %v9044_v49, %s6712_s13 }
 0x2cb   : > { %v3727_v16 = vpop.permute.xlu0 %3726 }
 0x2cc   : > { %v9374_v15 = vpop.permute.xlu1 %5115 }
 0x2cd   : > { %5169 = vrot.lane.b32.xlu0 %v8896_v28, %s6713_s26 }
 0x2ce   : > { %5159 = vrot.lane.b32.xlu1 %v8917_v27, %s6713_s26 }
 0x2cf   : > { %v9380_v22 = vpop.permute.xlu0 %5113 }
 0x2d0   : > { %v5132_v44 = vpop.permute.xlu1 %5131 }
 0x2d1   : > { %5151 = vrot.lane.b32.xlu0 %v8981_v26, %s6713_s26 }
 0x2d2   : > { %5175 = vrot.lane.b32.xlu1 %v9072_v55, %s6713_s26 }
 0x2d3   : > { %v5122_v51 = vpop.permute.xlu0 %5121 }
 0x2d4   : > { %v9388_v5 = vsel %vm10929_vm2, %v5122_v51, %v5130_v46  ;;  %v9393_v28 = vsel %vm10931_vm3, %v9380_v22, %v5122_v51  ;;  %v3721_v27 = vpop.permute.xlu1 %3720  ;;  %vm10936_vm2 = vmmov %vm10918_vm1 }
 0x2d5   : > { %10930 = vst [vmem:[#allocation60_spill] sm:$0xff] %v9388_v5  ;;  %10932 = vst [vmem:[#allocation98_spill] sm:$0xff] %v9393_v28  ;;  %5167 = vrot.lane.b32.xlu0 %v8909_v63, %s6713_s26 }
 0x2d6   : > { %5157 = vrot.lane.b32.xlu1 %v8931_v38, %s6713_s26  ;;  %vm10937_vm3 = vmmov %vm10918_vm1 }
 0x2d7   : > { %v9399_v26 = vpop.permute.xlu0 %5137 }
 0x2d8   : > { %10933 = vst [vmem:[#allocation111_spill] sm:$0xff] %v9399_v26  ;;  %v9404_v55 = vsel %vm10924_vm0, %v5130_v46, %v9399_v26  ;;  %v9406_v5 = vpop.permute.xlu1 %3736  ;;  %vm10939_vm0 = vmmov %vm10918_vm1 }
 0x2d9   : > { %10934 = vst [vmem:[#allocation43_spill] sm:$0xff] %v9404_v55  ;;  %5149 = vrot.lane.b32.xlu0 %v8990_v23, %s6713_s26 }
 0x2da   : > { %5173 = vrot.lane.b32.xlu1 %v9083_v8, %s6713_s26 }
 0x2db   : > { %v3713_v51 = vpop.permute.xlu0 %3712 }
 0x2dc   : > { %v9414_v63 = vsel %vm10935_vm15, %v3713_v51, %v3721_v27  ;;  %v9419_v38 = vsel %vm10918_vm1, %v9224_v7, %v3713_v51  ;;  %v9421_v46 = vpop.permute.xlu1 %3746  ;;  %vm10941_vm15 = vmmov %vm10939_vm0  ;;  %v6714_v7 = vmov 0  }
 0x2dd   : > { %5165 = vrot.lane.b32.xlu0 %v8927_v60, %s6713_s26  ;;  %v3836_v60 = vsel %vm10939_vm0, %v3727_v16, %v9368_v59  ;;  %vm10942_vm1 = vmmov %vm10939_vm0 }
 0x2de   : > { %5195 = vrot.lane.b32.xlu1 %v9013_v30, %s6713_s26  ;;  %6430 = vset.pattern.permute.xlu0 %v6714_v7 }
 0x2df   : > { %v3729_v23 = vpop.permute.xlu0 %3728 }
 0x2e0   : > { %v3837_v8 = vsel %vm10936_vm2, %v3729_v23, %v9406_v5  ;;  %v3841_v28 = vsel %vm10937_vm3, %v3721_v27, %v3729_v23  ;;  %v9432_v55 = vpop.permute.xlu1 %3762  ;;  %v3840_v27 = vsel %vm10941_vm15, %v3719_v18, %v3727_v16  ;;  %vm10943_vm2 = vcmp.lt.s32.totalorder %v10907_v0, 127  ;;  %vm10948_vm15 = vmmov %vm10939_vm0 }
 0x2e1   : > { %5193 = vrot.lane.b32.xlu0 %v9020_v29, %s6713_s26  ;;  %6281 = vmatprep.subr.msk.mxu1 %vm7205_vm4, %v3837_v8  ;;  %v3835_v29 = vsel %vm10942_vm1, %v9329_v24, %v9331_v1  ;;  %vm10945_vm3 = vmmov %vm10943_vm2  ;;  %v3839_v16 = vsel %vm10939_vm0, %v9317_v2, %v9329_v24 }
 0x2e2   : > { %6282 = vmatpush1.msk.msra.mxu1 %vm7219_vm5, %v3841_v28  ;;  %5185 = vrot.lane.b32.xlu1 %v9057_v12, %s6713_s26  ;;  %v3834_v28 = vsel %vm10948_vm15, %v9300_v10, %v9290_v50  ;;  %vm10949_vm1 = vmmov %vm10939_vm0 }
 0x2e3   : > { %v5124_v51 = vpop.permute.xlu0 %5123  ;;  %6283 = vmatprep.subr.msk.mxu1 %vm7205_vm4, %v3836_v60  ;;  %v3838_v24 = vsel %vm10949_vm1, %v9249_v4, %v9300_v10  ;;  %vm10956_vm15 = vmmov %vm10943_vm2 }
 0x2e4   : > { %v9455_v23 = vsel %vm10943_vm2, %v5124_v51, %v5132_v44  ;;  %v9460_v12 = vsel %vm10945_vm3, %v9374_v15, %v5124_v51  ;;  %6284 = vmatpush1.msk.msra.mxu1 %vm7219_vm5, %v3840_v27  ;;  %v9464_v18 = vpop.permute.xlu1 %5143  ;;  %vm10954_vm3 = vmmov %vm10939_vm0 }
 0x2e5   : > { %10944 = vst [vmem:[#allocation113_spill] sm:$0xff] %v9455_v23  ;;  %10946 = vst [vmem:[#allocation40_spill] sm:$0xff] %v9460_v12  ;;  %5183 = vrot.lane.b32.xlu0 %v9067_v32, %s6713_s26  ;;  %6285 = vmatprep.subr.msk.mxu1 %vm7205_vm4, %v3835_v29 }
 0x2e6   : > { %10947 = vst [vmem:[#allocation63_spill] sm:$0xff] %v9464_v18  ;;  %6286 = vmatpush1.msk.msra.mxu1 %vm7219_vm5, %v3839_v16  ;;  %5201 = vrot.lane.b32.xlu1 %v9017_v17, %s6713_s26  ;;  %vm10958_vm1 = vmmov %vm10939_vm0 }
 0x2e7   : > { %v5140_v32 = vpop.permute.xlu0 %5139  ;;  %6287 = vmatprep.subr.msk.mxu1 %vm7205_vm4, %v3834_v28  ;;  %vm10951_vm4 = vmmov %vm10939_vm0 }
 0x2e8   : > { %v9490_v2 = vsel %vm10943_vm2, %v5132_v44, %v5140_v32  ;;  %6288 = vmatpush1.msk.msra.mxu1 %vm7219_vm5, %v3838_v24  ;;  %v3749_v8 = vpop.permute.xlu1 %3748  ;;  %vm10952_vm5 = vmmov %vm10939_vm0 }
 0x2e9   : > { %10950 = vst [vmem:[#allocation99_spill] sm:$0xff] %v9490_v2  ;;  %5187 = vrot.lane.b32.xlu0 %v9044_v49, %s6713_s26  ;;  %6289 = vmatmul.mubr.msk.f32.vlgmr.msra.gmra.mxu1 %vm3932_vm7, %v9276_v6  ;;  %vm10959_vm2 = vmmov %vm10939_vm0 }
 0x2ea   : > { %5191 = vrot.lane.b32.xlu1 %v9032_v11, %s6713_s26  ;;  %4926 = vmatprep.mubr.f32.mxu1 %v10816_v42 }
 0x2eb   : > { %v3739_v17 = vpop.permute.xlu0 %3738 }
 0x2ec   : > { %v9504_v44 = vsel %vm10951_vm4, %v3739_v17, %v9421_v46  ;;  %v9509_v4 = vsel %vm10952_vm5, %v9290_v50, %v3739_v17  ;;  %v9511_v49 = vpop.permute.xlu1 %3764  ;;  %vm10961_vm4 = vmmov %vm10939_vm0 }
 0x2ed   : > { %5203 = vrot.lane.b32.xlu0 %v9007_v21, %s6713_s26  ;;  %vm10963_vm5 = vmmov %vm10939_vm0 }
 0x2ee   : > { %5181 = vrot.lane.b32.xlu1 %v9079_v40, %s6713_s26 }
 0x2ef   : > { %v3755_v11 = vpop.permute.xlu0 %3754 }
 0x2f0   : > { %v9517_v10 = vpop.permute.xlu1 %5145 }
 0x2f1   : > { %10953 = vst [vmem:[#allocation110_spill] sm:$0xff] %v9517_v10  ;;  %5199 = vrot.lane.b32.xlu0 %v9027_v61, %s6713_s26  ;;  %v5920_v61 = vld [vmem:[%s10344_s4] sm:$0xff] }
 0x2f2   : > { %5197 = vrot.lane.b32.xlu1 %v9037_v3, %s6713_s26 }
 0x2f3   : > { %v3741_v50 = vpop.permute.xlu0 %3740 }
 0x2f4   : > { %v9525_v60 = vsel %vm10954_vm3, %v3741_v50, %v3749_v8  ;;  %v9530_v21 = vsel %vm10939_vm0, %v9331_v1, %v3741_v50  ;;  %v9532_v40 = vpop.permute.xlu1 %3750  ;;  %vm10964_vm3 = vmmov %vm10939_vm0 }
 0x2f5   : > { %5189 = vrot.lane.b32.xlu0 %v9040_v19, %s6713_s26 }
 0x2f7   : > { %v3757_v3 = vpop.permute.xlu0 %3756 }
 0x2f8   : > { %v9539_v30 = vpop.permute.xlu1 %3766 }
 0x2f9   : > { %5923 = vperm.xlu0 %6430, %v5920_v61  }
 0x2fb   : > { %v9541_v27 = vpop.permute.xlu0 %3742 }
 0x2fc   : > { %v9543_v51 = vpop.permute.xlu1 %5147 }
 0x2fd   : > { %10955 = vst [vmem:[#allocation41_spill] sm:$0xff] %v9543_v51  ;;  %v9548_v1 = vsel %vm10956_vm15, %v5140_v32, %v9543_v51  ;;  %vm10965_vm15 = vmmov %vm10939_vm0 }
 0x2fe   : > { %10957 = vst [vmem:[#allocation62_spill] sm:$0xff] %v9548_v1 }
 0x2ff   : > { %v3759_v29 = vpop.permute.xlu0 %3758 }
 0x300   : > { %v9550_v16 = vpop.permute.xlu1 %3752  ;;  %v3820_v61 = vsel %vm10961_vm4, %v3759_v29, %v9539_v30  ;;  %v3824_v54 = vsel %vm10963_vm5, %v9532_v40, %v3759_v29  ;;  %v3818_v29 = vsel %vm10965_vm15, %v3755_v11, %v9432_v55  ;;  %vm10972_vm4 = vmmov %vm10939_vm0 }
 0x301   : > { %vm10973_vm5 = vmmov %vm10939_vm0 }
 0x302   : > { %vm10975_vm15 = vmmov %vm10939_vm0 }
 0x303   : > { %v9552_v19 = vpop.permute.xlu0 %3744 }
 0x304   : > { %v9554_v28 = vpop.permute.xlu1 %3768 }
 0x307   : > { %v3761_v24 = vpop.permute.xlu0 %3760 }
 0x308   : > { %v3821_v17 = vsel %vm10958_vm1, %v3761_v24, %v9554_v28  ;;  %v9559_v7 = vpop.permute.xlu1 %3770  ;;  %v3825_v50 = vsel %vm10959_vm2, %v9550_v16, %v3761_v24  ;;  %v3819_v24 = vsel %vm10964_vm3, %v3757_v3, %v9511_v49  ;;  %vm10966_vm1 = vmmov %vm10939_vm0  ;;  %vm10971_vm2 = vcmp.ne.s32.totalorder %v10907_v0, 0 }
 0x309   : > { %6299 = vmatprep.subr.msk.mxu1 %vm7274_vm8, %v3821_v17  ;;  %vm10974_vm3 = vmmov %vm10971_vm2 }
 0x30a   : > { %6300 = vmatpush1.msk.msra.mxu1 %vm7333_vm11, %v3825_v50  ;;  %v3823_v50 = vsel %vm10939_vm0, %v3749_v8, %v3757_v3 }
 0x30b   : > { %v9574_v18 = vpop.permute.xlu0 %3778  ;;  %6301 = vmatprep.subr.msk.mxu1 %vm7274_vm8, %v3820_v61  ;;  %v3822_v61 = vsel %vm10966_vm1, %v9421_v46, %v3755_v11  ;;  %vm10976_vm1 = vmmov %vm10971_vm2 }
 0x30c   : > { %6302 = vmatpush1.msk.msra.mxu1 %vm7333_vm11, %v3824_v54  ;;  %v9583_v17 = vpop.permute.xlu1 %3786 }
 0x30d   : > { %6303 = vmatprep.subr.msk.mxu1 %vm7274_vm8, %v3819_v24 }
 0x30e   : > { %6304 = vmatpush1.msk.msra.mxu1 %vm7333_vm11, %v3823_v50 }
 0x30f   : > { %v9597_v54 = vpop.permute.xlu0 %3772  ;;  %6305 = vmatprep.subr.msk.mxu1 %vm7274_vm8, %v3818_v29  ;;  %vm10968_vm8 = vmmov %vm10939_vm0 }
 0x310   : > { %6306 = vmatpush1.msk.msra.mxu1 %vm7333_vm11, %v3822_v61  ;;  %v9603_v8 = vpop.permute.xlu1 %3794  ;;  %vm10969_vm11 = vmmov %vm10939_vm0 }
 0x311   : > { %6307 = vmatmul.mubr.msk.f32.vlgmr.msra.gmra.mxu1 %vm3932_vm7, %v9276_v6 }
 0x312   : > { %5068 = vmatprep.mubr.f32.mxu1 %v10816_v42 }
 0x313   : > { %v9608_v3 = vpop.permute.xlu0 %3788 }
 0x314   : > { %v9610_v24 = vpop.permute.xlu1 %3780 }
 0x317   : > { %v9612_v46 = vpop.permute.xlu0 %3796 }
 0x318   : > { %v9614_v11 = vpop.permute.xlu1 %3774 }
 0x31b   : > { %v9616_v32 = vpop.permute.xlu0 %3782 }
 0x31c   : > { %v9618_v50 = vpop.permute.xlu1 %3790 }
 0x31f   : > { %v9620_v51 = vpop.permute.xlu0 %3776 }
 0x320   : > { %v3799_v29 = vpop.permute.xlu1 %3798 }
 0x321   : > { %v3864_v48 = vsel %vm10973_vm5, %v3799_v29, %v9169_v56  ;;  %vm10984_vm5 = vmmov %vm10939_vm0 }
 0x323   : > { %v3793_v61 = vpop.permute.xlu0 %3792 }
 0x324   : > { %v9622_v12 = vpop.permute.xlu1 %5125 }
 0x325   : > { %10967 = vst [vmem:[#allocation100_spill] sm:$0xff] %v9622_v12  ;;  %v3860_v12 = vsel %vm10972_vm4, %v9169_v56, %v9181_v52  ;;  %v3863_v52 = vsel %vm10975_vm15, %v9612_v46, %v9137_v20  ;;  %vm10983_vm4 = vmmov %vm10939_vm0 }
 0x326   : > { %vm10988_vm15 = vmmov %vm10939_vm0 }
 0x327   : > { %v3801_v2 = vpop.permute.xlu0 %3800 }
 0x328   : > { %v3805_v23 = vsel %vm10968_vm8, %v3793_v61, %v3801_v2  ;;  %v3865_v26 = vsel %vm10969_vm11, %v3801_v2, %v9197_v34  ;;  %v9629_v10 = vpop.permute.xlu1 %5141  ;;  %vm10977_vm8 = vmmov %vm10939_vm0 }
 0x329   : > { %6317 = vmatprep.subr.msk.mxu1 %vm7344_vm12, %v3805_v23  ;;  %6255 = vmatpush1.msk.msra.mxu0 %vm10971_vm2, %v3865_v26  ;;  %v3859_v26 = vsel %vm10939_vm0, %v9137_v20, %v9153_v62  ;;  %vm10978_vm11 = vmmov %vm10939_vm0  ;;  %v11029_v23 = vld [vmem:[#allocation59_spill] sm:$0xff] }
 0x32a   : > { %6256 = vmatprep.subr.msk.mxu0 %vm7240_vm6, %v3860_v12  ;;  %v3862_v62 = vsel %vm10978_vm11, %v9603_v8, %v9103_v35  ;;  %vm10979_vm2 = vmmov %vm10976_vm1  ;;  %v11030_v12 = vld [vmem:[#allocation57_spill] sm:$0xff] }
 0x32b   : > { %v9644_v34 = vpop.permute.xlu0 %5117  ;;  %6257 = vmatpush1.msk.msra.mxu0 %vm10974_vm3, %v3864_v48  ;;  %v3858_v48 = vsel %vm10977_vm8, %v9103_v35, %v9115_v14  ;;  %vm10985_vm3 = vmmov %vm10939_vm0 }
 0x32c   : > { %6258 = vmatprep.subr.msk.mxu0 %vm7240_vm6, %v3859_v26  ;;  %v9658_v56 = vpop.permute.xlu1 %5163  ;;  %vm10992_vm8 = vmmov %vm10939_vm0  ;;  %v11018_v26 = vld [vmem:[#allocation20_spill] sm:$0xff] }
 0x32d   : > { %6259 = vmatpush1.msk.msra.mxu0 %vm10976_vm1, %v3863_v52  ;;  %vm10991_vm1 = vmmov %vm10939_vm0 }
 0x32e   : > { %6260 = vmatprep.subr.msk.mxu0 %vm7240_vm6, %v3858_v48  ;;  %vm10982_vm6 = vmmov %vm10939_vm0  ;;  %v11027_v48 = vld [vmem:[#allocation56_spill] sm:$0xff] }
 0x32f   : > { %v9672_v20 = vpop.permute.xlu0 %5133  ;;  %6261 = vmatpush1.msk.msra.mxu0 %vm10979_vm2, %v3862_v62  ;;  %v3848_v35 = vsel %vm10982_vm6, %v9189_v39, %v9361_v37  ;;  %v3846_v39 = vsel %vm10984_vm5, %v9125_v13, %v9265_v47  ;;  %v10986_v13 = vld [vmem:[#allocation14_spill] sm:$0xff]  ;;  %v10989_v37 = vld [vmem:[#allocation15_spill] sm:$0xff]  ;;  %vm10993_vm11 = vmmov %vm10939_vm0 }
 0x330   : > { %6262 = vmatmul.mubr.msk.f32.vlgmr.msra.gmra.mxu0 %vm3932_vm7, %v9276_v6  ;;  %6272 = vmatprep.subr.msk.mxu0 %vm7303_vm9, %v9414_v63  ;;  %v9681_v14 = vpop.permute.xlu1 %5179  ;;  %v3847_v63 = vsel %vm10983_vm4, %v9161_v57, %v9315_v25  ;;  %v3829_v57 = vsel %vm10985_vm3, %v9552_v19, %v9550_v16  ;;  %vm10994_vm2 = vmmov %vm10939_vm0 }
 0x331   : > { %6273 = vmatpush1.msk.msra.mxu0 %vm7317_vm10, %v9419_v38  ;;  %4713 = vmatprep.mubr.f32.mxu0 %v10816_v42  ;;  %vm10997_vm4 = vmmov %vm10939_vm0 }
 0x332   : > { %6274 = vmatprep.subr.msk.mxu0 %vm7303_vm9, %v9366_v36  ;;  %vm10998_vm5 = vmmov %vm10939_vm0 }
 0x333   : > { %v9694_v33 = vpop.permute.xlu0 %5155  ;;  %6275 = vmatpush1.msk.msra.mxu0 %vm7317_vm10, %v3848_v35 }
 0x334   : > { %6276 = vmatprep.subr.msk.mxu0 %vm7303_vm9, %v9325_v31  ;;  %v9705_v38 = vpop.permute.xlu1 %5161  ;;  %v3833_v31 = vsel %vm10939_vm0, %v9406_v5, %v9552_v19  ;;  %v3832_v5 = vsel %vm10991_vm1, %v9368_v59, %v9541_v27  ;;  %v10999_v19 = vld [vmem:[#allocation16_spill] sm:$0xff]  ;;  %vm11005_vm1 = vmmov %vm10939_vm0 }
 0x335   : > { %6277 = vmatpush1.msk.msra.mxu0 %vm7317_vm10, %v3847_v63  ;;  %vm11000_vm3 = vnez %v10999_v19  ;;  %v11032_v63 = vld [vmem:[#allocation91_spill] sm:$0xff] }
 0x336   : > { %6278 = vmatprep.subr.msk.mxu0 %vm7303_vm9, %v9286_v58  ;;  %vm10987_vm9 = vnez %v10986_v13  ;;  %v3828_v58 = vsel %vm10988_vm15, %v9541_v27, %v9532_v40  ;;  %v3804_v27 = vsel %vm10994_vm2, %v9618_v50, %v3799_v29  ;;  %v3803_v29 = vsel %vm10939_vm0, %v9608_v3, %v9612_v46  ;;  %vm11008_vm2 = vmmov %vm10939_vm0 }
 0x337   : > { %v9720_v25 = vpop.permute.xlu0 %5171  ;;  %6279 = vmatpush1.msk.msra.mxu0 %vm7317_vm10, %v3846_v39  ;;  %vm10990_vm10 = vnez %v10989_v37  ;;  %v3816_v46 = vsel %vm11005_vm1, %v9539_v30, %v9614_v11  ;;  %v3815_v30 = vsel %vm11008_vm2, %v9511_v49, %v9597_v54  ;;  %v3814_v49 = vsel %vm10939_vm0, %v9432_v55, %v9559_v7 }
 0x338   : > { %6280 = vmatmul.mubr.msk.f32.vlgmr.msra.gmra.mxu0 %vm3932_vm7, %v9276_v6  ;;  %6290 = vmatprep.subr.msk.mxu0 %vm10987_vm9, %v3829_v57  ;;  %v9732_v47 = vpop.permute.xlu1 %5177  ;;  %vm11019_vm1 = vnez %v11018_v26  ;;  %vm11024_vm2 = vcmp.ne.s32.totalorder %v10907_v0, 127  ;;  %v11035_v57 = vld [vmem:[#allocation92_spill] sm:$0xff]  ;;  %v11065_v26 = vld [vmem:[#allocation61_spill] sm:$0xff] }
 0x339   : > { %6291 = vmatpush1.msk.msra.mxu0 %vm10990_vm10, %v3833_v31  ;;  %4855 = vmatprep.mubr.f32.mxu0 %v10816_v42 }
 0x33a   : > { %6292 = vmatprep.subr.msk.mxu0 %vm10987_vm9, %v3828_v58  ;;  %v11037_v58 = vld [vmem:[#allocation54_spill] sm:$0xff] }
 0x33b   : > { %v9747_v36 = vpop.permute.xlu0 %5153  ;;  %6293 = vmatpush1.msk.msra.mxu0 %vm10990_vm10, %v3832_v5  ;;  %v11039_v5 = vld [vmem:[#allocation95_spill] sm:$0xff] }
 0x33c   : > { %6294 = vmatprep.subr.msk.mxu0 %vm10987_vm9, %v9525_v60  ;;  %v3785_v2 = vpop.permute.xlu1 %3784  ;;  %v10995_v60 = vld [vmem:[#allocation17_spill] sm:$0xff] }
 0x33d   : > { %6295 = vmatpush1.msk.msra.mxu0 %vm10990_vm10, %v9530_v21  ;;  %v3809_v59 = vsel %vm10992_vm8, %v3785_v2, %v3793_v61  ;;  %v3813_v40 = vsel %vm10993_vm11, %v9620_v51, %v3785_v2  ;;  %vm10996_vm6 = vnez %v10995_v60  ;;  %v3817_v21 = vsel %vm10997_vm4, %v9554_v28, %v9620_v51  ;;  %v11002_v51 = vld [vmem:[#allocation19_spill] sm:$0xff]  ;;  %vm11006_vm8 = vmmov %vm10939_vm0  ;;  %v9957_v60 = vld [vmem:[%s10343_s3 + $0x10] sm:$0xff] }
 0x33e   : > { %6296 = vmatprep.subr.msk.mxu0 %vm10987_vm9, %v9504_v44  ;;  %6318 = vmatpush1.msk.msra.mxu1 %vm10996_vm6, %v3809_v59  ;;  %v3808_v44 = vsel %vm10998_vm5, %v9616_v32, %v9618_v50  ;;  %vm11001_vm9 = vmmov %vm10939_vm0  ;;  %vm11003_vm15 = vnez %v11002_v51  ;;  %v11040_v2 = vld [vmem:[#allocation55_spill] sm:$0xff] }
 0x33f   : > { %v9770_v16 = vpop.permute.xlu0 %5169  ;;  %6297 = vmatpush1.msk.msra.mxu0 %vm10990_vm10, %v9509_v4  ;;  %6319 = vmatprep.subr.msk.mxu1 %vm7344_vm12, %v3804_v27  ;;  %v3812_v28 = vsel %vm11001_vm9, %v9614_v11, %v9616_v32  ;;  %vm11004_vm10 = vmmov %vm10939_vm0  ;;  %v3802_v32 = vsel %vm11006_vm8, %v9583_v17, %v9603_v8 }
 0x340   : > { %6298 = vmatmul.mubr.msk.f32.vlgmr.msra.gmra.mxu0 %vm3932_vm7, %v9276_v6  ;;  %6308 = vmatprep.subr.msk.mxu0 %vm11000_vm3, %v3813_v40  ;;  %v9789_v4 = vpop.permute.xlu1 %5159  ;;  %v3807_v50 = vsel %vm11004_vm10, %v9610_v24, %v9608_v3  ;;  %vm11007_vm11 = vmmov %vm10939_vm0  ;;  %v11042_v40 = vld [vmem:[#allocation89_spill] sm:$0xff] }
 0x341   : > { %6309 = vmatpush1.msk.msra.mxu0 %vm11003_vm15, %v3817_v21  ;;  %6320 = vmatpush1.msk.msra.mxu1 %vm10996_vm6, %v3808_v44  ;;  %v3811_v3 = vsel %vm11007_vm11, %v9597_v54, %v9610_v24  ;;  %vm11009_vm4 = vmmov %vm10939_vm0  ;;  %v11044_v44 = vld [vmem:[#allocation90_spill] sm:$0xff] }
 0x342   : > { %6310 = vmatprep.subr.msk.mxu0 %vm11000_vm3, %v3812_v28  ;;  %6321 = vmatprep.subr.msk.mxu1 %vm7344_vm12, %v3803_v29  ;;  %v3806_v8 = vsel %vm11009_vm4, %v9574_v18, %v9583_v17  ;;  %vm11010_vm5 = vmmov %vm10939_vm0  ;;  %v11046_v29 = vld [vmem:[#allocation52_spill] sm:$0xff] }
 0x343   : > { %v9823_v61 = vpop.permute.xlu0 %5151  ;;  %6311 = vmatpush1.msk.msra.mxu0 %vm11003_vm15, %v3816_v46  ;;  %6322 = vmatpush1.msk.msra.mxu1 %vm10996_vm6, %v3807_v50  ;;  %v3810_v11 = vsel %vm11010_vm5, %v9559_v7, %v9574_v18  ;;  %v11013_v7 = vld [vmem:[#allocation18_spill] sm:$0xff] }
 0x344   : > { %6312 = vmatprep.subr.msk.mxu0 %vm11000_vm3, %v3811_v3  ;;  %6323 = vmatprep.subr.msk.mxu1 %vm7344_vm12, %v3802_v32  ;;  %v9841_v24 = vpop.permute.xlu1 %5175  ;;  %vm11011_vm12 = vcmp.lt.s32.totalorder %v10907_v0, 127  ;;  %v11049_v50 = vld [vmem:[#allocation62_spill] sm:$0xff]  ;;  %v11053_v3 = vld [vmem:[#allocation111_spill] sm:$0xff]  ;;  %v4073_v0 = vpop.f32.mrf.mxu1 }
 0x345   : > { %6313 = vmatpush1.msk.msra.mxu0 %vm11003_vm15, %v3815_v30  ;;  %6324 = vmatpush1.msk.msra.mxu1 %vm10996_vm6, %v3806_v8  ;;  %v5252_v18 = vsel %vm11011_vm12, %v9237_v45, %v9374_v15  ;;  %vm11012_vm6 = vmmov %vm11011_vm12  ;;  %v11050_v46 = vld [vmem:[#allocation22_spill] sm:$0xff] }
 0x346   : > { %6314 = vmatprep.subr.msk.mxu0 %vm11000_vm3, %v3810_v11  ;;  %4997 = vmatprep.mubr.f32.mxu0 %v10816_v42  ;;  %v5256_v55 = vsel %vm11012_vm6, %v9205_v43, %v9237_v45  ;;  %vm11014_vm3 = vnez %v11013_v7  ;;  %vm11015_vm9 = vmmov %vm11012_vm6  ;;  %v11052_v32 = vld [vmem:[#allocation110_spill] sm:$0xff]  ;;  %v11055_v11 = vld [vmem:[#allocation113_spill] sm:$0xff] }
 0x347   : > { %v9862_v1 = vpop.permute.xlu0 %5167  ;;  %6315 = vmatpush1.msk.msra.mxu0 %vm11003_vm15, %v3814_v49  ;;  %6325 = vmatmul.mubr.msk.f32.vlgmr.msra.gmra.mxu1 %vm3932_vm7, %v9276_v6  ;;  %v5260_v15 = vsel %vm11015_vm9, %v9222_v9, %v9205_v43  ;;  %vm11016_vm15 = vmmov %vm11012_vm6  ;;  %v11022_v43 = vld [vmem:[#allocation93_spill] sm:$0xff]  ;;  %v11056_v49 = vld [vmem:[#allocation23_spill] sm:$0xff] }
 0x348   : > { %6336 = vmatprep.subr.msk.mxu1 %vm11014_vm3, %v5252_v18  ;;  %6316 = vmatmul.mubr.msk.f32.vlgmr.msra.gmra.mxu0 %vm3932_vm7, %v9276_v6  ;;  %v9880_v17 = vpop.permute.xlu1 %5157  ;;  %v5264_v54 = vsel %vm11016_vm15, %v9211_v53, %v9222_v9  ;;  %vm11017_vm10 = vmmov %vm11012_vm6  ;;  %v11020_v6 = vld [vmem:[#allocation21_spill] sm:$0xff]  ;;  %v11025_v9 = vld [vmem:[#allocation94_spill] sm:$0xff] }
 0x349   : > { %v5251_v45 = vsel %vm11017_vm10, %v9199_v41, %v9380_v22  ;;  %6327 = vmatprep.subr.msk.mxu0 %vm11019_vm1, %v5260_v15  ;;  %vm11021_vm8 = vnez %v11020_v6  ;;  %vm11023_vm11 = vmmov %vm11012_vm6  ;;  %5471 = vmatprep.mubr.f32.mxu1 %v10816_v42  ;;  %v11058_v18 = vld [vmem:[#allocation99_spill] sm:$0xff]  ;;  %v11061_v7 = vld [vmem:[#allocation40_spill] sm:$0xff] }
 0x34a   : > { %6337 = vmatpush1.msk.msra.mxu1 %vm11021_vm8, %v5256_v55  ;;  %v5255_v52 = vsel %vm11023_vm11, %v11022_v43, %v9199_v41  ;;  %6328 = vmatpush1.msk.msra.mxu0 %vm11024_vm2, %v5264_v54  ;;  %vm11026_vm4 = vmmov %vm11012_vm6  ;;  %v11059_v55 = vld [vmem:[#allocation24_spill] sm:$0xff]  ;;  %v11062_v15 = vld [vmem:[#allocation26_spill] sm:$0xff] }
 0x34b   : > { %6338 = vmatprep.subr.msk.mxu1 %vm11014_vm3, %v5251_v45  ;;  %v5259_v22 = vsel %vm11026_vm4, %v11025_v9, %v11022_v43  ;;  %vm11028_vm5 = vmmov %vm11026_vm4  ;;  %v9914_v35 = vpop.permute.xlu0 %5149  ;;  %5400 = vmatprep.mubr.f32.mxu0 %v10816_v42  ;;  %v11064_v45 = vld [vmem:[#allocation63_spill] sm:$0xff] }
 0x34c   : > { %v5263_v62 = vsel %vm11028_vm5, %v11027_v48, %v11025_v9  ;;  %vm11031_vm0 = vmmov %vm11026_vm4  ;;  %6339 = vmatpush1.msk.msra.mxu1 %vm11021_vm8, %v5255_v52  ;;  %6329 = vmatprep.subr.msk.mxu0 %vm11019_vm1, %v5259_v22  ;;  %v9932_v13 = vpop.permute.xlu1 %5173  ;;  %vm11051_vm5 = vnez %v11050_v46  ;;  %v11067_v43 = vld [vmem:[#allocation43_spill] sm:$0xff]  ;;  %v11068_v52 = vld [vmem:[#allocation60_spill] sm:$0xff] }
 0x34d   : > { %v5250_v41 = vsel %vm11031_vm0, %v11030_v12, %v11029_v23  ;;  %vm11033_vm12 = vmmov %vm11031_vm0  ;;  %v11069_v9 = vld [vmem:[#allocation98_spill] sm:$0xff] }
 0x34e   : > { %v5254_v39 = vsel %vm11033_vm12, %v11032_v63, %v11030_v12  ;;  %vm11034_vm6 = vmmov %vm11024_vm2  ;;  %6340 = vmatprep.subr.msk.mxu1 %vm11014_vm3, %v5250_v41  ;;  %vm11060_vm12 = vnez %v11059_v55  ;;  %v11071_v23 = vld [vmem:[#allocation58_spill] sm:$0xff]  ;;  %v11072_v12 = vld [vmem:[#allocation97_spill] sm:$0xff] }
 0x34f   : > { %6330 = vmatpush1.msk.msra.mxu0 %vm11034_vm6, %v5263_v62  ;;  %vm11036_vm9 = vmmov %vm11031_vm0  ;;  %6341 = vmatpush1.msk.msra.mxu1 %vm11021_vm8, %v5254_v39  ;;  %v9959_v21 = vpop.permute.xlu0 %5165  ;;  %vm11063_vm6 = vnez %v11062_v15  ;;  %v11073_v41 = vld [vmem:[#allocation100_spill] sm:$0xff] }
 0x350   : > { %v5258_v31 = vsel %vm11036_vm9, %v11035_v57, %v11032_v63  ;;  %vm11038_vm15 = vmmov %vm11031_vm0  ;;  %v9975_v51 = vpop.permute.xlu1 %5195  ;;  %v11075_v39 = vld [vmem:[#allocation96_spill] sm:$0xff] }
 0x351   : > { %v5262_v37 = vsel %vm11038_vm15, %v11037_v58, %v11035_v57  ;;  %vm11041_vm10 = vmmov %vm11031_vm0  ;;  %6331 = vmatprep.subr.msk.mxu0 %vm11019_vm1, %v5258_v31 }
 0x352   : > { %v5249_v59 = vsel %vm11041_vm10, %v11040_v2, %v11039_v5  ;;  %vm11043_vm11 = vmmov %vm11031_vm0  ;;  %6332 = vmatpush1.msk.msra.mxu0 %vm11024_vm2, %v5262_v37 }
 0x353   : > { %v5253_v27 = vsel %vm11043_vm11, %v11042_v40, %v11040_v2  ;;  %6342 = vmatprep.subr.msk.mxu1 %vm11014_vm3, %v5249_v59  ;;  %vm11045_vm4 = vmmov %vm11031_vm0  ;;  %v9990_v8 = vpop.permute.xlu0 %5193  ;;  %v11081_v59 = vld [vmem:[#allocation25_spill] sm:$0xff] }
 0x354   : > { %6343 = vmatpush1.msk.msra.mxu1 %vm11021_vm8, %v5253_v27  ;;  %v5257_v19 = vsel %vm11045_vm4, %v11044_v44, %v11042_v40  ;;  %vm11047_vm3 = vmmov %vm11031_vm0  ;;  %v10003_v54 = vpop.permute.xlu1 %5185  ;;  %v11083_v27 = vld [vmem:[#allocation41_spill] sm:$0xff] }
 0x355   : > { %v5261_v28 = vsel %vm11047_vm3, %v11046_v29, %v11044_v44  ;;  %6333 = vmatprep.subr.msk.mxu0 %vm11019_vm1, %v5257_v19  ;;  %vm11048_vm8 = vmmov %vm11024_vm2  ;;  %6344 = vmatmul.mubr.msk.f32.vlgmr.msra.gmra.mxu1 %vm3932_vm7, %v9957_v60 }
 0x356   : > { %6334 = vmatpush1.msk.msra.mxu0 %vm11048_vm8, %v5261_v28  ;;  %6354 = vmatprep.subr.msk.mxu1 %vm11051_vm5, %v11049_v50  ;;  %vm11054_vm1 = vmmov %vm11031_vm0  ;;  %vm11057_vm0 = vnez %v11056_v49  ;;  %v11085_v28 = vld [vmem:[#allocation27_spill] sm:$0xff] }
 0x357   : > { %6335 = vmatmul.mubr.msk.f32.vlgmr.msra.gmra.mxu0 %vm3932_vm7, %v9957_v60  ;;  %v5235_v30 = vsel %vm11054_vm1, %v11053_v3, %v11052_v32  ;;  %6345 = vmatprep.subr.msk.mxu0 %vm11057_vm0, %v11055_v11  ;;  %vm11066_vm9 = vmmov %vm11054_vm1  ;;  %v10024_v62 = vpop.permute.xlu0 %5183  ;;  %v5232_v44 = vsel %vm11054_vm1, %v11083_v27, %v9694_v33 }
 0x358   : > { %6355 = vmatpush1.msk.msra.mxu1 %vm11060_vm12, %v11058_v18  ;;  %6346 = vmatpush1.msk.msra.mxu0 %vm11063_vm6, %v11061_v7  ;;  %v5234_v6 = vsel %vm11066_vm9, %v11065_v26, %v11064_v45  ;;  %vm11070_vm15 = vmmov %vm11054_vm1  ;;  %v10041_v57 = vpop.permute.xlu1 %5201  ;;  %v11110_v7 = vld [vmem:[#allocation32_spill] sm:$0xff] }
 0x359   : > { %6356 = vmatprep.subr.msk.mxu1 %vm11051_vm5, %v5235_v30  ;;  %6347 = vmatprep.subr.msk.mxu0 %vm11057_vm0, %v11068_v52  ;;  %v5233_v22 = vsel %vm11070_vm15, %v9672_v20, %v9629_v10  ;;  %vm11074_vm10 = vmmov %vm11054_vm1 }
 0x35a   : > { %6357 = vmatpush1.msk.msra.mxu1 %vm11060_vm12, %v11067_v43  ;;  %6348 = vmatpush1.msk.msra.mxu0 %vm11063_vm6, %v11069_v9  ;;  %v5237_v63 = vsel %vm11074_vm10, %v11073_v41, %v9672_v20  ;;  %vm11076_vm11 = vmmov %vm11054_vm1 }
 0x35b   : > { %6358 = vmatprep.subr.msk.mxu1 %vm11051_vm5, %v5234_v6  ;;  %6349 = vmatprep.subr.msk.mxu0 %vm11057_vm0, %v11071_v23  ;;  %v5241_v31 = vsel %vm11076_vm11, %v9644_v34, %v11073_v41  ;;  %vm11077_vm2 = vmmov %vm11054_vm1  ;;  %v5188_v2 = vpop.permute.xlu0 %5187 }
 0x35c   : > { %6359 = vmatpush1.msk.msra.mxu1 %vm11060_vm12, %v11072_v12  ;;  %6350 = vmatpush1.msk.msra.mxu0 %vm11063_vm6, %v11075_v39  ;;  %v5245_v20 = vsel %vm11077_vm2, %v11039_v5, %v9644_v34  ;;  %vm11078_vm4 = vmmov %vm11054_vm1  ;;  %v5192_v40 = vpop.permute.xlu1 %5191 }
 0x35d   : > { %6360 = vmatprep.subr.msk.mxu1 %vm11051_vm5, %v5233_v22  ;;  %5613 = vmatprep.mubr.f32.mxu1 %v10816_v42  ;;  %v5220_v37 = vsel %vm11078_vm4, %v9720_v25, %v9681_v14  ;;  %vm11079_vm3 = vmmov %vm11054_vm1  ;;  %vm11082_vm5 = vnez %v11081_v59 }
 0x35e   : > { %6361 = vmatpush1.msk.msra.mxu1 %vm11060_vm12, %v5237_v63  ;;  %6351 = vmatprep.subr.msk.mxu0 %vm11057_vm0, %v5241_v31  ;;  %v5228_v34 = vsel %vm11079_vm3, %v9694_v33, %v9658_v56  ;;  %vm11080_vm8 = vmmov %vm11054_vm1  ;;  %vm11086_vm12 = vnez %v11085_v28 }
 0x35f   : > { %5542 = vmatprep.mubr.f32.mxu0 %v10816_v42  ;;  %6352 = vmatpush1.msk.msra.mxu0 %vm11063_vm6, %v5245_v20  ;;  %v5224_v5 = vsel %vm11080_vm8, %v9658_v56, %v9720_v25  ;;  %vm11084_vm0 = vmmov %vm11054_vm1  ;;  %v11087_v56 = vld [vmem:[#allocation28_spill] sm:$0xff] }
 0x360   : > { %6362 = vmatmul.mubr.msk.f32.vlgmr.msra.gmra.mxu1 %vm3932_vm7, %v9957_v60  ;;  %6372 = vmatprep.subr.msk.mxu1 %vm11082_vm5, %v5220_v37  ;;  %v5219_v19 = vsel %vm11084_vm0, %v9770_v16, %v9732_v47  ;;  %vm11088_vm6 = vnez %v11087_v56  ;;  %vm11089_vm9 = vmmov %vm11084_vm0  ;;  %v5210_v6 = vsel %vm11084_vm0, %v10024_v62, %v5192_v40 }
 0x361   : > { %6353 = vmatmul.mubr.msk.f32.vlgmr.msra.gmra.mxu0 %vm3932_vm7, %v9957_v60  ;;  %6363 = vmatprep.subr.msk.mxu0 %vm11086_vm12, %v5228_v34  ;;  %v5227_v25 = vsel %vm11089_vm9, %v9747_v36, %v9705_v38  ;;  %vm11090_vm15 = vmmov %vm11084_vm0 }
 0x362   : > { %6373 = vmatpush1.msk.msra.mxu1 %vm11088_vm6, %v5224_v5  ;;  %v5223_v33 = vsel %vm11090_vm15, %v9705_v38, %v9770_v16  ;;  %6364 = vmatpush1.msk.msra.mxu0 %vm7705_vm13, %v5232_v44  ;;  %vm11092_vm10 = vmmov %vm11084_vm0  ;;  %v5204_v38 = vpop.permute.xlu0 %5203 }
 0x363   : > { %6374 = vmatprep.subr.msk.mxu1 %vm11082_vm5, %v5219_v19  ;;  %v5231_v46 = vsel %vm11092_vm10, %v11052_v32, %v9747_v36  ;;  %vm11093_vm11 = vmmov %vm11084_vm0  ;;  %6365 = vmatprep.subr.msk.mxu0 %vm11086_vm12, %v5227_v25 }
 0x364   : > { %v5218_v3 = vsel %vm11093_vm11, %v9862_v1, %v9841_v24  ;;  %6375 = vmatpush1.msk.msra.mxu1 %vm11088_vm6, %v5223_v33  ;;  %vm11094_vm2 = vmmov %vm11084_vm0  ;;  %6366 = vmatpush1.msk.msra.mxu0 %vm7705_vm13, %v5231_v46 }
 0x365   : > { %v5226_v16 = vsel %vm11094_vm2, %v9823_v61, %v9789_v4  ;;  %vm11095_vm4 = vmmov %vm11084_vm0  ;;  %6376 = vmatprep.subr.msk.mxu1 %vm11082_vm5, %v5218_v3  ;;  %5755 = vmatprep.mubr.f32.mxu1 %v10816_v42 }
 0x366   : > { %v5222_v36 = vsel %vm11095_vm4, %v9789_v4, %v9862_v1  ;;  %vm11096_vm3 = vmmov %vm11084_vm0  ;;  %6367 = vmatprep.subr.msk.mxu0 %vm11086_vm12, %v5226_v16  ;;  %v5182_v4 = vpop.permute.xlu1 %5181  ;;  %5684 = vmatprep.mubr.f32.mxu0 %v10816_v42  ;;  %vm11111_vm4 = vnez %v11110_v7 }
 0x367   : > { %v5230_v32 = vsel %vm11096_vm3, %v11064_v45, %v9823_v61  ;;  %vm11097_vm8 = vmmov %vm11084_vm0  ;;  %6377 = vmatpush1.msk.msra.mxu1 %vm11088_vm6, %v5222_v36  ;;  %v5225_v61 = vsel %vm11084_vm0, %v9914_v35, %v9880_v17 }
 0x368   : > { %v5217_v30 = vsel %vm11097_vm8, %v9959_v21, %v9932_v13  ;;  %vm11098_vm1 = vmmov %vm11084_vm0  ;;  %6368 = vmatpush1.msk.msra.mxu0 %vm7705_vm13, %v5230_v32 }
 0x369   : > { %v5221_v1 = vsel %vm11098_vm1, %v9880_v17, %v9959_v21  ;;  %6378 = vmatprep.subr.msk.mxu1 %vm11082_vm5, %v5217_v30  ;;  %vm11099_vm9 = vmmov %vm11084_vm0  ;;  %v5200_v21 = vpop.permute.xlu0 %5199  ;;  %6369 = vmatprep.subr.msk.mxu0 %vm11086_vm12, %v5225_v61 }
 0x36a   : > { %v5268_v11 = vsel %vm11099_vm9, %v5204_v38, %v9211_v53  ;;  %6379 = vmatpush1.msk.msra.mxu1 %vm11088_vm6, %v5221_v1  ;;  %vm11100_vm15 = vmmov %vm11084_vm0  ;;  %v5198_v45 = vpop.permute.xlu1 %5197 }
 0x36b   : > { %v5229_v49 = vsel %vm11100_vm15, %v9629_v10, %v9914_v35  ;;  %6380 = vmatmul.mubr.msk.f32.vlgmr.msra.gmra.mxu1 %vm3932_vm7, %v9957_v60  ;;  %vm11101_vm5 = vmmov %vm11084_vm0  ;;  %v11103_v10 = vld [vmem:[#allocation29_spill] sm:$0xff] }
 0x36c   : > { %6370 = vmatpush1.msk.msra.mxu0 %vm7705_vm13, %v5229_v49  ;;  %v5212_v53 = vsel %vm11101_vm5, %v5188_v2, %v9975_v51  ;;  %vm11102_vm6 = vmmov %vm11084_vm0  ;;  %vm11104_vm10 = vnez %v11103_v10  ;;  %5897 = vmatprep.mubr.f32.mxu1 %v10816_v42 }
 0x36d   : > { %v5208_v17 = vsel %vm11102_vm6, %v9975_v51, %v5204_v38  ;;  %6390 = vmatprep.subr.msk.mxu1 %vm11104_vm10, %v5268_v11  ;;  %6371 = vmatmul.mubr.msk.f32.vlgmr.msra.gmra.mxu0 %vm3932_vm7, %v9957_v60  ;;  %vm11105_vm13 = vmmov %vm11084_vm0  ;;  %v11108_v51 = vld [vmem:[#allocation31_spill] sm:$0xff]  ;;  %v5190_v15 = vpop.permute.xlu0 %5189 }
 0x36e   : > { %v5216_v35 = vsel %vm11105_vm13, %v9681_v14, %v5188_v2  ;;  %vm11106_vm12 = vmmov %vm11084_vm0  ;;  %vm11109_vm2 = vnez %v11108_v51  ;;  %6391 = vmatpush1.msk.msra.mxu1 %vm11111_vm4, %v5208_v17  ;;  %5826 = vmatprep.mubr.f32.mxu0 %v10816_v42 }
 0x36f   : > { %v5267_v18 = vsel %vm11106_vm12, %v10041_v57, %v11027_v48  ;;  %vm11107_vm11 = vmmov %vm11084_vm0  ;;  %6381 = vmatprep.subr.msk.mxu0 %vm11109_vm2, %v5212_v53 }
 0x370   : > { %v5266_v55 = vsel %vm11107_vm11, %v5200_v21, %v11037_v58  ;;  %vm11112_vm3 = vmmov %vm11084_vm0  ;;  %6382 = vmatpush1.msk.msra.mxu0 %vm7782_vm14, %v5216_v35  ;;  %6392 = vmatprep.subr.msk.mxu1 %vm11104_vm10, %v5267_v18 }
 0x371   : > { %v5211_v14 = vsel %vm11112_vm3, %v10003_v54, %v9990_v8  ;;  %vm11113_vm8 = vmmov %vm11084_vm0 }
 0x372   : > { %v5207_v48 = vsel %vm11113_vm8, %v9990_v8, %v10041_v57  ;;  %vm11115_vm1 = vmmov %vm11084_vm0  ;;  %6383 = vmatprep.subr.msk.mxu0 %vm11109_vm2, %v5211_v14 }
 0x373   : > { %v5215_v58 = vsel %vm11115_vm1, %v9732_v47, %v10003_v54  ;;  %6393 = vmatpush1.msk.msra.mxu1 %vm11111_vm4, %v5207_v48  ;;  %vm11116_vm9 = vmmov %vm11084_vm0 }
 0x374   : > { %v5206_v8 = vsel %vm11116_vm9, %v5192_v40, %v5200_v21  ;;  %6384 = vmatpush1.msk.msra.mxu0 %vm7782_vm14, %v5215_v58  ;;  %6394 = vmatprep.subr.msk.mxu1 %vm11104_vm10, %v5266_v55  ;;  %vm11117_vm15 = vmmov %vm11084_vm0  ;;  %v10277_v32 = vpop.permute.xlu0 %5923 }
 0x375   : > { %v5209_v47 = vsel %vm11117_vm15, %v5182_v4, %v5190_v15  ;;  %vm11118_vm5 = vmmov %vm11084_vm0  ;;  %6385 = vmatprep.subr.msk.mxu0 %vm11109_vm2, %v5210_v6  ;;  %6395 = vmatpush1.msk.msra.mxu1 %vm11111_vm4, %v5206_v8 }
 0x376   : > { %v5265_v54 = vsel %vm11118_vm5, %v5198_v45, %v11046_v29  ;;  %vm11119_vm6 = vmmov %vm11084_vm0 }
 0x377   : > { %v5214_v43 = vsel %vm11119_vm6, %v9841_v24, %v10024_v62  ;;  %vm11120_vm13 = vmmov %vm11084_vm0  ;;  %6396 = vmatprep.subr.msk.mxu1 %vm11104_vm10, %v5265_v54  ;;  %v4075_v24 = vpop.f32.mrf.mxu1 }
 0x378   : > { %v5205_v52 = vsel %vm11120_vm13, %v5190_v15, %v5198_v45  ;;  %6386 = vmatpush1.msk.msra.mxu0 %vm7782_vm14, %v5214_v43  ;;  %vm11121_vm12 = vmmov %vm11084_vm0 }
 0x379   : > { %v5213_v29 = vsel %vm11121_vm12, %v9932_v13, %v5182_v4  ;;  %6387 = vmatprep.subr.msk.mxu0 %vm11109_vm2, %v5209_v47  ;;  %6397 = vmatpush1.msk.msra.mxu1 %vm11111_vm4, %v5205_v52  ;;  %v4002_v13 = vpop.f32.mrf.mxu0  ;;  %v4215_v9 = vpop.f32.mrf.mxu1 }
 0x37a   : > { %6388 = vmatpush1.msk.msra.mxu0 %vm7782_vm14, %v5213_v29  ;;  %6398 = vmatmul.mubr.msk.f32.vlgmr.msra.gmra.mxu1 %vm3932_vm7, %v9957_v60 }
 0x37b   : > { %6389 = vmatmul.mubr.msk.f32.vlgmr.msra.gmra.mxu0 %vm3932_vm7, %v9957_v60  ;;  %v4004_v22 = vpop.f32.mrf.mxu0  ;;  %v4217_v62 = vpop.f32.mrf.mxu1 }
 0x37d   : > { %v4144_v23 = vpop.f32.mrf.mxu0  ;;  %v10253_v12 = vpop.f32.mrf.mxu1 }
 0x37f   : > { %v4146_v41 = vpop.f32.mrf.mxu0  ;;  %v10257_v39 = vpop.f32.mrf.mxu1 }
 0x381   : > { %v10255_v63 = vpop.f32.mrf.mxu0  ;;  %v10261_v42 = vpop.f32.mrf.mxu1 }
 0x383   : > { %v10259_v57 = vpop.f32.mrf.mxu0  ;;  %v10265_v60 = vpop.f32.mrf.mxu1 }
 0x385   : > { %v10263_v31 = vpop.f32.mrf.mxu0  ;;  %v4644_v37 = vpop.f32.mrf.mxu1 }
 0x386   : > { %v4645_v3 = vadd.f32 %v4644_v37, %v4073_v0 }
 0x387   : > { %v10267_v20 = vpop.f32.mrf.mxu0  ;;  %v4646_v34 = vpop.f32.mrf.mxu1 }
 0x388   : > { %v4647_v30 = vadd.f32 %v4646_v34, %v4075_v24 }
 0x3a9   : > { %v4786_v59 = vpop.f32.mrf.mxu1 }
 0x3aa   : > { %v4787_v51 = vadd.f32 %v4786_v59, %v4215_v9 }
 0x3ab   : > { %v4788_v27 = vpop.f32.mrf.mxu1 }
 0x3ac   : > { %v4789_v45 = vadd.f32 %v4788_v27, %v4217_v62 }
 0x3d1   : > { %v4928_v19 = vpop.f32.mrf.mxu1 }
 0x3d2   : > { %v4929_v24 = vadd.f32 %v4928_v19, %v10253_v12 }
 0x3d3   : > { %v4930_v56 = vpop.f32.mrf.mxu1 }
 0x3f0   : > { %v4573_v2 = vpop.f32.mrf.mxu0 }
 0x3f1   : > { %v4574_v16 = vadd.f32 %v4573_v2, %v4002_v13 }
 0x3f2   : > { %v4575_v5 = vpop.f32.mrf.mxu0 }
 0x3f3   : > { %v4576_v61 = vadd.f32 %v4575_v5, %v4004_v22  ;;  %v4931_v22 = vadd.f32 %v4930_v56, %v10257_v39 }
 0x3f8   : > { %v4715_v40 = vpop.f32.mrf.mxu0 }
 0x3f9   : > { %v4716_v7 = vadd.f32 %v4715_v40, %v4144_v23 }
 0x3fa   : > { %v4717_v44 = vpop.f32.mrf.mxu0 }
 0x3fb   : > { %v4718_v26 = vadd.f32 %v4717_v44, %v4146_v41 }
 0x400   : > { %v4857_v28 = vpop.f32.mrf.mxu0 }
 0x401   : > { %v4858_v13 = vadd.f32 %v4857_v28, %v10255_v63 }
 0x402   : > { %v4859_v25 = vpop.f32.mrf.mxu0 }
 0x403   : > { %v4860_v41 = vadd.f32 %v4859_v25, %v10259_v57 }
 0x407   : > { %v10269_v33 = vpop.f32.mrf.mxu1 }
 0x408   : > { %v10271_v50 = vpop.f32.mrf.mxu0  ;;  %v5071_v27 = vadd.f32 %v10269_v33, %v10261_v42 }
 0x409   : > { %v10273_v46 = vpop.f32.mrf.mxu1  ;;  %v5000_v57 = vadd.f32 %v10271_v50, %v10263_v31 }
 0x40a   : > { %v10275_v38 = vpop.f32.mrf.mxu0  ;;  %v5073_v25 = vadd.f32 %v10273_v46, %v10265_v60 }
 0x40b   : > { %v5002_v19 = vadd.f32 %v10275_v38, %v10267_v20 }
 0x415   : > { %v5473_v36 = vpop.f32.mrf.mxu1 }
 0x416   : > { %v5906_v4 = vadd.f32 %v5473_v36, %v4645_v3 }
 0x417   : > { %v5402_v1 = vpop.f32.mrf.mxu0  ;;  %v5475_v21 = vpop.f32.mrf.mxu1 }
 0x418   : > { %v5904_v11 = vadd.f32 %v5402_v1, %v4574_v16  ;;  %v5928_v49 = vadd.f32 %v10277_v32, %v5906_v4  ;;  %v5907_v53 = vadd.f32 %v5475_v21, %v4647_v30 }
 0x419   : > { %v5404_v17 = vpop.f32.mrf.mxu0 }
 0x41a   : > { %v5926_v10 = vadd.f32 %v10277_v32, %v5904_v11  ;;  %v5905_v35 = vadd.f32 %v5404_v17, %v4576_v61  ;;  %5944 = vst [vmem:[%s10284_s14 + $0x10] sm:$0xff] %v5928_v49  ;;  %v5929_v18 = vadd.f32 %v10277_v32, %v5907_v53 }
 0x41c   : > { %5942 = vst [vmem:[%s10284_s14] sm:$0xff] %v5926_v10  ;;  %v5927_v55 = vadd.f32 %v10277_v32, %v5905_v35  ;;  %5945 = vst [vmem:[%s10284_s14 + $0x18] sm:$0xff] %v5929_v18 }
 0x41e   : > { %5943 = vst [vmem:[%s10284_s14 + $0x8] sm:$0xff] %v5927_v55 }
 0x420   : > { %v5615_v15 = vpop.f32.mrf.mxu1 }
 0x421   : > { %v5910_v14 = vadd.f32 %v5615_v15, %v4787_v51  ;;  %v5544_v48 = vpop.f32.mrf.mxu0 }
 0x422   : > { %v5908_v58 = vadd.f32 %v5544_v48, %v4716_v7  ;;  %v5617_v6 = vpop.f32.mrf.mxu1 }
 0x423   : > { %v5932_v8 = vadd.f32 %v10277_v32, %v5910_v14  ;;  %v5911_v47 = vadd.f32 %v5617_v6, %v4789_v45  ;;  %v5546_v54 = vpop.f32.mrf.mxu0 }
 0x424   : > { %v5930_v43 = vadd.f32 %v10277_v32, %v5908_v58  ;;  %v5909_v52 = vadd.f32 %v5546_v54, %v4718_v26 }
 0x425   : > { %5948 = vst [vmem:[%s10284_s14 + $0x30] sm:$0xff] %v5932_v8  ;;  %v5933_v29 = vadd.f32 %v10277_v32, %v5911_v47 }
 0x426   : > { %5946 = vst [vmem:[%s10284_s14 + $0x20] sm:$0xff] %v5930_v43  ;;  %v5931_v0 = vadd.f32 %v10277_v32, %v5909_v52 }
 0x427   : > { %5949 = vst [vmem:[%s10284_s14 + $0x38] sm:$0xff] %v5933_v29 }
 0x428   : > { %5947 = vst [vmem:[%s10284_s14 + $0x28] sm:$0xff] %v5931_v0 }
 0x42b   : > { %v5757_v9 = vpop.f32.mrf.mxu1 }
 0x42c   : > { %v5914_v62 = vadd.f32 %v5757_v9, %v4929_v24 }
 0x42d   : > { %v5686_v23 = vpop.f32.mrf.mxu0  ;;  %v5759_v2 = vpop.f32.mrf.mxu1 }
 0x42e   : > { %v5912_v37 = vadd.f32 %v5686_v23, %v4858_v13  ;;  %v5936_v34 = vadd.f32 %v10277_v32, %v5914_v62  ;;  %v5915_v5 = vadd.f32 %v5759_v2, %v4931_v22 }
 0x42f   : > { %v5688_v59 = vpop.f32.mrf.mxu0 }
 0x430   : > { %v5934_v12 = vadd.f32 %v10277_v32, %v5912_v37  ;;  %v5913_v40 = vadd.f32 %v5688_v59, %v4860_v41  ;;  %5952 = vst [vmem:[%s10284_s14 + $0x50] sm:$0xff] %v5936_v34  ;;  %v5937_v63 = vadd.f32 %v10277_v32, %v5915_v5 }
 0x432   : > { %5950 = vst [vmem:[%s10284_s14 + $0x40] sm:$0xff] %v5934_v12  ;;  %v5935_v39 = vadd.f32 %v10277_v32, %v5913_v40  ;;  %5953 = vst [vmem:[%s10284_s14 + $0x58] sm:$0xff] %v5937_v63 }
 0x434   : > { %5951 = vst [vmem:[%s10284_s14 + $0x48] sm:$0xff] %v5935_v39 }
 0x43a   : > { %v5899_v56 = vpop.f32.mrf.mxu1 }
 0x43b   : > { %v5828_v44 = vpop.f32.mrf.mxu0  ;;  %v5918_v16 = vadd.f32 %v5899_v56, %v5071_v27 }
 0x43c   : > { %v5916_v28 = vadd.f32 %v5828_v44, %v5000_v57  ;;  %v5901_v50 = vpop.f32.mrf.mxu1 }
 0x43d   : > { %v5830_v3 = vpop.f32.mrf.mxu0  ;;  %v5940_v30 = vadd.f32 %v10277_v32, %v5918_v16  ;;  %v5919_v42 = vadd.f32 %v5901_v50, %v5073_v25 }
 0x43e   : > { %v5938_v36 = vadd.f32 %v10277_v32, %v5916_v28  ;;  %v5917_v31 = vadd.f32 %v5830_v3, %v5002_v19 }
 0x43f   : > { %5956 = vst [vmem:[%s10284_s14 + $0x70] sm:$0xff] %v5940_v30  ;;  %v5941_v20 = vadd.f32 %v10277_v32, %v5919_v42 }
 0x440   : > { %5954 = vst [vmem:[%s10284_s14 + $0x60] sm:$0xff] %v5938_v36  ;;  %v5939_v33 = vadd.f32 %v10277_v32, %v5917_v31 }
 0x441   : > { %5957 = vst [vmem:[%s10284_s14 + $0x78] sm:$0xff] %v5941_v20 }
 0x442   : > { %5955 = vst [vmem:[%s10284_s14 + $0x68] sm:$0xff] %v5939_v33 }
 0x443 PF: > { %p12_p9 = scmp.ge.s32.totalorder %s6762_s22, 4   ;;  %s11122_s18 = smov %s6705_s19 }
 0x444   : > { %s11123_s19 = smov %s6771_s25  ;;  %s11124_s20 = smov %s6762_s22 }
 0x445   :  { %14 = sbr.rel (!%p12_p9) target bundleno = 2 (0x2), region = 105 }

</bundles_post_ra>
